<compile_context>
chip_gen: v5e
topology: v5e:2x2
jax: 0.10.0
libtpu: 0.0.40
codegen_flags: <defaults>
</compile_context>

<pallas_src>
import jax
import jax.numpy as jnp
from jax import lax
from jax.experimental import pallas as pl
from jax.experimental.pallas import tpu as pltpu


def _round_up(x, m):
    return ((x + m - 1) // m) * m


def _sigmoid(x):
    # One EUP op (tanh) instead of exp + reciprocal -> lower EUP pressure.
    return 0.5 * jnp.tanh(0.5 * x) + 0.5


# ---------------------------------------------------------------------------
# Fused multi-layer LSTM: one gridless pallas_call; layer-outer / time-inner.
# Gate order matches PyTorch nn.LSTM: i, f, g, o (columns of the fused 4H dim).
# ---------------------------------------------------------------------------
def _make_lstm_stack_kernel(nlayers, seq_len, batch_p, hidden, unroll):
    L, T, Bp, H = nlayers, seq_len, batch_p, hidden

    def kernel(*refs):
        x_ref, h0_ref, c0_ref = refs[0], refs[1], refs[2]
        w_refs = refs[3:3 + 3 * L]
        y_ref = refs[3 + 3 * L]          # (T*Bp, H) f32  (returned `output`)
        ybf_ref = refs[3 + 3 * L + 1]    # (T*Bp, H) bf16 (decoder input / layer feed)
        h_ref = refs[3 + 3 * L + 2]      # (L, Bp, H) f32 final h
        c_ref = refs[3 + 3 * L + 3]      # (L, Bp, H) f32 final c
        gx_ref = refs[3 + 3 * L + 4]     # (T*Bp, 4H) f32 scratch (input projections)

        for l in range(L):
            wih = w_refs[3 * l][...]       # (in_l, 4H) bf16
            whh = w_refs[3 * l + 1][...]   # (H,    4H) bf16
            b = w_refs[3 * l + 2][...]     # (1,    4H) f32

            # --- Hoisted input projection: one big matmul with M = T*Bp. ---
            xin = x_ref[...] if l == 0 else ybf_ref[...]          # (T*Bp, in_l) bf16
            gx_ref[...] = (jnp.dot(xin, wih, preferred_element_type=jnp.float32)
                           + b)                                    # (T*Bp, 4H) f32

            last_layer = (l == L - 1)

            # --- Serial recurrence: only (Bp, H) @ (H, 4H) on the critical path. ---
            def step(t, carry, whh=whh, last_layer=last_layer):
                h_prev, c_prev = carry                             # (Bp, H) f32
                row = pl.multiple_of(t * Bp, Bp)
                gates = (gx_ref[pl.ds(row, Bp), :]
                         + jnp.dot(h_prev.astype(jnp.bfloat16), whh,
                                   preferred_element_type=jnp.float32))  # (Bp, 4H)

                i_g = _sigmoid(gates[:, 0 * H:1 * H])
                f_g = _sigmoid(gates[:, 1 * H:2 * H])
                g_g = jnp.tanh(gates[:, 2 * H:3 * H])
                o_g = _sigmoid(gates[:, 3 * H:4 * H])

                c_new = f_g * c_prev + i_g * g_g                   # f32 cell state
                h_new = o_g * jnp.tanh(c_new)

                ybf_ref[pl.ds(row, Bp), :] = h_new.astype(jnp.bfloat16)
                if last_layer:
                    y_ref[pl.ds(row, Bp), :] = h_new
                return (h_new, c_new)

            h_last, c_last = lax.fori_loop(
                0, T, step, (h0_ref[l], c0_ref[l]), unroll=unroll)
            h_ref[l] = h_last
            c_ref[l] = c_last

    return kernel


def lstm_stack(x_emb, h0, c0, layer_weights):
    """x_emb: (T, B, E) f32, h0/c0: (L, B, H) f32.
    Returns (y_flat f32 (T*Bp, H), ybf_flat bf16 (T*Bp, H), hT, cT (L, Bp, H), Bp)."""
    T, B, E = x_emb.shape
    L, _, H = h0.shape

    # Pad batch to a multiple of 16 sublanes (bf16 packs 16 rows per vreg).
    Bp = max(_round_up(B, 16), 16)
    if Bp != B:
        x_emb = jnp.pad(x_emb, ((0, 0), (0, Bp - B), (0, 0)))
        h0 = jnp.pad(h0, ((0, 0), (0, Bp - B), (0, 0)))
        c0 = jnp.pad(c0, ((0, 0), (0, Bp - B), (0, 0)))
    x_flat = x_emb.astype(jnp.bfloat16).reshape(T * Bp, E)

    args = [x_flat, h0, c0]
    for wih, whh, b in layer_weights:
        args.extend([wih, whh, b])

    # Size the scoped-VMEM limit to the actual resident working set.
    resident = sum(int(a.size) * a.dtype.itemsize for a in args)
    resident += T * Bp * H * (4 + 2)          # y (f32) + ybf (bf16) outputs
    resident += 2 * L * Bp * H * 4            # final h / c outputs
    resident += T * Bp * 4 * H * 4            # gx scratch
    vmem_limit = int(min(max(2 * resident + (4 << 20), 32 << 20), 64 << 20))

    kernel = _make_lstm_stack_kernel(L, T, Bp, H, unroll=(T <= 32))
    y_flat, ybf_flat, hT, cT = pl.pallas_call(
        kernel,
        out_shape=[
            jax.ShapeDtypeStruct((T * Bp, H), jnp.float32),
            jax.ShapeDtypeStruct((T * Bp, H), jnp.bfloat16),
            jax.ShapeDtypeStruct((L, Bp, H), jnp.float32),
            jax.ShapeDtypeStruct((L, Bp, H), jnp.float32),
        ],
        scratch_shapes=[pltpu.VMEM((T * Bp, 4 * H), jnp.float32)],
        compiler_params=pltpu.CompilerParams(vmem_limit_bytes=vmem_limit),
    )(*args)
    return y_flat, ybf_flat, hT, cT, Bp


# ---------------------------------------------------------------------------
# Decoder (nn.Linear): y = x @ W^T + b, tiled over (vocab, rows) with the row
# axis innermost so each (H, tv) weight tile is DMA'd from HBM exactly once.
# ---------------------------------------------------------------------------
_DEC_TN = 256     # row tile
_DEC_TV = 1024    # vocab (lane) tile


def _dec_tiles(vocab):
    tv = min(_DEC_TV, _round_up(vocab, 128))
    vp = _round_up(vocab, tv)
    return tv, vp


def _decoder_kernel(x_ref, w_ref, b_ref, o_ref):
    o_ref[...] = (jnp.dot(x_ref[...], w_ref[...],
                          preferred_element_type=jnp.float32) + b_ref[...])


def decoder_linear(x_bf16, w_pad_bf16, b_pad):
    """x: (N, H) bf16, w: (H, Vp) bf16 (pre-padded at init), b: (1, Vp) f32.
    Returns (Np, Vp) f32; caller slices to (N, V)."""
    N, H = x_bf16.shape
    Vp = w_pad_bf16.shape[1]
    tv = min(_DEC_TV, Vp)                      # Vp is a multiple of tv (by init)

    tn = min(_DEC_TN, _round_up(N, 8))
    Np = _round_up(N, tn)
    if Np != N:
        x_bf16 = jnp.pad(x_bf16, ((0, Np - N), (0, 0)))

    vmem_need = 2 * (tn * H * 2 + H * tv * 2 + tv * 4 + tn * tv * 4)
    out = pl.pallas_call(
        _decoder_kernel,
        # Vocab is the slow (outer) axis, rows the fast (inner) axis: the
        # weight block index (0, j) is constant across consecutive steps.
        grid=(Vp // tv, Np // tn),
        in_specs=[
            pl.BlockSpec((tn, H), lambda j, i: (i, 0)),
            pl.BlockSpec((H, tv), lambda j, i: (0, j)),
            pl.BlockSpec((1, tv), lambda j, i: (0, j)),
        ],
        out_specs=pl.BlockSpec((tn, tv), lambda j, i: (i, j)),
        out_shape=jax.ShapeDtypeStruct((Np, Vp), jnp.float32),
        compiler_params=pltpu.CompilerParams(
            dimension_semantics=("parallel", "parallel"),
            vmem_limit_bytes=int(min(max(vmem_need + (4 << 20), 32 << 20),
                                     64 << 20))),
    )(x_bf16, w_pad_bf16, b_pad)
    return out


# ---------------------------------------------------------------------------
# Parameter construction (mirrors module __init__ shapes / init_weights)
# ---------------------------------------------------------------------------
def init_params(key, vocab, emb_size, hidden_size, nlayers):
    initrange = 0.1
    k_enc, k_dec, k_lstm = jax.random.split(key, 3)

    params = {}
    # nn.Embedding(len(dictionary), embedding_size), uniform(-0.1, 0.1)
    params["encoder"] = jax.random.uniform(
        k_enc, (vocab, emb_size), jnp.float32, -initrange, initrange)

    # nn.LSTM default init U(-1/sqrt(H), 1/sqrt(H)), gate order i|f|g|o
    stdv = 1.0 / (hidden_size ** 0.5)
    layers = []
    lkeys = jax.random.split(k_lstm, nlayers)
    for l in range(nlayers):
        in_dim = emb_size if l == 0 else hidden_size
        k1, k2, k3, k4 = jax.random.split(lkeys[l], 4)
        w_ih = jax.random.uniform(k1, (4 * hidden_size, in_dim), jnp.float32, -stdv, stdv)
        w_hh = jax.random.uniform(k2, (4 * hidden_size, hidden_size), jnp.float32, -stdv, stdv)
        b_ih = jax.random.uniform(k3, (4 * hidden_size,), jnp.float32, -stdv, stdv)
        b_hh = jax.random.uniform(k4, (4 * hidden_size,), jnp.float32, -stdv, stdv)
        # Fused-gate layout for the kernel: (in_dim, 4H), (H, 4H), (1, 4H).
        wih_t = w_ih.T.astype(jnp.bfloat16)                 # (in_dim, 4H)
        whh_t = w_hh.T.astype(jnp.bfloat16)                 # (H, 4H)
        bias = (b_ih + b_hh).reshape(1, 4 * hidden_size)    # f32
        layers.append((wih_t, whh_t, bias))
    params["lstm"] = layers

    # nn.Linear(hidden_size, len(dictionary)); weight U(-0.1, 0.1), bias 0.
    # Pre-pad the vocab dim to the decoder tile and pre-cast to bf16 ONCE.
    dec_w = jax.random.uniform(k_dec, (vocab, hidden_size), jnp.float32,
                               -initrange, initrange)
    tv, vp = _dec_tiles(vocab)
    del tv
    dec_w_t = dec_w.T                                       # (H, V) f32
    params["dec_w_t_bf16"] = jnp.pad(
        dec_w_t, ((0, 0), (0, vp - vocab))).astype(jnp.bfloat16)   # (H, Vp) bf16
    params["dec_b_pad"] = jnp.zeros((1, vp), jnp.float32)          # bias = 0
    params["vocab"] = vocab
    return params


# ---------------------------------------------------------------------------
# Full forward pass (nout=None path of LanguageModel.forward)
# ---------------------------------------------------------------------------
def language_model_forward(params, tokens, hidden):
    h0, c0 = hidden                          # each (nlayers, B, H) f32
    T, B = tokens.shape
    L, _, H = h0.shape
    V = params["vocab"]

    emb = params["encoder"][tokens]          # (T, B, E) embedding gather (glue)
    # drop(emb): identity at inference.

    y_flat, ybf_flat, hT, cT, Bp = lstm_stack(emb, h0, c0, params["lstm"])
    output = y_flat.reshape(T, Bp, H)[:, :B, :]          # (T, B, H) f32
    # drop(output): identity at inference; proj is None (nout=None).

    decoded_p = decoder_linear(ybf_flat, params["dec_w_t_bf16"], params["dec_b_pad"])
    decoded = decoded_p[:T * Bp].reshape(T, Bp, -1)[:, :B, :V]

    hT = hT[:, :B, :]
    cT = cT[:, :B, :]
    return decoded, output, (hT, cT)


def init_hidden(nlayers, bsz, hidden_size):
    z = jnp.zeros((nlayers, bsz, hidden_size), jnp.float32)
    return (z, z)


if __name__ == "__main__":
    VOCAB = 64
    EMB = 32
    HIDDEN = 32
    NLAYERS = 2
    SEQ = 8
    BATCH = 4

    key = jax.random.PRNGKey(0)
    k_params, k_tokens = jax.random.split(key)

    params = init_params(k_params, VOCAB, EMB, HIDDEN, NLAYERS)
    tokens = jax.random.randint(k_tokens, (SEQ, BATCH), 0, VOCAB, jnp.int32)
    hidden = init_hidden(NLAYERS, BATCH, HIDDEN)

    decoded, output, new_hidden = language_model_forward(params, tokens, hidden)
    jax.block_until_ready((decoded, output, new_hidden))

    assert decoded.shape == (SEQ, BATCH, VOCAB)
    assert output.shape == (SEQ, BATCH, HIDDEN)
    assert new_hidden[0].shape == (NLAYERS, BATCH, HIDDEN)
    assert new_hidden[1].shape == (NLAYERS, BATCH, HIDDEN)
    assert bool(jnp.all(jnp.isfinite(decoded)))
    assert bool(jnp.all(jnp.isfinite(output)))
    assert bool(jnp.all(jnp.isfinite(new_hidden[0])))
    assert bool(jnp.all(jnp.isfinite(new_hidden[1])))

    print("KERNEL_OK")
</pallas_src>

<mosaic_0001>
module attributes {stable_mosaic.version = 11 : i64} {
  func.func @kernel(%arg0: memref<128x32xbf16, #tpu.memory_space<vmem>>, %arg1: memref<2x16x32xf32, #tpu.memory_space<vmem>>, %arg2: memref<2x16x32xf32, #tpu.memory_space<vmem>>, %arg3: memref<32x128xbf16, #tpu.memory_space<vmem>>, %arg4: memref<32x128xbf16, #tpu.memory_space<vmem>>, %arg5: memref<1x128xf32, #tpu.memory_space<vmem>>, %arg6: memref<32x128xbf16, #tpu.memory_space<vmem>>, %arg7: memref<32x128xbf16, #tpu.memory_space<vmem>>, %arg8: memref<1x128xf32, #tpu.memory_space<vmem>>, %arg9: memref<128x32xf32, #tpu.memory_space<vmem>>, %arg10: memref<128x32xbf16, #tpu.memory_space<vmem>>, %arg11: memref<2x16x32xf32, #tpu.memory_space<vmem>>, %arg12: memref<2x16x32xf32, #tpu.memory_space<vmem>>, %arg13: memref<128x128xf32, #tpu.memory_space<vmem>>) attributes {dimension_semantics = [], scalar_prefetch = 0 : i64, scratch_operands = 1 : i64, tpu.core_type = #tpu.core_type<tc>} {
    %c0 = arith.constant 0 : index
    %c0_0 = arith.constant 0 : index
    %0 = vector.load %arg3[%c0, %c0_0] : memref<32x128xbf16, #tpu.memory_space<vmem>>, vector<32x128xbf16>
    %c0_1 = arith.constant 0 : index
    %c0_2 = arith.constant 0 : index
    %1 = vector.load %arg4[%c0_1, %c0_2] : memref<32x128xbf16, #tpu.memory_space<vmem>>, vector<32x128xbf16>
    %c0_3 = arith.constant 0 : index
    %c0_4 = arith.constant 0 : index
    %2 = vector.load %arg5[%c0_3, %c0_4] : memref<1x128xf32, #tpu.memory_space<vmem>>, vector<1x128xf32>
    %c0_5 = arith.constant 0 : index
    %c0_6 = arith.constant 0 : index
    %3 = vector.load %arg0[%c0_5, %c0_6] : memref<128x32xbf16, #tpu.memory_space<vmem>>, vector<128x32xbf16>
    %cst = arith.constant dense<0.000000e+00> : vector<128x128xf32>
    %4 = tpu.matmul %3, %0, %cst {dimension_numbers = #tpu.dot_dimension_numbers<[1], [0], [0], [1], [0, 0, 1, 1], [], []>} : vector<128x32xbf16>, vector<32x128xbf16>, vector<128x128xf32> -> vector<128x128xf32>
    %5 = vector.broadcast %2 : vector<1x128xf32> to vector<128x128xf32>
    %6 = arith.addf %4, %5 : vector<128x128xf32>
    %c0_7 = arith.constant 0 : index
    %c0_8 = arith.constant 0 : index
    %7 = vector.load %arg13[%c0_7, %c0_8] : memref<128x128xf32, #tpu.memory_space<vmem>>, vector<128x128xf32>
    tpu.vector_store %arg13[%c0_7, %c0_8], %6 {strides = array<i32>} : memref<128x128xf32, #tpu.memory_space<vmem>>, vector<128x128xf32>,
    %c0_9 = arith.constant 0 : index
    %c0_10 = arith.constant 0 : index
    %c0_11 = arith.constant 0 : index
    %8 = vector.load %arg1[%c0_9, %c0_10, %c0_11] : memref<2x16x32xf32, #tpu.memory_space<vmem>>, vector<1x16x32xf32>
    %9 = vector.shape_cast %8 : vector<1x16x32xf32> to vector<16x32xf32>
    %c0_12 = arith.constant 0 : index
    %c0_13 = arith.constant 0 : index
    %c0_14 = arith.constant 0 : index
    %10 = vector.load %arg2[%c0_12, %c0_13, %c0_14] : memref<2x16x32xf32, #tpu.memory_space<vmem>>, vector<1x16x32xf32>
    %11 = vector.shape_cast %10 : vector<1x16x32xf32> to vector<16x32xf32>
    %c0_i32 = arith.constant 0 : i32
    %c16_i32 = arith.constant 16 : i32
    %12 = arith.muli %c0_i32, %c16_i32 : i32
    %13 = tpu.assume_multiple %12, 16 : i32
    %14 = arith.index_cast %13 : i32 to index
    %c0_15 = arith.constant 0 : index
    %15 = vector.load %arg13[%14, %c0_15] : memref<128x128xf32, #tpu.memory_space<vmem>>, vector<16x128xf32>
    %16 = arith.truncf %9 : vector<16x32xf32> to vector<16x32xbf16>
    %cst_16 = arith.constant dense<0.000000e+00> : vector<16x128xf32>
    %17 = tpu.matmul %16, %1, %cst_16 {dimension_numbers = #tpu.dot_dimension_numbers<[1], [0], [0], [1], [0, 0, 1, 1], [], []>} : vector<16x32xbf16>, vector<32x128xbf16>, vector<16x128xf32> -> vector<16x128xf32>
    %18 = arith.addf %15, %17 : vector<16x128xf32>
    %19 = vector.extract_strided_slice %18 {offsets = [0, 0], sizes = [16, 32], strides = [1, 1]} : vector<16x128xf32> to vector<16x32xf32>
    %cst_17 = arith.constant 5.000000e-01 : f32
    %20 = vector.broadcast %cst_17 : f32 to vector<16x32xf32>
    %21 = arith.mulf %20, %19 : vector<16x32xf32>
    %22 = math.tanh %21 : vector<16x32xf32>
    %cst_18 = arith.constant 5.000000e-01 : f32
    %23 = vector.broadcast %cst_18 : f32 to vector<16x32xf32>
    %24 = arith.mulf %23, %22 : vector<16x32xf32>
    %cst_19 = arith.constant 5.000000e-01 : f32
    %25 = vector.broadcast %cst_19 : f32 to vector<16x32xf32>
    %26 = arith.addf %24, %25 : vector<16x32xf32>
    %27 = vector.extract_strided_slice %18 {offsets = [0, 32], sizes = [16, 32], strides = [1, 1]} : vector<16x128xf32> to vector<16x32xf32>
    %cst_20 = arith.constant 5.000000e-01 : f32
    %28 = vector.broadcast %cst_20 : f32 to vector<16x32xf32>
    %29 = arith.mulf %28, %27 : vector<16x32xf32>
    %30 = math.tanh %29 : vector<16x32xf32>
    %cst_21 = arith.constant 5.000000e-01 : f32
    %31 = vector.broadcast %cst_21 : f32 to vector<16x32xf32>
    %32 = arith.mulf %31, %30 : vector<16x32xf32>
    %cst_22 = arith.constant 5.000000e-01 : f32
    %33 = vector.broadcast %cst_22 : f32 to vector<16x32xf32>
    %34 = arith.addf %32, %33 : vector<16x32xf32>
    %35 = vector.extract_strided_slice %18 {offsets = [0, 64], sizes = [16, 32], strides = [1, 1]} : vector<16x128xf32> to vector<16x32xf32>
    %36 = math.tanh %35 : vector<16x32xf32>
    %37 = vector.extract_strided_slice %18 {offsets = [0, 96], sizes = [16, 32], strides = [1, 1]} : vector<16x128xf32> to vector<16x32xf32>
    %cst_23 = arith.constant 5.000000e-01 : f32
    %38 = vector.broadcast %cst_23 : f32 to vector<16x32xf32>
    %39 = arith.mulf %38, %37 : vector<16x32xf32>
    %40 = math.tanh %39 : vector<16x32xf32>
    %cst_24 = arith.constant 5.000000e-01 : f32
    %41 = vector.broadcast %cst_24 : f32 to vector<16x32xf32>
    %42 = arith.mulf %41, %40 : vector<16x32xf32>
    %cst_25 = arith.constant 5.000000e-01 : f32
    %43 = vector.broadcast %cst_25 : f32 to vector<16x32xf32>
    %44 = arith.addf %42, %43 : vector<16x32xf32>
    %45 = arith.mulf %34, %11 : vector<16x32xf32>
    %46 = arith.mulf %26, %36 : vector<16x32xf32>
    %47 = arith.addf %45, %46 : vector<16x32xf32>
    %48 = math.tanh %47 : vector<16x32xf32>
    %49 = arith.mulf %44, %48 : vector<16x32xf32>
    %50 = arith.truncf %49 : vector<16x32xf32> to vector<16x32xbf16>
    %51 = arith.index_cast %13 : i32 to index
    %c0_26 = arith.constant 0 : index
    %52 = vector.load %arg10[%51, %c0_26] : memref<128x32xbf16, #tpu.memory_space<vmem>>, vector<16x32xbf16>
    tpu.vector_store %arg10[%51, %c0_26], %50 {strides = array<i32>} : memref<128x32xbf16, #tpu.memory_space<vmem>>, vector<16x32xbf16>,
    %c1_i32 = arith.constant 1 : i32
    %c16_i32_27 = arith.constant 16 : i32
    %53 = arith.muli %c1_i32, %c16_i32_27 : i32
    %54 = tpu.assume_multiple %53, 16 : i32
    %55 = arith.index_cast %54 : i32 to index
    %c0_28 = arith.constant 0 : index
    %56 = vector.load %arg13[%55, %c0_28] : memref<128x128xf32, #tpu.memory_space<vmem>>, vector<16x128xf32>
    %57 = arith.truncf %49 : vector<16x32xf32> to vector<16x32xbf16>
    %cst_29 = arith.constant dense<0.000000e+00> : vector<16x128xf32>
    %58 = tpu.matmul %57, %1, %cst_29 {dimension_numbers = #tpu.dot_dimension_numbers<[1], [0], [0], [1], [0, 0, 1, 1], [], []>} : vector<16x32xbf16>, vector<32x128xbf16>, vector<16x128xf32> -> vector<16x128xf32>
    %59 = arith.addf %56, %58 : vector<16x128xf32>
    %60 = vector.extract_strided_slice %59 {offsets = [0, 0], sizes = [16, 32], strides = [1, 1]} : vector<16x128xf32> to vector<16x32xf32>
    %cst_30 = arith.constant 5.000000e-01 : f32
    %61 = vector.broadcast %cst_30 : f32 to vector<16x32xf32>
    %62 = arith.mulf %61, %60 : vector<16x32xf32>
    %63 = math.tanh %62 : vector<16x32xf32>
    %cst_31 = arith.constant 5.000000e-01 : f32
    %64 = vector.broadcast %cst_31 : f32 to vector<16x32xf32>
    %65 = arith.mulf %64, %63 : vector<16x32xf32>
    %cst_32 = arith.constant 5.000000e-01 : f32
    %66 = vector.broadcast %cst_32 : f32 to vector<16x32xf32>
    %67 = arith.addf %65, %66 : vector<16x32xf32>
    %68 = vector.extract_strided_slice %59 {offsets = [0, 32], sizes = [16, 32], strides = [1, 1]} : vector<16x128xf32> to vector<16x32xf32>
    %cst_33 = arith.constant 5.000000e-01 : f32
    %69 = vector.broadcast %cst_33 : f32 to vector<16x32xf32>
    %70 = arith.mulf %69, %68 : vector<16x32xf32>
    %71 = math.tanh %70 : vector<16x32xf32>
    %cst_34 = arith.constant 5.000000e-01 : f32
    %72 = vector.broadcast %cst_34 : f32 to vector<16x32xf32>
    %73 = arith.mulf %72, %71 : vector<16x32xf32>
    %cst_35 = arith.constant 5.000000e-01 : f32
    %74 = vector.broadcast %cst_35 : f32 to vector<16x32xf32>
    %75 = arith.addf %73, %74 : vector<16x32xf32>
    %76 = vector.extract_strided_slice %59 {offsets = [0, 64], sizes = [16, 32], strides = [1, 1]} : vector<16x128xf32> to vector<16x32xf32>
    %77 = math.tanh %76 : vector<16x32xf32>
    %78 = vector.extract_strided_slice %59 {offsets = [0, 96], sizes = [16, 32], strides = [1, 1]} : vector<16x128xf32> to vector<16x32xf32>
    %cst_36 = arith.constant 5.000000e-01 : f32
    %79 = vector.broadcast %cst_36 : f32 to vector<16x32xf32>
    %80 = arith.mulf %79, %78 : vector<16x32xf32>
    %81 = math.tanh %80 : vector<16x32xf32>
    %cst_37 = arith.constant 5.000000e-01 : f32
    %82 = vector.broadcast %cst_37 : f32 to vector<16x32xf32>
    %83 = arith.mulf %82, %81 : vector<16x32xf32>
    %cst_38 = arith.constant 5.000000e-01 : f32
    %84 = vector.broadcast %cst_38 : f32 to vector<16x32xf32>
    %85 = arith.addf %83, %84 : vector<16x32xf32>
    %86 = arith.mulf %75, %47 : vector<16x32xf32>
    %87 = arith.mulf %67, %77 : vector<16x32xf32>
    %88 = arith.addf %86, %87 : vector<16x32xf32>
    %89 = math.tanh %88 : vector<16x32xf32>
    %90 = arith.mulf %85, %89 : vector<16x32xf32>
    %91 = arith.truncf %90 : vector<16x32xf32> to vector<16x32xbf16>
    %92 = arith.index_cast %54 : i32 to index
    %c0_39 = arith.constant 0 : index
    %93 = vector.load %arg10[%92, %c0_39] : memref<128x32xbf16, #tpu.memory_space<vmem>>, vector<16x32xbf16>
    tpu.vector_store %arg10[%92, %c0_39], %91 {strides = array<i32>} : memref<128x32xbf16, #tpu.memory_space<vmem>>, vector<16x32xbf16>,
    %c2_i32 = arith.constant 2 : i32
    %c16_i32_40 = arith.constant 16 : i32
    %94 = arith.muli %c2_i32, %c16_i32_40 : i32
    %95 = tpu.assume_multiple %94, 16 : i32
    %96 = arith.index_cast %95 : i32 to index
    %c0_41 = arith.constant 0 : index
    %97 = vector.load %arg13[%96, %c0_41] : memref<128x128xf32, #tpu.memory_space<vmem>>, vector<16x128xf32>
    %98 = arith.truncf %90 : vector<16x32xf32> to vector<16x32xbf16>
    %cst_42 = arith.constant dense<0.000000e+00> : vector<16x128xf32>
    %99 = tpu.matmul %98, %1, %cst_42 {dimension_numbers = #tpu.dot_dimension_numbers<[1], [0], [0], [1], [0, 0, 1, 1], [], []>} : vector<16x32xbf16>, vector<32x128xbf16>, vector<16x128xf32> -> vector<16x128xf32>
    %100 = arith.addf %97, %99 : vector<16x128xf32>
    %101 = vector.extract_strided_slice %100 {offsets = [0, 0], sizes = [16, 32], strides = [1, 1]} : vector<16x128xf32> to vector<16x32xf32>
    %cst_43 = arith.constant 5.000000e-01 : f32
    %102 = vector.broadcast %cst_43 : f32 to vector<16x32xf32>
    %103 = arith.mulf %102, %101 : vector<16x32xf32>
    %104 = math.tanh %103 : vector<16x32xf32>
    %cst_44 = arith.constant 5.000000e-01 : f32
    %105 = vector.broadcast %cst_44 : f32 to vector<16x32xf32>
    %106 = arith.mulf %105, %104 : vector<16x32xf32>
    %cst_45 = arith.constant 5.000000e-01 : f32
    %107 = vector.broadcast %cst_45 : f32 to vector<16x32xf32>
    %108 = arith.addf %106, %107 : vector<16x32xf32>
    %109 = vector.extract_strided_slice %100 {offsets = [0, 32], sizes = [16, 32], strides = [1, 1]} : vector<16x128xf32> to vector<16x32xf32>
    %cst_46 = arith.constant 5.000000e-01 : f32
    %110 = vector.broadcast %cst_46 : f32 to vector<16x32xf32>
    %111 = arith.mulf %110, %109 : vector<16x32xf32>
    %112 = math.tanh %111 : vector<16x32xf32>
    %cst_47 = arith.constant 5.000000e-01 : f32
    %113 = vector.broadcast %cst_47 : f32 to vector<16x32xf32>
    %114 = arith.mulf %113, %112 : vector<16x32xf32>
    %cst_48 = arith.constant 5.000000e-01 : f32
    %115 = vector.broadcast %cst_48 : f32 to vector<16x32xf32>
    %116 = arith.addf %114, %115 : vector<16x32xf32>
    %117 = vector.extract_strided_slice %100 {offsets = [0, 64], sizes = [16, 32], strides = [1, 1]} : vector<16x128xf32> to vector<16x32xf32>
    %118 = math.tanh %117 : vector<16x32xf32>
    %119 = vector.extract_strided_slice %100 {offsets = [0, 96], sizes = [16, 32], strides = [1, 1]} : vector<16x128xf32> to vector<16x32xf32>
    %cst_49 = arith.constant 5.000000e-01 : f32
    %120 = vector.broadcast %cst_49 : f32 to vector<16x32xf32>
    %121 = arith.mulf %120, %119 : vector<16x32xf32>
    %122 = math.tanh %121 : vector<16x32xf32>
    %cst_50 = arith.constant 5.000000e-01 : f32
    %123 = vector.broadcast %cst_50 : f32 to vector<16x32xf32>
    %124 = arith.mulf %123, %122 : vector<16x32xf32>
    %cst_51 = arith.constant 5.000000e-01 : f32
    %125 = vector.broadcast %cst_51 : f32 to vector<16x32xf32>
    %126 = arith.addf %124, %125 : vector<16x32xf32>
    %127 = arith.mulf %116, %88 : vector<16x32xf32>
    %128 = arith.mulf %108, %118 : vector<16x32xf32>
    %129 = arith.addf %127, %128 : vector<16x32xf32>
    %130 = math.tanh %129 : vector<16x32xf32>
    %131 = arith.mulf %126, %130 : vector<16x32xf32>
    %132 = arith.truncf %131 : vector<16x32xf32> to vector<16x32xbf16>
    %133 = arith.index_cast %95 : i32 to index
    %c0_52 = arith.constant 0 : index
    %134 = vector.load %arg10[%133, %c0_52] : memref<128x32xbf16, #tpu.memory_space<vmem>>, vector<16x32xbf16>
    tpu.vector_store %arg10[%133, %c0_52], %132 {strides = array<i32>} : memref<128x32xbf16, #tpu.memory_space<vmem>>, vector<16x32xbf16>,
    %c3_i32 = arith.constant 3 : i32
    %c16_i32_53 = arith.constant 16 : i32
    %135 = arith.muli %c3_i32, %c16_i32_53 : i32
    %136 = tpu.assume_multiple %135, 16 : i32
    %137 = arith.index_cast %136 : i32 to index
    %c0_54 = arith.constant 0 : index
    %138 = vector.load %arg13[%137, %c0_54] : memref<128x128xf32, #tpu.memory_space<vmem>>, vector<16x128xf32>
    %139 = arith.truncf %131 : vector<16x32xf32> to vector<16x32xbf16>
    %cst_55 = arith.constant dense<0.000000e+00> : vector<16x128xf32>
    %140 = tpu.matmul %139, %1, %cst_55 {dimension_numbers = #tpu.dot_dimension_numbers<[1], [0], [0], [1], [0, 0, 1, 1], [], []>} : vector<16x32xbf16>, vector<32x128xbf16>, vector<16x128xf32> -> vector<16x128xf32>
    %141 = arith.addf %138, %140 : vector<16x128xf32>
    %142 = vector.extract_strided_slice %141 {offsets = [0, 0], sizes = [16, 32], strides = [1, 1]} : vector<16x128xf32> to vector<16x32xf32>
    %cst_56 = arith.constant 5.000000e-01 : f32
    %143 = vector.broadcast %cst_56 : f32 to vector<16x32xf32>
    %144 = arith.mulf %143, %142 : vector<16x32xf32>
    %145 = math.tanh %144 : vector<16x32xf32>
    %cst_57 = arith.constant 5.000000e-01 : f32
    %146 = vector.broadcast %cst_57 : f32 to vector<16x32xf32>
    %147 = arith.mulf %146, %145 : vector<16x32xf32>
    %cst_58 = arith.constant 5.000000e-01 : f32
    %148 = vector.broadcast %cst_58 : f32 to vector<16x32xf32>
    %149 = arith.addf %147, %148 : vector<16x32xf32>
    %150 = vector.extract_strided_slice %141 {offsets = [0, 32], sizes = [16, 32], strides = [1, 1]} : vector<16x128xf32> to vector<16x32xf32>
    %cst_59 = arith.constant 5.000000e-01 : f32
    %151 = vector.broadcast %cst_59 : f32 to vector<16x32xf32>
    %152 = arith.mulf %151, %150 : vector<16x32xf32>
    %153 = math.tanh %152 : vector<16x32xf32>
    %cst_60 = arith.constant 5.000000e-01 : f32
    %154 = vector.broadcast %cst_60 : f32 to vector<16x32xf32>
    %155 = arith.mulf %154, %153 : vector<16x32xf32>
    %cst_61 = arith.constant 5.000000e-01 : f32
    %156 = vector.broadcast %cst_61 : f32 to vector<16x32xf32>
    %157 = arith.addf %155, %156 : vector<16x32xf32>
    %158 = vector.extract_strided_slice %141 {offsets = [0, 64], sizes = [16, 32], strides = [1, 1]} : vector<16x128xf32> to vector<16x32xf32>
    %159 = math.tanh %158 : vector<16x32xf32>
    %160 = vector.extract_strided_slice %141 {offsets = [0, 96], sizes = [16, 32], strides = [1, 1]} : vector<16x128xf32> to vector<16x32xf32>
    %cst_62 = arith.constant 5.000000e-01 : f32
    %161 = vector.broadcast %cst_62 : f32 to vector<16x32xf32>
    %162 = arith.mulf %161, %160 : vector<16x32xf32>
    %163 = math.tanh %162 : vector<16x32xf32>
    %cst_63 = arith.constant 5.000000e-01 : f32
    %164 = vector.broadcast %cst_63 : f32 to vector<16x32xf32>
    %165 = arith.mulf %164, %163 : vector<16x32xf32>
    %cst_64 = arith.constant 5.000000e-01 : f32
    %166 = vector.broadcast %cst_64 : f32 to vector<16x32xf32>
    %167 = arith.addf %165, %166 : vector<16x32xf32>
    %168 = arith.mulf %157, %129 : vector<16x32xf32>
    %169 = arith.mulf %149, %159 : vector<16x32xf32>
    %170 = arith.addf %168, %169 : vector<16x32xf32>
    %171 = math.tanh %170 : vector<16x32xf32>
    %172 = arith.mulf %167, %171 : vector<16x32xf32>
    %173 = arith.truncf %172 : vector<16x32xf32> to vector<16x32xbf16>
    %174 = arith.index_cast %136 : i32 to index
    %c0_65 = arith.constant 0 : index
    %175 = vector.load %arg10[%174, %c0_65] : memref<128x32xbf16, #tpu.memory_space<vmem>>, vector<16x32xbf16>
    tpu.vector_store %arg10[%174, %c0_65], %173 {strides = array<i32>} : memref<128x32xbf16, #tpu.memory_space<vmem>>, vector<16x32xbf16>,
    %c4_i32 = arith.constant 4 : i32
    %c16_i32_66 = arith.constant 16 : i32
    %176 = arith.muli %c4_i32, %c16_i32_66 : i32
    %177 = tpu.assume_multiple %176, 16 : i32
    %178 = arith.index_cast %177 : i32 to index
    %c0_67 = arith.constant 0 : index
    %179 = vector.load %arg13[%178, %c0_67] : memref<128x128xf32, #tpu.memory_space<vmem>>, vector<16x128xf32>
    %180 = arith.truncf %172 : vector<16x32xf32> to vector<16x32xbf16>
    %cst_68 = arith.constant dense<0.000000e+00> : vector<16x128xf32>
    %181 = tpu.matmul %180, %1, %cst_68 {dimension_numbers = #tpu.dot_dimension_numbers<[1], [0], [0], [1], [0, 0, 1, 1], [], []>} : vector<16x32xbf16>, vector<32x128xbf16>, vector<16x128xf32> -> vector<16x128xf32>
    %182 = arith.addf %179, %181 : vector<16x128xf32>
    %183 = vector.extract_strided_slice %182 {offsets = [0, 0], sizes = [16, 32], strides = [1, 1]} : vector<16x128xf32> to vector<16x32xf32>
    %cst_69 = arith.constant 5.000000e-01 : f32
    %184 = vector.broadcast %cst_69 : f32 to vector<16x32xf32>
    %185 = arith.mulf %184, %183 : vector<16x32xf32>
    %186 = math.tanh %185 : vector<16x32xf32>
    %cst_70 = arith.constant 5.000000e-01 : f32
    %187 = vector.broadcast %cst_70 : f32 to vector<16x32xf32>
    %188 = arith.mulf %187, %186 : vector<16x32xf32>
    %cst_71 = arith.constant 5.000000e-01 : f32
    %189 = vector.broadcast %cst_71 : f32 to vector<16x32xf32>
    %190 = arith.addf %188, %189 : vector<16x32xf32>
    %191 = vector.extract_strided_slice %182 {offsets = [0, 32], sizes = [16, 32], strides = [1, 1]} : vector<16x128xf32> to vector<16x32xf32>
    %cst_72 = arith.constant 5.000000e-01 : f32
    %192 = vector.broadcast %cst_72 : f32 to vector<16x32xf32>
    %193 = arith.mulf %192, %191 : vector<16x32xf32>
    %194 = math.tanh %193 : vector<16x32xf32>
    %cst_73 = arith.constant 5.000000e-01 : f32
    %195 = vector.broadcast %cst_73 : f32 to vector<16x32xf32>
    %196 = arith.mulf %195, %194 : vector<16x32xf32>
    %cst_74 = arith.constant 5.000000e-01 : f32
    %197 = vector.broadcast %cst_74 : f32 to vector<16x32xf32>
    %198 = arith.addf %196, %197 : vector<16x32xf32>
    %199 = vector.extract_strided_slice %182 {offsets = [0, 64], sizes = [16, 32], strides = [1, 1]} : vector<16x128xf32> to vector<16x32xf32>
    %200 = math.tanh %199 : vector<16x32xf32>
    %201 = vector.extract_strided_slice %182 {offsets = [0, 96], sizes = [16, 32], strides = [1, 1]} : vector<16x128xf32> to vector<16x32xf32>
    %cst_75 = arith.constant 5.000000e-01 : f32
    %202 = vector.broadcast %cst_75 : f32 to vector<16x32xf32>
    %203 = arith.mulf %202, %201 : vector<16x32xf32>
    %204 = math.tanh %203 : vector<16x32xf32>
    %cst_76 = arith.constant 5.000000e-01 : f32
    %205 = vector.broadcast %cst_76 : f32 to vector<16x32xf32>
    %206 = arith.mulf %205, %204 : vector<16x32xf32>
    %cst_77 = arith.constant 5.000000e-01 : f32
    %207 = vector.broadcast %cst_77 : f32 to vector<16x32xf32>
    %208 = arith.addf %206, %207 : vector<16x32xf32>
    %209 = arith.mulf %198, %170 : vector<16x32xf32>
    %210 = arith.mulf %190, %200 : vector<16x32xf32>
    %211 = arith.addf %209, %210 : vector<16x32xf32>
    %212 = math.tanh %211 : vector<16x32xf32>
    %213 = arith.mulf %208, %212 : vector<16x32xf32>
    %214 = arith.truncf %213 : vector<16x32xf32> to vector<16x32xbf16>
    %215 = arith.index_cast %177 : i32 to index
    %c0_78 = arith.constant 0 : index
    %216 = vector.load %arg10[%215, %c0_78] : memref<128x32xbf16, #tpu.memory_space<vmem>>, vector<16x32xbf16>
    tpu.vector_store %arg10[%215, %c0_78], %214 {strides = array<i32>} : memref<128x32xbf16, #tpu.memory_space<vmem>>, vector<16x32xbf16>,
    %c5_i32 = arith.constant 5 : i32
    %c16_i32_79 = arith.constant 16 : i32
    %217 = arith.muli %c5_i32, %c16_i32_79 : i32
    %218 = tpu.assume_multiple %217, 16 : i32
    %219 = arith.index_cast %218 : i32 to index
    %c0_80 = arith.constant 0 : index
    %220 = vector.load %arg13[%219, %c0_80] : memref<128x128xf32, #tpu.memory_space<vmem>>, vector<16x128xf32>
    %221 = arith.truncf %213 : vector<16x32xf32> to vector<16x32xbf16>
    %cst_81 = arith.constant dense<0.000000e+00> : vector<16x128xf32>
    %222 = tpu.matmul %221, %1, %cst_81 {dimension_numbers = #tpu.dot_dimension_numbers<[1], [0], [0], [1], [0, 0, 1, 1], [], []>} : vector<16x32xbf16>, vector<32x128xbf16>, vector<16x128xf32> -> vector<16x128xf32>
    %223 = arith.addf %220, %222 : vector<16x128xf32>
    %224 = vector.extract_strided_slice %223 {offsets = [0, 0], sizes = [16, 32], strides = [1, 1]} : vector<16x128xf32> to vector<16x32xf32>
    %cst_82 = arith.constant 5.000000e-01 : f32
    %225 = vector.broadcast %cst_82 : f32 to vector<16x32xf32>
    %226 = arith.mulf %225, %224 : vector<16x32xf32>
    %227 = math.tanh %226 : vector<16x32xf32>
    %cst_83 = arith.constant 5.000000e-01 : f32
    %228 = vector.broadcast %cst_83 : f32 to vector<16x32xf32>
    %229 = arith.mulf %228, %227 : vector<16x32xf32>
    %cst_84 = arith.constant 5.000000e-01 : f32
    %230 = vector.broadcast %cst_84 : f32 to vector<16x32xf32>
    %231 = arith.addf %229, %230 : vector<16x32xf32>
    %232 = vector.extract_strided_slice %223 {offsets = [0, 32], sizes = [16, 32], strides = [1, 1]} : vector<16x128xf32> to vector<16x32xf32>
    %cst_85 = arith.constant 5.000000e-01 : f32
    %233 = vector.broadcast %cst_85 : f32 to vector<16x32xf32>
    %234 = arith.mulf %233, %232 : vector<16x32xf32>
    %235 = math.tanh %234 : vector<16x32xf32>
    %cst_86 = arith.constant 5.000000e-01 : f32
    %236 = vector.broadcast %cst_86 : f32 to vector<16x32xf32>
    %237 = arith.mulf %236, %235 : vector<16x32xf32>
    %cst_87 = arith.constant 5.000000e-01 : f32
    %238 = vector.broadcast %cst_87 : f32 to vector<16x32xf32>
    %239 = arith.addf %237, %238 : vector<16x32xf32>
    %240 = vector.extract_strided_slice %223 {offsets = [0, 64], sizes = [16, 32], strides = [1, 1]} : vector<16x128xf32> to vector<16x32xf32>
    %241 = math.tanh %240 : vector<16x32xf32>
    %242 = vector.extract_strided_slice %223 {offsets = [0, 96], sizes = [16, 32], strides = [1, 1]} : vector<16x128xf32> to vector<16x32xf32>
    %cst_88 = arith.constant 5.000000e-01 : f32
    %243 = vector.broadcast %cst_88 : f32 to vector<16x32xf32>
    %244 = arith.mulf %243, %242 : vector<16x32xf32>
    %245 = math.tanh %244 : vector<16x32xf32>
    %cst_89 = arith.constant 5.000000e-01 : f32
    %246 = vector.broadcast %cst_89 : f32 to vector<16x32xf32>
    %247 = arith.mulf %246, %245 : vector<16x32xf32>
    %cst_90 = arith.constant 5.000000e-01 : f32
    %248 = vector.broadcast %cst_90 : f32 to vector<16x32xf32>
    %249 = arith.addf %247, %248 : vector<16x32xf32>
    %250 = arith.mulf %239, %211 : vector<16x32xf32>
    %251 = arith.mulf %231, %241 : vector<16x32xf32>
    %252 = arith.addf %250, %251 : vector<16x32xf32>
    %253 = math.tanh %252 : vector<16x32xf32>
    %254 = arith.mulf %249, %253 : vector<16x32xf32>
    %255 = arith.truncf %254 : vector<16x32xf32> to vector<16x32xbf16>
    %256 = arith.index_cast %218 : i32 to index
    %c0_91 = arith.constant 0 : index
    %257 = vector.load %arg10[%256, %c0_91] : memref<128x32xbf16, #tpu.memory_space<vmem>>, vector<16x32xbf16>
    tpu.vector_store %arg10[%256, %c0_91], %255 {strides = array<i32>} : memref<128x32xbf16, #tpu.memory_space<vmem>>, vector<16x32xbf16>,
    %c6_i32 = arith.constant 6 : i32
    %c16_i32_92 = arith.constant 16 : i32
    %258 = arith.muli %c6_i32, %c16_i32_92 : i32
    %259 = tpu.assume_multiple %258, 16 : i32
    %260 = arith.index_cast %259 : i32 to index
    %c0_93 = arith.constant 0 : index
    %261 = vector.load %arg13[%260, %c0_93] : memref<128x128xf32, #tpu.memory_space<vmem>>, vector<16x128xf32>
    %262 = arith.truncf %254 : vector<16x32xf32> to vector<16x32xbf16>
    %cst_94 = arith.constant dense<0.000000e+00> : vector<16x128xf32>
    %263 = tpu.matmul %262, %1, %cst_94 {dimension_numbers = #tpu.dot_dimension_numbers<[1], [0], [0], [1], [0, 0, 1, 1], [], []>} : vector<16x32xbf16>, vector<32x128xbf16>, vector<16x128xf32> -> vector<16x128xf32>
    %264 = arith.addf %261, %263 : vector<16x128xf32>
    %265 = vector.extract_strided_slice %264 {offsets = [0, 0], sizes = [16, 32], strides = [1, 1]} : vector<16x128xf32> to vector<16x32xf32>
    %cst_95 = arith.constant 5.000000e-01 : f32
    %266 = vector.broadcast %cst_95 : f32 to vector<16x32xf32>
    %267 = arith.mulf %266, %265 : vector<16x32xf32>
    %268 = math.tanh %267 : vector<16x32xf32>
    %cst_96 = arith.constant 5.000000e-01 : f32
    %269 = vector.broadcast %cst_96 : f32 to vector<16x32xf32>
    %270 = arith.mulf %269, %268 : vector<16x32xf32>
    %cst_97 = arith.constant 5.000000e-01 : f32
    %271 = vector.broadcast %cst_97 : f32 to vector<16x32xf32>
    %272 = arith.addf %270, %271 : vector<16x32xf32>
    %273 = vector.extract_strided_slice %264 {offsets = [0, 32], sizes = [16, 32], strides = [1, 1]} : vector<16x128xf32> to vector<16x32xf32>
    %cst_98 = arith.constant 5.000000e-01 : f32
    %274 = vector.broadcast %cst_98 : f32 to vector<16x32xf32>
    %275 = arith.mulf %274, %273 : vector<16x32xf32>
    %276 = math.tanh %275 : vector<16x32xf32>
    %cst_99 = arith.constant 5.000000e-01 : f32
    %277 = vector.broadcast %cst_99 : f32 to vector<16x32xf32>
    %278 = arith.mulf %277, %276 : vector<16x32xf32>
    %cst_100 = arith.constant 5.000000e-01 : f32
    %279 = vector.broadcast %cst_100 : f32 to vector<16x32xf32>
    %280 = arith.addf %278, %279 : vector<16x32xf32>
    %281 = vector.extract_strided_slice %264 {offsets = [0, 64], sizes = [16, 32], strides = [1, 1]} : vector<16x128xf32> to vector<16x32xf32>
    %282 = math.tanh %281 : vector<16x32xf32>
    %283 = vector.extract_strided_slice %264 {offsets = [0, 96], sizes = [16, 32], strides = [1, 1]} : vector<16x128xf32> to vector<16x32xf32>
    %cst_101 = arith.constant 5.000000e-01 : f32
    %284 = vector.broadcast %cst_101 : f32 to vector<16x32xf32>
    %285 = arith.mulf %284, %283 : vector<16x32xf32>
    %286 = math.tanh %285 : vector<16x32xf32>
    %cst_102 = arith.constant 5.000000e-01 : f32
    %287 = vector.broadcast %cst_102 : f32 to vector<16x32xf32>
    %288 = arith.mulf %287, %286 : vector<16x32xf32>
    %cst_103 = arith.constant 5.000000e-01 : f32
    %289 = vector.broadcast %cst_103 : f32 to vector<16x32xf32>
    %290 = arith.addf %288, %289 : vector<16x32xf32>
    %291 = arith.mulf %280, %252 : vector<16x32xf32>
    %292 = arith.mulf %272, %282 : vector<16x32xf32>
    %293 = arith.addf %291, %292 : vector<16x32xf32>
    %294 = math.tanh %293 : vector<16x32xf32>
    %295 = arith.mulf %290, %294 : vector<16x32xf32>
    %296 = arith.truncf %295 : vector<16x32xf32> to vector<16x32xbf16>
    %297 = arith.index_cast %259 : i32 to index
    %c0_104 = arith.constant 0 : index
    %298 = vector.load %arg10[%297, %c0_104] : memref<128x32xbf16, #tpu.memory_space<vmem>>, vector<16x32xbf16>
    tpu.vector_store %arg10[%297, %c0_104], %296 {strides = array<i32>} : memref<128x32xbf16, #tpu.memory_space<vmem>>, vector<16x32xbf16>,
    %c7_i32 = arith.constant 7 : i32
    %c16_i32_105 = arith.constant 16 : i32
    %299 = arith.muli %c7_i32, %c16_i32_105 : i32
    %300 = tpu.assume_multiple %299, 16 : i32
    %301 = arith.index_cast %300 : i32 to index
    %c0_106 = arith.constant 0 : index
    %302 = vector.load %arg13[%301, %c0_106] : memref<128x128xf32, #tpu.memory_space<vmem>>, vector<16x128xf32>
    %303 = arith.truncf %295 : vector<16x32xf32> to vector<16x32xbf16>
    %cst_107 = arith.constant dense<0.000000e+00> : vector<16x128xf32>
    %304 = tpu.matmul %303, %1, %cst_107 {dimension_numbers = #tpu.dot_dimension_numbers<[1], [0], [0], [1], [0, 0, 1, 1], [], []>} : vector<16x32xbf16>, vector<32x128xbf16>, vector<16x128xf32> -> vector<16x128xf32>
    %305 = arith.addf %302, %304 : vector<16x128xf32>
    %306 = vector.extract_strided_slice %305 {offsets = [0, 0], sizes = [16, 32], strides = [1, 1]} : vector<16x128xf32> to vector<16x32xf32>
    %cst_108 = arith.constant 5.000000e-01 : f32
    %307 = vector.broadcast %cst_108 : f32 to vector<16x32xf32>
    %308 = arith.mulf %307, %306 : vector<16x32xf32>
    %309 = math.tanh %308 : vector<16x32xf32>
    %cst_109 = arith.constant 5.000000e-01 : f32
    %310 = vector.broadcast %cst_109 : f32 to vector<16x32xf32>
    %311 = arith.mulf %310, %309 : vector<16x32xf32>
    %cst_110 = arith.constant 5.000000e-01 : f32
    %312 = vector.broadcast %cst_110 : f32 to vector<16x32xf32>
    %313 = arith.addf %311, %312 : vector<16x32xf32>
    %314 = vector.extract_strided_slice %305 {offsets = [0, 32], sizes = [16, 32], strides = [1, 1]} : vector<16x128xf32> to vector<16x32xf32>
    %cst_111 = arith.constant 5.000000e-01 : f32
    %315 = vector.broadcast %cst_111 : f32 to vector<16x32xf32>
    %316 = arith.mulf %315, %314 : vector<16x32xf32>
    %317 = math.tanh %316 : vector<16x32xf32>
    %cst_112 = arith.constant 5.000000e-01 : f32
    %318 = vector.broadcast %cst_112 : f32 to vector<16x32xf32>
    %319 = arith.mulf %318, %317 : vector<16x32xf32>
    %cst_113 = arith.constant 5.000000e-01 : f32
    %320 = vector.broadcast %cst_113 : f32 to vector<16x32xf32>
    %321 = arith.addf %319, %320 : vector<16x32xf32>
    %322 = vector.extract_strided_slice %305 {offsets = [0, 64], sizes = [16, 32], strides = [1, 1]} : vector<16x128xf32> to vector<16x32xf32>
    %323 = math.tanh %322 : vector<16x32xf32>
    %324 = vector.extract_strided_slice %305 {offsets = [0, 96], sizes = [16, 32], strides = [1, 1]} : vector<16x128xf32> to vector<16x32xf32>
    %cst_114 = arith.constant 5.000000e-01 : f32
    %325 = vector.broadcast %cst_114 : f32 to vector<16x32xf32>
    %326 = arith.mulf %325, %324 : vector<16x32xf32>
    %327 = math.tanh %326 : vector<16x32xf32>
    %cst_115 = arith.constant 5.000000e-01 : f32
    %328 = vector.broadcast %cst_115 : f32 to vector<16x32xf32>
    %329 = arith.mulf %328, %327 : vector<16x32xf32>
    %cst_116 = arith.constant 5.000000e-01 : f32
    %330 = vector.broadcast %cst_116 : f32 to vector<16x32xf32>
    %331 = arith.addf %329, %330 : vector<16x32xf32>
    %332 = arith.mulf %321, %293 : vector<16x32xf32>
    %333 = arith.mulf %313, %323 : vector<16x32xf32>
    %334 = arith.addf %332, %333 : vector<16x32xf32>
    %335 = math.tanh %334 : vector<16x32xf32>
    %336 = arith.mulf %331, %335 : vector<16x32xf32>
    %337 = arith.truncf %336 : vector<16x32xf32> to vector<16x32xbf16>
    %338 = arith.index_cast %300 : i32 to index
    %c0_117 = arith.constant 0 : index
    %339 = vector.load %arg10[%338, %c0_117] : memref<128x32xbf16, #tpu.memory_space<vmem>>, vector<16x32xbf16>
    tpu.vector_store %arg10[%338, %c0_117], %337 {strides = array<i32>} : memref<128x32xbf16, #tpu.memory_space<vmem>>, vector<16x32xbf16>,
    %c8_i32 = arith.constant 8 : i32
    %c0_118 = arith.constant 0 : index
    %c0_119 = arith.constant 0 : index
    %c0_120 = arith.constant 0 : index
    %340 = vector.load %arg11[%c0_118, %c0_119, %c0_120] : memref<2x16x32xf32, #tpu.memory_space<vmem>>, vector<1x16x32xf32>
    %341 = vector.shape_cast %340 : vector<1x16x32xf32> to vector<16x32xf32>
    %342 = vector.shape_cast %336 : vector<16x32xf32> to vector<1x16x32xf32>
    tpu.vector_store %arg11[%c0_118, %c0_119, %c0_120], %342 {strides = array<i32>} : memref<2x16x32xf32, #tpu.memory_space<vmem>>, vector<1x16x32xf32>,
    %c0_121 = arith.constant 0 : index
    %c0_122 = arith.constant 0 : index
    %c0_123 = arith.constant 0 : index
    %343 = vector.load %arg12[%c0_121, %c0_122, %c0_123] : memref<2x16x32xf32, #tpu.memory_space<vmem>>, vector<1x16x32xf32>
    %344 = vector.shape_cast %343 : vector<1x16x32xf32> to vector<16x32xf32>
    %345 = vector.shape_cast %334 : vector<16x32xf32> to vector<1x16x32xf32>
    tpu.vector_store %arg12[%c0_121, %c0_122, %c0_123], %345 {strides = array<i32>} : memref<2x16x32xf32, #tpu.memory_space<vmem>>, vector<1x16x32xf32>,
    %c0_124 = arith.constant 0 : index
    %c0_125 = arith.constant 0 : index
    %346 = vector.load %arg6[%c0_124, %c0_125] : memref<32x128xbf16, #tpu.memory_space<vmem>>, vector<32x128xbf16>
    %c0_126 = arith.constant 0 : index
    %c0_127 = arith.constant 0 : index
    %347 = vector.load %arg7[%c0_126, %c0_127] : memref<32x128xbf16, #tpu.memory_space<vmem>>, vector<32x128xbf16>
    %c0_128 = arith.constant 0 : index
    %c0_129 = arith.constant 0 : index
    %348 = vector.load %arg8[%c0_128, %c0_129] : memref<1x128xf32, #tpu.memory_space<vmem>>, vector<1x128xf32>
    %c0_130 = arith.constant 0 : index
    %c0_131 = arith.constant 0 : index
    %349 = vector.load %arg10[%c0_130, %c0_131] : memref<128x32xbf16, #tpu.memory_space<vmem>>, vector<128x32xbf16>
    %cst_132 = arith.constant dense<0.000000e+00> : vector<128x128xf32>
    %350 = tpu.matmul %349, %346, %cst_132 {dimension_numbers = #tpu.dot_dimension_numbers<[1], [0], [0], [1], [0, 0, 1, 1], [], []>} : vector<128x32xbf16>, vector<32x128xbf16>, vector<128x128xf32> -> vector<128x128xf32>
    %351 = vector.broadcast %348 : vector<1x128xf32> to vector<128x128xf32>
    %352 = arith.addf %350, %351 : vector<128x128xf32>
    %c0_133 = arith.constant 0 : index
    %c0_134 = arith.constant 0 : index
    %353 = vector.load %arg13[%c0_133, %c0_134] : memref<128x128xf32, #tpu.memory_space<vmem>>, vector<128x128xf32>
    tpu.vector_store %arg13[%c0_133, %c0_134], %352 {strides = array<i32>} : memref<128x128xf32, #tpu.memory_space<vmem>>, vector<128x128xf32>,
    %c1 = arith.constant 1 : index
    %c0_135 = arith.constant 0 : index
    %c0_136 = arith.constant 0 : index
    %354 = vector.load %arg1[%c1, %c0_135, %c0_136] : memref<2x16x32xf32, #tpu.memory_space<vmem>>, vector<1x16x32xf32>
    %355 = vector.shape_cast %354 : vector<1x16x32xf32> to vector<16x32xf32>
    %c1_137 = arith.constant 1 : index
    %c0_138 = arith.constant 0 : index
    %c0_139 = arith.constant 0 : index
    %356 = vector.load %arg2[%c1_137, %c0_138, %c0_139] : memref<2x16x32xf32, #tpu.memory_space<vmem>>, vector<1x16x32xf32>
    %357 = vector.shape_cast %356 : vector<1x16x32xf32> to vector<16x32xf32>
    %c0_i32_140 = arith.constant 0 : i32
    %c16_i32_141 = arith.constant 16 : i32
    %358 = arith.muli %c0_i32_140, %c16_i32_141 : i32
    %359 = tpu.assume_multiple %358, 16 : i32
    %360 = arith.index_cast %359 : i32 to index
    %c0_142 = arith.constant 0 : index
    %361 = vector.load %arg13[%360, %c0_142] : memref<128x128xf32, #tpu.memory_space<vmem>>, vector<16x128xf32>
    %362 = arith.truncf %355 : vector<16x32xf32> to vector<16x32xbf16>
    %cst_143 = arith.constant dense<0.000000e+00> : vector<16x128xf32>
    %363 = tpu.matmul %362, %347, %cst_143 {dimension_numbers = #tpu.dot_dimension_numbers<[1], [0], [0], [1], [0, 0, 1, 1], [], []>} : vector<16x32xbf16>, vector<32x128xbf16>, vector<16x128xf32> -> vector<16x128xf32>
    %364 = arith.addf %361, %363 : vector<16x128xf32>
    %365 = vector.extract_strided_slice %364 {offsets = [0, 0], sizes = [16, 32], strides = [1, 1]} : vector<16x128xf32> to vector<16x32xf32>
    %cst_144 = arith.constant 5.000000e-01 : f32
    %366 = vector.broadcast %cst_144 : f32 to vector<16x32xf32>
    %367 = arith.mulf %366, %365 : vector<16x32xf32>
    %368 = math.tanh %367 : vector<16x32xf32>
    %cst_145 = arith.constant 5.000000e-01 : f32
    %369 = vector.broadcast %cst_145 : f32 to vector<16x32xf32>
    %370 = arith.mulf %369, %368 : vector<16x32xf32>
    %cst_146 = arith.constant 5.000000e-01 : f32
    %371 = vector.broadcast %cst_146 : f32 to vector<16x32xf32>
    %372 = arith.addf %370, %371 : vector<16x32xf32>
    %373 = vector.extract_strided_slice %364 {offsets = [0, 32], sizes = [16, 32], strides = [1, 1]} : vector<16x128xf32> to vector<16x32xf32>
    %cst_147 = arith.constant 5.000000e-01 : f32
    %374 = vector.broadcast %cst_147 : f32 to vector<16x32xf32>
    %375 = arith.mulf %374, %373 : vector<16x32xf32>
    %376 = math.tanh %375 : vector<16x32xf32>
    %cst_148 = arith.constant 5.000000e-01 : f32
    %377 = vector.broadcast %cst_148 : f32 to vector<16x32xf32>
    %378 = arith.mulf %377, %376 : vector<16x32xf32>
    %cst_149 = arith.constant 5.000000e-01 : f32
    %379 = vector.broadcast %cst_149 : f32 to vector<16x32xf32>
    %380 = arith.addf %378, %379 : vector<16x32xf32>
    %381 = vector.extract_strided_slice %364 {offsets = [0, 64], sizes = [16, 32], strides = [1, 1]} : vector<16x128xf32> to vector<16x32xf32>
    %382 = math.tanh %381 : vector<16x32xf32>
    %383 = vector.extract_strided_slice %364 {offsets = [0, 96], sizes = [16, 32], strides = [1, 1]} : vector<16x128xf32> to vector<16x32xf32>
    %cst_150 = arith.constant 5.000000e-01 : f32
    %384 = vector.broadcast %cst_150 : f32 to vector<16x32xf32>
    %385 = arith.mulf %384, %383 : vector<16x32xf32>
    %386 = math.tanh %385 : vector<16x32xf32>
    %cst_151 = arith.constant 5.000000e-01 : f32
    %387 = vector.broadcast %cst_151 : f32 to vector<16x32xf32>
    %388 = arith.mulf %387, %386 : vector<16x32xf32>
    %cst_152 = arith.constant 5.000000e-01 : f32
    %389 = vector.broadcast %cst_152 : f32 to vector<16x32xf32>
    %390 = arith.addf %388, %389 : vector<16x32xf32>
    %391 = arith.mulf %380, %357 : vector<16x32xf32>
    %392 = arith.mulf %372, %382 : vector<16x32xf32>
    %393 = arith.addf %391, %392 : vector<16x32xf32>
    %394 = math.tanh %393 : vector<16x32xf32>
    %395 = arith.mulf %390, %394 : vector<16x32xf32>
    %396 = arith.truncf %395 : vector<16x32xf32> to vector<16x32xbf16>
    %397 = arith.index_cast %359 : i32 to index
    %c0_153 = arith.constant 0 : index
    %398 = vector.load %arg10[%397, %c0_153] : memref<128x32xbf16, #tpu.memory_space<vmem>>, vector<16x32xbf16>
    tpu.vector_store %arg10[%397, %c0_153], %396 {strides = array<i32>} : memref<128x32xbf16, #tpu.memory_space<vmem>>, vector<16x32xbf16>,
    %399 = arith.index_cast %359 : i32 to index
    %c0_154 = arith.constant 0 : index
    %400 = vector.load %arg9[%399, %c0_154] : memref<128x32xf32, #tpu.memory_space<vmem>>, vector<16x32xf32>
    tpu.vector_store %arg9[%399, %c0_154], %395 {strides = array<i32>} : memref<128x32xf32, #tpu.memory_space<vmem>>, vector<16x32xf32>,
    %c1_i32_155 = arith.constant 1 : i32
    %c16_i32_156 = arith.constant 16 : i32
    %401 = arith.muli %c1_i32_155, %c16_i32_156 : i32
    %402 = tpu.assume_multiple %401, 16 : i32
    %403 = arith.index_cast %402 : i32 to index
    %c0_157 = arith.constant 0 : index
    %404 = vector.load %arg13[%403, %c0_157] : memref<128x128xf32, #tpu.memory_space<vmem>>, vector<16x128xf32>
    %405 = arith.truncf %395 : vector<16x32xf32> to vector<16x32xbf16>
    %cst_158 = arith.constant dense<0.000000e+00> : vector<16x128xf32>
    %406 = tpu.matmul %405, %347, %cst_158 {dimension_numbers = #tpu.dot_dimension_numbers<[1], [0], [0], [1], [0, 0, 1, 1], [], []>} : vector<16x32xbf16>, vector<32x128xbf16>, vector<16x128xf32> -> vector<16x128xf32>
    %407 = arith.addf %404, %406 : vector<16x128xf32>
    %408 = vector.extract_strided_slice %407 {offsets = [0, 0], sizes = [16, 32], strides = [1, 1]} : vector<16x128xf32> to vector<16x32xf32>
    %cst_159 = arith.constant 5.000000e-01 : f32
    %409 = vector.broadcast %cst_159 : f32 to vector<16x32xf32>
    %410 = arith.mulf %409, %408 : vector<16x32xf32>
    %411 = math.tanh %410 : vector<16x32xf32>
    %cst_160 = arith.constant 5.000000e-01 : f32
    %412 = vector.broadcast %cst_160 : f32 to vector<16x32xf32>
    %413 = arith.mulf %412, %411 : vector<16x32xf32>
    %cst_161 = arith.constant 5.000000e-01 : f32
    %414 = vector.broadcast %cst_161 : f32 to vector<16x32xf32>
    %415 = arith.addf %413, %414 : vector<16x32xf32>
    %416 = vector.extract_strided_slice %407 {offsets = [0, 32], sizes = [16, 32], strides = [1, 1]} : vector<16x128xf32> to vector<16x32xf32>
    %cst_162 = arith.constant 5.000000e-01 : f32
    %417 = vector.broadcast %cst_162 : f32 to vector<16x32xf32>
    %418 = arith.mulf %417, %416 : vector<16x32xf32>
    %419 = math.tanh %418 : vector<16x32xf32>
    %cst_163 = arith.constant 5.000000e-01 : f32
    %420 = vector.broadcast %cst_163 : f32 to vector<16x32xf32>
    %421 = arith.mulf %420, %419 : vector<16x32xf32>
    %cst_164 = arith.constant 5.000000e-01 : f32
    %422 = vector.broadcast %cst_164 : f32 to vector<16x32xf32>
    %423 = arith.addf %421, %422 : vector<16x32xf32>
    %424 = vector.extract_strided_slice %407 {offsets = [0, 64], sizes = [16, 32], strides = [1, 1]} : vector<16x128xf32> to vector<16x32xf32>
    %425 = math.tanh %424 : vector<16x32xf32>
    %426 = vector.extract_strided_slice %407 {offsets = [0, 96], sizes = [16, 32], strides = [1, 1]} : vector<16x128xf32> to vector<16x32xf32>
    %cst_165 = arith.constant 5.000000e-01 : f32
    %427 = vector.broadcast %cst_165 : f32 to vector<16x32xf32>
    %428 = arith.mulf %427, %426 : vector<16x32xf32>
    %429 = math.tanh %428 : vector<16x32xf32>
    %cst_166 = arith.constant 5.000000e-01 : f32
    %430 = vector.broadcast %cst_166 : f32 to vector<16x32xf32>
    %431 = arith.mulf %430, %429 : vector<16x32xf32>
    %cst_167 = arith.constant 5.000000e-01 : f32
    %432 = vector.broadcast %cst_167 : f32 to vector<16x32xf32>
    %433 = arith.addf %431, %432 : vector<16x32xf32>
    %434 = arith.mulf %423, %393 : vector<16x32xf32>
    %435 = arith.mulf %415, %425 : vector<16x32xf32>
    %436 = arith.addf %434, %435 : vector<16x32xf32>
    %437 = math.tanh %436 : vector<16x32xf32>
    %438 = arith.mulf %433, %437 : vector<16x32xf32>
    %439 = arith.truncf %438 : vector<16x32xf32> to vector<16x32xbf16>
    %440 = arith.index_cast %402 : i32 to index
    %c0_168 = arith.constant 0 : index
    %441 = vector.load %arg10[%440, %c0_168] : memref<128x32xbf16, #tpu.memory_space<vmem>>, vector<16x32xbf16>
    tpu.vector_store %arg10[%440, %c0_168], %439 {strides = array<i32>} : memref<128x32xbf16, #tpu.memory_space<vmem>>, vector<16x32xbf16>,
    %442 = arith.index_cast %402 : i32 to index
    %c0_169 = arith.constant 0 : index
    %443 = vector.load %arg9[%442, %c0_169] : memref<128x32xf32, #tpu.memory_space<vmem>>, vector<16x32xf32>
    tpu.vector_store %arg9[%442, %c0_169], %438 {strides = array<i32>} : memref<128x32xf32, #tpu.memory_space<vmem>>, vector<16x32xf32>,
    %c2_i32_170 = arith.constant 2 : i32
    %c16_i32_171 = arith.constant 16 : i32
    %444 = arith.muli %c2_i32_170, %c16_i32_171 : i32
    %445 = tpu.assume_multiple %444, 16 : i32
    %446 = arith.index_cast %445 : i32 to index
    %c0_172 = arith.constant 0 : index
    %447 = vector.load %arg13[%446, %c0_172] : memref<128x128xf32, #tpu.memory_space<vmem>>, vector<16x128xf32>
    %448 = arith.truncf %438 : vector<16x32xf32> to vector<16x32xbf16>
    %cst_173 = arith.constant dense<0.000000e+00> : vector<16x128xf32>
    %449 = tpu.matmul %448, %347, %cst_173 {dimension_numbers = #tpu.dot_dimension_numbers<[1], [0], [0], [1], [0, 0, 1, 1], [], []>} : vector<16x32xbf16>, vector<32x128xbf16>, vector<16x128xf32> -> vector<16x128xf32>
    %450 = arith.addf %447, %449 : vector<16x128xf32>
    %451 = vector.extract_strided_slice %450 {offsets = [0, 0], sizes = [16, 32], strides = [1, 1]} : vector<16x128xf32> to vector<16x32xf32>
    %cst_174 = arith.constant 5.000000e-01 : f32
    %452 = vector.broadcast %cst_174 : f32 to vector<16x32xf32>
    %453 = arith.mulf %452, %451 : vector<16x32xf32>
    %454 = math.tanh %453 : vector<16x32xf32>
    %cst_175 = arith.constant 5.000000e-01 : f32
    %455 = vector.broadcast %cst_175 : f32 to vector<16x32xf32>
    %456 = arith.mulf %455, %454 : vector<16x32xf32>
    %cst_176 = arith.constant 5.000000e-01 : f32
    %457 = vector.broadcast %cst_176 : f32 to vector<16x32xf32>
    %458 = arith.addf %456, %457 : vector<16x32xf32>
    %459 = vector.extract_strided_slice %450 {offsets = [0, 32], sizes = [16, 32], strides = [1, 1]} : vector<16x128xf32> to vector<16x32xf32>
    %cst_177 = arith.constant 5.000000e-01 : f32
    %460 = vector.broadcast %cst_177 : f32 to vector<16x32xf32>
    %461 = arith.mulf %460, %459 : vector<16x32xf32>
    %462 = math.tanh %461 : vector<16x32xf32>
    %cst_178 = arith.constant 5.000000e-01 : f32
    %463 = vector.broadcast %cst_178 : f32 to vector<16x32xf32>
    %464 = arith.mulf %463, %462 : vector<16x32xf32>
    %cst_179 = arith.constant 5.000000e-01 : f32
    %465 = vector.broadcast %cst_179 : f32 to vector<16x32xf32>
    %466 = arith.addf %464, %465 : vector<16x32xf32>
    %467 = vector.extract_strided_slice %450 {offsets = [0, 64], sizes = [16, 32], strides = [1, 1]} : vector<16x128xf32> to vector<16x32xf32>
    %468 = math.tanh %467 : vector<16x32xf32>
    %469 = vector.extract_strided_slice %450 {offsets = [0, 96], sizes = [16, 32], strides = [1, 1]} : vector<16x128xf32> to vector<16x32xf32>
    %cst_180 = arith.constant 5.000000e-01 : f32
    %470 = vector.broadcast %cst_180 : f32 to vector<16x32xf32>
    %471 = arith.mulf %470, %469 : vector<16x32xf32>
    %472 = math.tanh %471 : vector<16x32xf32>
    %cst_181 = arith.constant 5.000000e-01 : f32
    %473 = vector.broadcast %cst_181 : f32 to vector<16x32xf32>
    %474 = arith.mulf %473, %472 : vector<16x32xf32>
    %cst_182 = arith.constant 5.000000e-01 : f32
    %475 = vector.broadcast %cst_182 : f32 to vector<16x32xf32>
    %476 = arith.addf %474, %475 : vector<16x32xf32>
    %477 = arith.mulf %466, %436 : vector<16x32xf32>
    %478 = arith.mulf %458, %468 : vector<16x32xf32>
    %479 = arith.addf %477, %478 : vector<16x32xf32>
    %480 = math.tanh %479 : vector<16x32xf32>
    %481 = arith.mulf %476, %480 : vector<16x32xf32>
    %482 = arith.truncf %481 : vector<16x32xf32> to vector<16x32xbf16>
    %483 = arith.index_cast %445 : i32 to index
    %c0_183 = arith.constant 0 : index
    %484 = vector.load %arg10[%483, %c0_183] : memref<128x32xbf16, #tpu.memory_space<vmem>>, vector<16x32xbf16>
    tpu.vector_store %arg10[%483, %c0_183], %482 {strides = array<i32>} : memref<128x32xbf16, #tpu.memory_space<vmem>>, vector<16x32xbf16>,
    %485 = arith.index_cast %445 : i32 to index
    %c0_184 = arith.constant 0 : index
    %486 = vector.load %arg9[%485, %c0_184] : memref<128x32xf32, #tpu.memory_space<vmem>>, vector<16x32xf32>
    tpu.vector_store %arg9[%485, %c0_184], %481 {strides = array<i32>} : memref<128x32xf32, #tpu.memory_space<vmem>>, vector<16x32xf32>,
    %c3_i32_185 = arith.constant 3 : i32
    %c16_i32_186 = arith.constant 16 : i32
    %487 = arith.muli %c3_i32_185, %c16_i32_186 : i32
    %488 = tpu.assume_multiple %487, 16 : i32
    %489 = arith.index_cast %488 : i32 to index
    %c0_187 = arith.constant 0 : index
    %490 = vector.load %arg13[%489, %c0_187] : memref<128x128xf32, #tpu.memory_space<vmem>>, vector<16x128xf32>
    %491 = arith.truncf %481 : vector<16x32xf32> to vector<16x32xbf16>
    %cst_188 = arith.constant dense<0.000000e+00> : vector<16x128xf32>
    %492 = tpu.matmul %491, %347, %cst_188 {dimension_numbers = #tpu.dot_dimension_numbers<[1], [0], [0], [1], [0, 0, 1, 1], [], []>} : vector<16x32xbf16>, vector<32x128xbf16>, vector<16x128xf32> -> vector<16x128xf32>
    %493 = arith.addf %490, %492 : vector<16x128xf32>
    %494 = vector.extract_strided_slice %493 {offsets = [0, 0], sizes = [16, 32], strides = [1, 1]} : vector<16x128xf32> to vector<16x32xf32>
    %cst_189 = arith.constant 5.000000e-01 : f32
    %495 = vector.broadcast %cst_189 : f32 to vector<16x32xf32>
    %496 = arith.mulf %495, %494 : vector<16x32xf32>
    %497 = math.tanh %496 : vector<16x32xf32>
    %cst_190 = arith.constant 5.000000e-01 : f32
    %498 = vector.broadcast %cst_190 : f32 to vector<16x32xf32>
    %499 = arith.mulf %498, %497 : vector<16x32xf32>
    %cst_191 = arith.constant 5.000000e-01 : f32
    %500 = vector.broadcast %cst_191 : f32 to vector<16x32xf32>
    %501 = arith.addf %499, %500 : vector<16x32xf32>
    %502 = vector.extract_strided_slice %493 {offsets = [0, 32], sizes = [16, 32], strides = [1, 1]} : vector<16x128xf32> to vector<16x32xf32>
    %cst_192 = arith.constant 5.000000e-01 : f32
    %503 = vector.broadcast %cst_192 : f32 to vector<16x32xf32>
    %504 = arith.mulf %503, %502 : vector<16x32xf32>
    %505 = math.tanh %504 : vector<16x32xf32>
    %cst_193 = arith.constant 5.000000e-01 : f32
    %506 = vector.broadcast %cst_193 : f32 to vector<16x32xf32>
    %507 = arith.mulf %506, %505 : vector<16x32xf32>
    %cst_194 = arith.constant 5.000000e-01 : f32
    %508 = vector.broadcast %cst_194 : f32 to vector<16x32xf32>
    %509 = arith.addf %507, %508 : vector<16x32xf32>
    %510 = vector.extract_strided_slice %493 {offsets = [0, 64], sizes = [16, 32], strides = [1, 1]} : vector<16x128xf32> to vector<16x32xf32>
    %511 = math.tanh %510 : vector<16x32xf32>
    %512 = vector.extract_strided_slice %493 {offsets = [0, 96], sizes = [16, 32], strides = [1, 1]} : vector<16x128xf32> to vector<16x32xf32>
    %cst_195 = arith.constant 5.000000e-01 : f32
    %513 = vector.broadcast %cst_195 : f32 to vector<16x32xf32>
    %514 = arith.mulf %513, %512 : vector<16x32xf32>
    %515 = math.tanh %514 : vector<16x32xf32>
    %cst_196 = arith.constant 5.000000e-01 : f32
    %516 = vector.broadcast %cst_196 : f32 to vector<16x32xf32>
    %517 = arith.mulf %516, %515 : vector<16x32xf32>
    %cst_197 = arith.constant 5.000000e-01 : f32
    %518 = vector.broadcast %cst_197 : f32 to vector<16x32xf32>
    %519 = arith.addf %517, %518 : vector<16x32xf32>
    %520 = arith.mulf %509, %479 : vector<16x32xf32>
    %521 = arith.mulf %501, %511 : vector<16x32xf32>
    %522 = arith.addf %520, %521 : vector<16x32xf32>
    %523 = math.tanh %522 : vector<16x32xf32>
    %524 = arith.mulf %519, %523 : vector<16x32xf32>
    %525 = arith.truncf %524 : vector<16x32xf32> to vector<16x32xbf16>
    %526 = arith.index_cast %488 : i32 to index
    %c0_198 = arith.constant 0 : index
    %527 = vector.load %arg10[%526, %c0_198] : memref<128x32xbf16, #tpu.memory_space<vmem>>, vector<16x32xbf16>
    tpu.vector_store %arg10[%526, %c0_198], %525 {strides = array<i32>} : memref<128x32xbf16, #tpu.memory_space<vmem>>, vector<16x32xbf16>,
    %528 = arith.index_cast %488 : i32 to index
    %c0_199 = arith.constant 0 : index
    %529 = vector.load %arg9[%528, %c0_199] : memref<128x32xf32, #tpu.memory_space<vmem>>, vector<16x32xf32>
    tpu.vector_store %arg9[%528, %c0_199], %524 {strides = array<i32>} : memref<128x32xf32, #tpu.memory_space<vmem>>, vector<16x32xf32>,
    %c4_i32_200 = arith.constant 4 : i32
    %c16_i32_201 = arith.constant 16 : i32
    %530 = arith.muli %c4_i32_200, %c16_i32_201 : i32
    %531 = tpu.assume_multiple %530, 16 : i32
    %532 = arith.index_cast %531 : i32 to index
    %c0_202 = arith.constant 0 : index
    %533 = vector.load %arg13[%532, %c0_202] : memref<128x128xf32, #tpu.memory_space<vmem>>, vector<16x128xf32>
    %534 = arith.truncf %524 : vector<16x32xf32> to vector<16x32xbf16>
    %cst_203 = arith.constant dense<0.000000e+00> : vector<16x128xf32>
    %535 = tpu.matmul %534, %347, %cst_203 {dimension_numbers = #tpu.dot_dimension_numbers<[1], [0], [0], [1], [0, 0, 1, 1], [], []>} : vector<16x32xbf16>, vector<32x128xbf16>, vector<16x128xf32> -> vector<16x128xf32>
    %536 = arith.addf %533, %535 : vector<16x128xf32>
    %537 = vector.extract_strided_slice %536 {offsets = [0, 0], sizes = [16, 32], strides = [1, 1]} : vector<16x128xf32> to vector<16x32xf32>
    %cst_204 = arith.constant 5.000000e-01 : f32
    %538 = vector.broadcast %cst_204 : f32 to vector<16x32xf32>
    %539 = arith.mulf %538, %537 : vector<16x32xf32>
    %540 = math.tanh %539 : vector<16x32xf32>
    %cst_205 = arith.constant 5.000000e-01 : f32
    %541 = vector.broadcast %cst_205 : f32 to vector<16x32xf32>
    %542 = arith.mulf %541, %540 : vector<16x32xf32>
    %cst_206 = arith.constant 5.000000e-01 : f32
    %543 = vector.broadcast %cst_206 : f32 to vector<16x32xf32>
    %544 = arith.addf %542, %543 : vector<16x32xf32>
    %545 = vector.extract_strided_slice %536 {offsets = [0, 32], sizes = [16, 32], strides = [1, 1]} : vector<16x128xf32> to vector<16x32xf32>
    %cst_207 = arith.constant 5.000000e-01 : f32
    %546 = vector.broadcast %cst_207 : f32 to vector<16x32xf32>
    %547 = arith.mulf %546, %545 : vector<16x32xf32>
    %548 = math.tanh %547 : vector<16x32xf32>
    %cst_208 = arith.constant 5.000000e-01 : f32
    %549 = vector.broadcast %cst_208 : f32 to vector<16x32xf32>
    %550 = arith.mulf %549, %548 : vector<16x32xf32>
    %cst_209 = arith.constant 5.000000e-01 : f32
    %551 = vector.broadcast %cst_209 : f32 to vector<16x32xf32>
    %552 = arith.addf %550, %551 : vector<16x32xf32>
    %553 = vector.extract_strided_slice %536 {offsets = [0, 64], sizes = [16, 32], strides = [1, 1]} : vector<16x128xf32> to vector<16x32xf32>
    %554 = math.tanh %553 : vector<16x32xf32>
    %555 = vector.extract_strided_slice %536 {offsets = [0, 96], sizes = [16, 32], strides = [1, 1]} : vector<16x128xf32> to vector<16x32xf32>
    %cst_210 = arith.constant 5.000000e-01 : f32
    %556 = vector.broadcast %cst_210 : f32 to vector<16x32xf32>
    %557 = arith.mulf %556, %555 : vector<16x32xf32>
    %558 = math.tanh %557 : vector<16x32xf32>
    %cst_211 = arith.constant 5.000000e-01 : f32
    %559 = vector.broadcast %cst_211 : f32 to vector<16x32xf32>
    %560 = arith.mulf %559, %558 : vector<16x32xf32>
    %cst_212 = arith.constant 5.000000e-01 : f32
    %561 = vector.broadcast %cst_212 : f32 to vector<16x32xf32>
    %562 = arith.addf %560, %561 : vector<16x32xf32>
    %563 = arith.mulf %552, %522 : vector<16x32xf32>
    %564 = arith.mulf %544, %554 : vector<16x32xf32>
    %565 = arith.addf %563, %564 : vector<16x32xf32>
    %566 = math.tanh %565 : vector<16x32xf32>
    %567 = arith.mulf %562, %566 : vector<16x32xf32>
    %568 = arith.truncf %567 : vector<16x32xf32> to vector<16x32xbf16>
    %569 = arith.index_cast %531 : i32 to index
    %c0_213 = arith.constant 0 : index
    %570 = vector.load %arg10[%569, %c0_213] : memref<128x32xbf16, #tpu.memory_space<vmem>>, vector<16x32xbf16>
    tpu.vector_store %arg10[%569, %c0_213], %568 {strides = array<i32>} : memref<128x32xbf16, #tpu.memory_space<vmem>>, vector<16x32xbf16>,
    %571 = arith.index_cast %531 : i32 to index
    %c0_214 = arith.constant 0 : index
    %572 = vector.load %arg9[%571, %c0_214] : memref<128x32xf32, #tpu.memory_space<vmem>>, vector<16x32xf32>
    tpu.vector_store %arg9[%571, %c0_214], %567 {strides = array<i32>} : memref<128x32xf32, #tpu.memory_space<vmem>>, vector<16x32xf32>,
    %c5_i32_215 = arith.constant 5 : i32
    %c16_i32_216 = arith.constant 16 : i32
    %573 = arith.muli %c5_i32_215, %c16_i32_216 : i32
    %574 = tpu.assume_multiple %573, 16 : i32
    %575 = arith.index_cast %574 : i32 to index
    %c0_217 = arith.constant 0 : index
    %576 = vector.load %arg13[%575, %c0_217] : memref<128x128xf32, #tpu.memory_space<vmem>>, vector<16x128xf32>
    %577 = arith.truncf %567 : vector<16x32xf32> to vector<16x32xbf16>
    %cst_218 = arith.constant dense<0.000000e+00> : vector<16x128xf32>
    %578 = tpu.matmul %577, %347, %cst_218 {dimension_numbers = #tpu.dot_dimension_numbers<[1], [0], [0], [1], [0, 0, 1, 1], [], []>} : vector<16x32xbf16>, vector<32x128xbf16>, vector<16x128xf32> -> vector<16x128xf32>
    %579 = arith.addf %576, %578 : vector<16x128xf32>
    %580 = vector.extract_strided_slice %579 {offsets = [0, 0], sizes = [16, 32], strides = [1, 1]} : vector<16x128xf32> to vector<16x32xf32>
    %cst_219 = arith.constant 5.000000e-01 : f32
    %581 = vector.broadcast %cst_219 : f32 to vector<16x32xf32>
    %582 = arith.mulf %581, %580 : vector<16x32xf32>
    %583 = math.tanh %582 : vector<16x32xf32>
    %cst_220 = arith.constant 5.000000e-01 : f32
    %584 = vector.broadcast %cst_220 : f32 to vector<16x32xf32>
    %585 = arith.mulf %584, %583 : vector<16x32xf32>
    %cst_221 = arith.constant 5.000000e-01 : f32
    %586 = vector.broadcast %cst_221 : f32 to vector<16x32xf32>
    %587 = arith.addf %585, %586 : vector<16x32xf32>
    %588 = vector.extract_strided_slice %579 {offsets = [0, 32], sizes = [16, 32], strides = [1, 1]} : vector<16x128xf32> to vector<16x32xf32>
    %cst_222 = arith.constant 5.000000e-01 : f32
    %589 = vector.broadcast %cst_222 : f32 to vector<16x32xf32>
    %590 = arith.mulf %589, %588 : vector<16x32xf32>
    %591 = math.tanh %590 : vector<16x32xf32>
    %cst_223 = arith.constant 5.000000e-01 : f32
    %592 = vector.broadcast %cst_223 : f32 to vector<16x32xf32>
    %593 = arith.mulf %592, %591 : vector<16x32xf32>
    %cst_224 = arith.constant 5.000000e-01 : f32
    %594 = vector.broadcast %cst_224 : f32 to vector<16x32xf32>
    %595 = arith.addf %593, %594 : vector<16x32xf32>
    %596 = vector.extract_strided_slice %579 {offsets = [0, 64], sizes = [16, 32], strides = [1, 1]} : vector<16x128xf32> to vector<16x32xf32>
    %597 = math.tanh %596 : vector<16x32xf32>
    %598 = vector.extract_strided_slice %579 {offsets = [0, 96], sizes = [16, 32], strides = [1, 1]} : vector<16x128xf32> to vector<16x32xf32>
    %cst_225 = arith.constant 5.000000e-01 : f32
    %599 = vector.broadcast %cst_225 : f32 to vector<16x32xf32>
    %600 = arith.mulf %599, %598 : vector<16x32xf32>
    %601 = math.tanh %600 : vector<16x32xf32>
    %cst_226 = arith.constant 5.000000e-01 : f32
    %602 = vector.broadcast %cst_226 : f32 to vector<16x32xf32>
    %603 = arith.mulf %602, %601 : vector<16x32xf32>
    %cst_227 = arith.constant 5.000000e-01 : f32
    %604 = vector.broadcast %cst_227 : f32 to vector<16x32xf32>
    %605 = arith.addf %603, %604 : vector<16x32xf32>
    %606 = arith.mulf %595, %565 : vector<16x32xf32>
    %607 = arith.mulf %587, %597 : vector<16x32xf32>
    %608 = arith.addf %606, %607 : vector<16x32xf32>
    %609 = math.tanh %608 : vector<16x32xf32>
    %610 = arith.mulf %605, %609 : vector<16x32xf32>
    %611 = arith.truncf %610 : vector<16x32xf32> to vector<16x32xbf16>
    %612 = arith.index_cast %574 : i32 to index
    %c0_228 = arith.constant 0 : index
    %613 = vector.load %arg10[%612, %c0_228] : memref<128x32xbf16, #tpu.memory_space<vmem>>, vector<16x32xbf16>
    tpu.vector_store %arg10[%612, %c0_228], %611 {strides = array<i32>} : memref<128x32xbf16, #tpu.memory_space<vmem>>, vector<16x32xbf16>,
    %614 = arith.index_cast %574 : i32 to index
    %c0_229 = arith.constant 0 : index
    %615 = vector.load %arg9[%614, %c0_229] : memref<128x32xf32, #tpu.memory_space<vmem>>, vector<16x32xf32>
    tpu.vector_store %arg9[%614, %c0_229], %610 {strides = array<i32>} : memref<128x32xf32, #tpu.memory_space<vmem>>, vector<16x32xf32>,
    %c6_i32_230 = arith.constant 6 : i32
    %c16_i32_231 = arith.constant 16 : i32
    %616 = arith.muli %c6_i32_230, %c16_i32_231 : i32
    %617 = tpu.assume_multiple %616, 16 : i32
    %618 = arith.index_cast %617 : i32 to index
    %c0_232 = arith.constant 0 : index
    %619 = vector.load %arg13[%618, %c0_232] : memref<128x128xf32, #tpu.memory_space<vmem>>, vector<16x128xf32>
    %620 = arith.truncf %610 : vector<16x32xf32> to vector<16x32xbf16>
    %cst_233 = arith.constant dense<0.000000e+00> : vector<16x128xf32>
    %621 = tpu.matmul %620, %347, %cst_233 {dimension_numbers = #tpu.dot_dimension_numbers<[1], [0], [0], [1], [0, 0, 1, 1], [], []>} : vector<16x32xbf16>, vector<32x128xbf16>, vector<16x128xf32> -> vector<16x128xf32>
    %622 = arith.addf %619, %621 : vector<16x128xf32>
    %623 = vector.extract_strided_slice %622 {offsets = [0, 0], sizes = [16, 32], strides = [1, 1]} : vector<16x128xf32> to vector<16x32xf32>
    %cst_234 = arith.constant 5.000000e-01 : f32
    %624 = vector.broadcast %cst_234 : f32 to vector<16x32xf32>
    %625 = arith.mulf %624, %623 : vector<16x32xf32>
    %626 = math.tanh %625 : vector<16x32xf32>
    %cst_235 = arith.constant 5.000000e-01 : f32
    %627 = vector.broadcast %cst_235 : f32 to vector<16x32xf32>
    %628 = arith.mulf %627, %626 : vector<16x32xf32>
    %cst_236 = arith.constant 5.000000e-01 : f32
    %629 = vector.broadcast %cst_236 : f32 to vector<16x32xf32>
    %630 = arith.addf %628, %629 : vector<16x32xf32>
    %631 = vector.extract_strided_slice %622 {offsets = [0, 32], sizes = [16, 32], strides = [1, 1]} : vector<16x128xf32> to vector<16x32xf32>
    %cst_237 = arith.constant 5.000000e-01 : f32
    %632 = vector.broadcast %cst_237 : f32 to vector<16x32xf32>
    %633 = arith.mulf %632, %631 : vector<16x32xf32>
    %634 = math.tanh %633 : vector<16x32xf32>
    %cst_238 = arith.constant 5.000000e-01 : f32
    %635 = vector.broadcast %cst_238 : f32 to vector<16x32xf32>
    %636 = arith.mulf %635, %634 : vector<16x32xf32>
    %cst_239 = arith.constant 5.000000e-01 : f32
    %637 = vector.broadcast %cst_239 : f32 to vector<16x32xf32>
    %638 = arith.addf %636, %637 : vector<16x32xf32>
    %639 = vector.extract_strided_slice %622 {offsets = [0, 64], sizes = [16, 32], strides = [1, 1]} : vector<16x128xf32> to vector<16x32xf32>
    %640 = math.tanh %639 : vector<16x32xf32>
    %641 = vector.extract_strided_slice %622 {offsets = [0, 96], sizes = [16, 32], strides = [1, 1]} : vector<16x128xf32> to vector<16x32xf32>
    %cst_240 = arith.constant 5.000000e-01 : f32
    %642 = vector.broadcast %cst_240 : f32 to vector<16x32xf32>
    %643 = arith.mulf %642, %641 : vector<16x32xf32>
    %644 = math.tanh %643 : vector<16x32xf32>
    %cst_241 = arith.constant 5.000000e-01 : f32
    %645 = vector.broadcast %cst_241 : f32 to vector<16x32xf32>
    %646 = arith.mulf %645, %644 : vector<16x32xf32>
    %cst_242 = arith.constant 5.000000e-01 : f32
    %647 = vector.broadcast %cst_242 : f32 to vector<16x32xf32>
    %648 = arith.addf %646, %647 : vector<16x32xf32>
    %649 = arith.mulf %638, %608 : vector<16x32xf32>
    %650 = arith.mulf %630, %640 : vector<16x32xf32>
    %651 = arith.addf %649, %650 : vector<16x32xf32>
    %652 = math.tanh %651 : vector<16x32xf32>
    %653 = arith.mulf %648, %652 : vector<16x32xf32>
    %654 = arith.truncf %653 : vector<16x32xf32> to vector<16x32xbf16>
    %655 = arith.index_cast %617 : i32 to index
    %c0_243 = arith.constant 0 : index
    %656 = vector.load %arg10[%655, %c0_243] : memref<128x32xbf16, #tpu.memory_space<vmem>>, vector<16x32xbf16>
    tpu.vector_store %arg10[%655, %c0_243], %654 {strides = array<i32>} : memref<128x32xbf16, #tpu.memory_space<vmem>>, vector<16x32xbf16>,
    %657 = arith.index_cast %617 : i32 to index
    %c0_244 = arith.constant 0 : index
    %658 = vector.load %arg9[%657, %c0_244] : memref<128x32xf32, #tpu.memory_space<vmem>>, vector<16x32xf32>
    tpu.vector_store %arg9[%657, %c0_244], %653 {strides = array<i32>} : memref<128x32xf32, #tpu.memory_space<vmem>>, vector<16x32xf32>,
    %c7_i32_245 = arith.constant 7 : i32
    %c16_i32_246 = arith.constant 16 : i32
    %659 = arith.muli %c7_i32_245, %c16_i32_246 : i32
    %660 = tpu.assume_multiple %659, 16 : i32
    %661 = arith.index_cast %660 : i32 to index
    %c0_247 = arith.constant 0 : index
    %662 = vector.load %arg13[%661, %c0_247] : memref<128x128xf32, #tpu.memory_space<vmem>>, vector<16x128xf32>
    %663 = arith.truncf %653 : vector<16x32xf32> to vector<16x32xbf16>
    %cst_248 = arith.constant dense<0.000000e+00> : vector<16x128xf32>
    %664 = tpu.matmul %663, %347, %cst_248 {dimension_numbers = #tpu.dot_dimension_numbers<[1], [0], [0], [1], [0, 0, 1, 1], [], []>} : vector<16x32xbf16>, vector<32x128xbf16>, vector<16x128xf32> -> vector<16x128xf32>
    %665 = arith.addf %662, %664 : vector<16x128xf32>
    %666 = vector.extract_strided_slice %665 {offsets = [0, 0], sizes = [16, 32], strides = [1, 1]} : vector<16x128xf32> to vector<16x32xf32>
    %cst_249 = arith.constant 5.000000e-01 : f32
    %667 = vector.broadcast %cst_249 : f32 to vector<16x32xf32>
    %668 = arith.mulf %667, %666 : vector<16x32xf32>
    %669 = math.tanh %668 : vector<16x32xf32>
    %cst_250 = arith.constant 5.000000e-01 : f32
    %670 = vector.broadcast %cst_250 : f32 to vector<16x32xf32>
    %671 = arith.mulf %670, %669 : vector<16x32xf32>
    %cst_251 = arith.constant 5.000000e-01 : f32
    %672 = vector.broadcast %cst_251 : f32 to vector<16x32xf32>
    %673 = arith.addf %671, %672 : vector<16x32xf32>
    %674 = vector.extract_strided_slice %665 {offsets = [0, 32], sizes = [16, 32], strides = [1, 1]} : vector<16x128xf32> to vector<16x32xf32>
    %cst_252 = arith.constant 5.000000e-01 : f32
    %675 = vector.broadcast %cst_252 : f32 to vector<16x32xf32>
    %676 = arith.mulf %675, %674 : vector<16x32xf32>
    %677 = math.tanh %676 : vector<16x32xf32>
    %cst_253 = arith.constant 5.000000e-01 : f32
    %678 = vector.broadcast %cst_253 : f32 to vector<16x32xf32>
    %679 = arith.mulf %678, %677 : vector<16x32xf32>
    %cst_254 = arith.constant 5.000000e-01 : f32
    %680 = vector.broadcast %cst_254 : f32 to vector<16x32xf32>
    %681 = arith.addf %679, %680 : vector<16x32xf32>
    %682 = vector.extract_strided_slice %665 {offsets = [0, 64], sizes = [16, 32], strides = [1, 1]} : vector<16x128xf32> to vector<16x32xf32>
    %683 = math.tanh %682 : vector<16x32xf32>
    %684 = vector.extract_strided_slice %665 {offsets = [0, 96], sizes = [16, 32], strides = [1, 1]} : vector<16x128xf32> to vector<16x32xf32>
    %cst_255 = arith.constant 5.000000e-01 : f32
    %685 = vector.broadcast %cst_255 : f32 to vector<16x32xf32>
    %686 = arith.mulf %685, %684 : vector<16x32xf32>
    %687 = math.tanh %686 : vector<16x32xf32>
    %cst_256 = arith.constant 5.000000e-01 : f32
    %688 = vector.broadcast %cst_256 : f32 to vector<16x32xf32>
    %689 = arith.mulf %688, %687 : vector<16x32xf32>
    %cst_257 = arith.constant 5.000000e-01 : f32
    %690 = vector.broadcast %cst_257 : f32 to vector<16x32xf32>
    %691 = arith.addf %689, %690 : vector<16x32xf32>
    %692 = arith.mulf %681, %651 : vector<16x32xf32>
    %693 = arith.mulf %673, %683 : vector<16x32xf32>
    %694 = arith.addf %692, %693 : vector<16x32xf32>
    %695 = math.tanh %694 : vector<16x32xf32>
    %696 = arith.mulf %691, %695 : vector<16x32xf32>
    %697 = arith.truncf %696 : vector<16x32xf32> to vector<16x32xbf16>
    %698 = arith.index_cast %660 : i32 to index
    %c0_258 = arith.constant 0 : index
    %699 = vector.load %arg10[%698, %c0_258] : memref<128x32xbf16, #tpu.memory_space<vmem>>, vector<16x32xbf16>
    tpu.vector_store %arg10[%698, %c0_258], %697 {strides = array<i32>} : memref<128x32xbf16, #tpu.memory_space<vmem>>, vector<16x32xbf16>,
    %700 = arith.index_cast %660 : i32 to index
    %c0_259 = arith.constant 0 : index
    %701 = vector.load %arg9[%700, %c0_259] : memref<128x32xf32, #tpu.memory_space<vmem>>, vector<16x32xf32>
    tpu.vector_store %arg9[%700, %c0_259], %696 {strides = array<i32>} : memref<128x32xf32, #tpu.memory_space<vmem>>, vector<16x32xf32>,
    %c8_i32_260 = arith.constant 8 : i32
    %c1_261 = arith.constant 1 : index
    %c0_262 = arith.constant 0 : index
    %c0_263 = arith.constant 0 : index
    %702 = vector.load %arg11[%c1_261, %c0_262, %c0_263] : memref<2x16x32xf32, #tpu.memory_space<vmem>>, vector<1x16x32xf32>
    %703 = vector.shape_cast %702 : vector<1x16x32xf32> to vector<16x32xf32>
    %704 = vector.shape_cast %696 : vector<16x32xf32> to vector<1x16x32xf32>
    tpu.vector_store %arg11[%c1_261, %c0_262, %c0_263], %704 {strides = array<i32>} : memref<2x16x32xf32, #tpu.memory_space<vmem>>, vector<1x16x32xf32>,
    %c1_264 = arith.constant 1 : index
    %c0_265 = arith.constant 0 : index
    %c0_266 = arith.constant 0 : index
    %705 = vector.load %arg12[%c1_264, %c0_265, %c0_266] : memref<2x16x32xf32, #tpu.memory_space<vmem>>, vector<1x16x32xf32>
    %706 = vector.shape_cast %705 : vector<1x16x32xf32> to vector<16x32xf32>
    %707 = vector.shape_cast %694 : vector<16x32xf32> to vector<1x16x32xf32>
    tpu.vector_store %arg12[%c1_264, %c0_265, %c0_266], %707 {strides = array<i32>} : memref<2x16x32xf32, #tpu.memory_space<vmem>>, vector<1x16x32xf32>,
    return
  }
}

</mosaic_0001>

<bundles_post_ra>
// kernel: tpu_custom_call.1
= control target key start
LH: loop header
LB: loop body
LE: loop exit
PB: predicated region body
PF: predicated region fallthrough
CT: control target
= control target key end

     0   :  { %18 = vsyncpa [#allocation4], 0  ;;  %s3416_s0 = inlined_call_operand.vmem [shape: bf16[128,32], index: 0, kind: input, shape index: {}]   ;;  %s3417_s1 = inlined_call_operand.vmem [shape: f32[2,16,32], index: 1, kind: input, shape index: {}]   ;;  %s3418_s2 = inlined_call_operand.vmem [shape: f32[2,16,32], index: 2, kind: input, shape index: {}]   ;;  %s3419_s3 = inlined_call_operand.vmem [shape: bf16[32,128], index: 3, kind: input, shape index: {}]   ;;  %s3420_s4 = inlined_call_operand.hbm [shape: bf16[32,128], index: 4, kind: input, shape index: {}]   ;;  %s3421_s5 = inlined_call_operand.vmem [shape: f32[1,128], index: 5, kind: input, shape index: {}]   ;;  %s3422_s6 = inlined_call_operand.hbm [shape: bf16[32,128], index: 6, kind: input, shape index: {}]   ;;  %s3423_s7 = inlined_call_operand.hbm [shape: bf16[32,128], index: 7, kind: input, shape index: {}]   ;;  %s3424_s8 = inlined_call_operand.vmem [shape: f32[1,128], index: 8, kind: input, shape index: {}]   ;;  %s3425_s9 = inlined_call_operand.vmem [shape: f32[128,32], index: 9, kind: output, shape index: {0}]   ;;  %s3426_s10 = inlined_call_operand.vmem [shape: bf16[128,32], index: 10, kind: output, shape index: {1}]   ;;  %s3427_s11 = inlined_call_operand.hbm [shape: f32[2,16,32], index: 11, kind: output, shape index: {2}]   ;;  %s3428_s12 = inlined_call_operand.hbm [shape: f32[2,16,32], index: 12, kind: output, shape index: {3}]  }
   0x1   :  { %19 = vsyncpa [#allocation7], 0 }
   0x2   :  { %20 = vsyncpa [#allocation5], 0 }
   0x3   :  { %21 = vsyncpa [#allocation11], 0  ;;  %s49_s23 = sshll.u32 %s3422_s6, 4  ;;  %s2494_s24 = smov [#allocation6]   ;;  %s50_s23 = int_to_ptr.hbm [resolvable:$true] %s49_s23 }
   0x4   :  { %s51_s25 = sshll.u32 %s2494_s24, 4  ;;  %s34_s28 = sshll.u32 %s3420_s4, 4  ;;  %s52_s25 = int_to_ptr.vmem [resolvable:$true] %s51_s25  ;;  %s35_s28 = int_to_ptr.hbm [resolvable:$true] %s34_s28 }
   0x5   :  { %s2495_s29 = smov 64   ;;  %s2496_s30 = smov 4  }
   0x6   :  { %57 = dma.hbm_to_vmem [thread:$0]  %s50_s23, 256, %s52_s25, [#allocation7], %s2495_s29, %s2495_s29, %s2496_s30  }
   0x7   :  { %s2497_s13 = smov [#allocation3]   ;;  %s62_s6 = sshll.u32 %s3423_s7, 4  ;;  %s63_s6 = int_to_ptr.hbm [resolvable:$true] %s62_s6 }
   0x8   :  { %s36_s14 = sshll.u32 %s2497_s13, 4  ;;  %s2498_s17 = smov [#allocation8]   ;;  %s37_s14 = int_to_ptr.vmem [resolvable:$true] %s36_s14 }
   0x9   :  { %42 = dma.hbm_to_vmem [thread:$0]  %s35_s28, 256, %s37_s14, [#allocation4], %s2495_s29, %s2495_s29, %s2496_s30  }
   0xa   :  { %s64_s18 = sshll.u32 %s2498_s17, 4  ;;  %s65_s18 = int_to_ptr.vmem [resolvable:$true] %s64_s18 }
   0xb   :  { %70 = dma.hbm_to_vmem [thread:$0]  %s63_s6, 256, %s65_s18, [#allocation7], %s2495_s29, %s2495_s29, %s2496_s30  }
   0xc   :  { %2486 = dma.done.wait [#allocation4], 256  }
   0xd   :  { %2487 = vsyncadd [#allocation4], 4294967040 }
   0xe   :  { %2488 = dma.done.wait [#allocation7], 512  }
   0xf   :  { %2489 = vsyncadd [#allocation7], 4294966784  ;;  %v2136_v0 = vld [vmem:[%s3419_s3 + $0x8] sm:$0xff]  ;;  %v2135_v2 = vld [vmem:[%s3419_s3] sm:$0xff]  ;;  %s2499_s27 = smov 32   ;;  %vm166_vm0 = vcmask 261120  }
  0x10   :  { %v2588_v1 = vld [vmem:[#allocation3 + $0x8] sm:$0xff]  ;;  %v2593_v3 = vld [vmem:[#allocation3] sm:$0xff]  ;;  %197 = vmatpush.bf16.msra.mxu0 %v2136_v0  ;;  %vm356_vm1 = vcmask 257024   ;;  %s2500_s20 = smov 96   ;;  %s2501_s6 = smov [#allocation10]  }
  0x11   :  { %284 = vmatpush.bf16.msra.mxu1 %v2588_v1  ;;  %v256_v4 = vld [vmem:[%s3417_s1] sm:$0xff]  ;;  %v257_v5 = vld [vmem:[%s3417_s1 + $0x8] sm:$0xff]  ;;  %376 = vmatpush.bf16.msra.mxu2 %v2588_v1  ;;  %s1938_s4 = sshll.u32 %s3428_s12, 4  ;;  %s2504_s28 = smov [#allocation9]   ;;  %s1939_s4 = int_to_ptr.hbm [resolvable:$true] %s1938_s4 }
  0x12   :  { %v258_v6 = vld [vmem:[%s3418_s2] sm:$0xff]  ;;  %v262_v8 = vpack.c.bf16 %v257_v5, %v256_v4  ;;  %v259_v9 = vld [vmem:[%s3418_s2 + $0x8] sm:$0xff]  ;;  %s1925_s14 = sshll.u32 %s3427_s11, 4  ;;  %s1926_s14 = int_to_ptr.hbm [resolvable:$true] %s1925_s14 }
  0x13   :  { %306 = vrot.lane.b32.xlu1 %v258_v6, %s2499_s27  ;;  %v2139_v7 = vld [vmem:[%s3416_s0] sm:$0xff]  ;;  %v2140_v43 = vld [vmem:[%s3416_s0 + $0x8] sm:$0xff] }
  0x14   :  { %198 = vmatpush.bf16.msra.mxu0 %v2135_v2  ;;  %v2627_v10 = vld [vmem:[%s3421_s5] ss:$0 sm:$0xff] }
  0x15   :  { %285 = vmatpush.bf16.msra.mxu1 %v2593_v3  ;;  %377 = vmatpush.bf16.msra.mxu2 %v2593_v3 }
  0x17   :  { %2001 = vmatmul.msk.bf16.vlgmr.msra.gmra.mxu0 %vm166_vm0, %v2139_v7 }
  0x18   :  { %2017 = vmatmul.msk.bf16.vlgmr.msra.gmra.mxu1 %vm166_vm0, %v262_v8 }
  0x19   :  { %460 = vmatpush.bf16.msrb.mxu1 %v2588_v1  ;;  %628 = vmatpush.bf16.msrb.mxu2 %v2588_v1 }
  0x1b   :  { %308 = vrot.lane.b32.xlu1 %v259_v9, %s2499_s27 }
  0x1d   :  { %461 = vmatpush.bf16.msrb.mxu1 %v2593_v3  ;;  %629 = vmatpush.bf16.msrb.mxu2 %v2593_v3 }
  0x21   :  { %544 = vmatpush.bf16.msra.mxu1 %v2588_v1 }
  0x25   :  { %545 = vmatpush.bf16.msra.mxu1 %v2593_v3 }
  0x27   :  { %2002 = vmatmul.msk.bf16.gmra.mxu0 %vm166_vm0, %v2140_v43 }
  0x85   :  { %v307_v33 = vpop.permute.xlu1 %306 }
  0x8d   :  { %v309_v37 = vpop.permute.xlu1 %308 }
  0x94   :  { %v200_v11 = vpop.f32.mrf.mxu0 }
  0x95   :  { %v287_v12 = vpop.f32.mrf.mxu1  ;;  %v201_v13 = vadd.f32 %v2627_v10, %v200_v11 }
  0x97   :  { %v292_v14 = vadd.f32 %v287_v12, %v201_v13 }
  0x99   :  { %2172 = vtanh.f32 %v292_v14  ;;  %v294_v21 = vmul.f32 0.5, %v292_v14 }
  0x9c   :  { %v202_v15 = vpop.f32.mrf.mxu0 }
  0x9d   :  { %v203_v16 = vadd.f32 %v2627_v10, %v202_v15  ;;  %v289_v17 = vpop.f32.mrf.mxu1 }
  0x9f   :  { %v2173_v18 = vpop.eup %2172  ;;  %v293_v19 = vadd.f32 %v289_v17, %v203_v16 }
  0xa0   :  { %316 = vrot.lane.b32.xlu0 %v2173_v18, %s2495_s29 }
  0xa1   :  { %2174 = vtanh.f32 %v293_v19  ;;  %v295_v22 = vmul.f32 0.5, %v293_v19 }
  0xa2   :  { %2176 = vtanh.f32 %v294_v21 }
  0xa3   :  { %2178 = vtanh.f32 %v295_v22 }
  0xa4   :  { %v205_v54 = vpop.f32.mrf.mxu0 }
  0xa5   :  { %v206_v55 = vadd.f32 %v2627_v10, %v205_v54 }
  0xa7   :  { %v2175_v20 = vpop.eup %2174 }
  0xa8   :  { %318 = vrot.lane.b32.xlu0 %v2175_v20, %s2495_s29  ;;  %v2177_v23 = vpop.eup %2176 }
  0xa9   :  { %v298_v24 = vmul.f32 0.5, %v2177_v23  ;;  %v2179_v26 = vpop.eup %2178  ;;  %v2141_v23 = vld [vmem:[%s3416_s0 + $0x10] sm:$0xff] }
  0xaa   :  { %v299_v29 = vmul.f32 0.5, %v2179_v26  ;;  %2003 = vmatmul.msk.bf16.gmra.mxu0 %vm166_vm0, %v2141_v23 }
  0xab   :  { %v300_v25 = vadd.f32 0.5, %v298_v24 }
  0xac   :  { %v301_v30 = vadd.f32 0.5, %v299_v29  ;;  %v207_v58 = vpop.f32.mrf.mxu0 }
  0xad   :  { %v312_v34 = vmul.f32 %v307_v33, %v300_v25  ;;  %v208_v59 = vadd.f32 %v2627_v10, %v207_v58 }
  0xae   :  { %v313_v38 = vmul.f32 %v309_v37, %v301_v30 }
 0x112   :  { %v317_v27 = vpop.permute.xlu0 %316 }
 0x113   :  { %v322_v28 = vmul.f32 %v317_v27, %v300_v25 }
 0x115   :  { %326 = vrot.lane.b32.xlu2 %v322_v28, %s2499_s27 }
 0x11a   :  { %v319_v31 = vpop.permute.xlu0 %318 }
 0x11b   :  { %v323_v32 = vmul.f32 %v319_v31, %v301_v30 }
 0x11d   :  { %328 = vrot.lane.b32.xlu2 %v323_v32, %s2499_s27 }
 0x16f   :  { %v327_v35 = vpop.permute.xlu2 %326 }
 0x170   :  { %v332_v36 = vadd.f32 %v327_v35, %v312_v34  ;;  %v210_v34 = vpop.f32.mrf.mxu0 }
 0x171   :  { %v211_v35 = vadd.f32 %v2627_v10, %v210_v34 }
 0x172   :  { %2180 = vtanh.f32 %v332_v36 }
 0x177   :  { %v329_v39 = vpop.permute.xlu2 %328 }
 0x178   :  { %v2181_v40 = vpop.eup %2180  ;;  %v333_v41 = vadd.f32 %v329_v39, %v313_v38  ;;  %v212_v38 = vpop.f32.mrf.mxu0 }
 0x179   :  { %338 = vrot.lane.b32.xlu0 %v2181_v40, %s2495_s29  ;;  %v213_v39 = vadd.f32 %v2627_v10, %v212_v38 }
 0x17a   :  { %2182 = vtanh.f32 %v333_v41 }
 0x180   :  { %v2183_v42 = vpop.eup %2182 }
 0x181   :  { %340 = vrot.lane.b32.xlu1 %v2183_v42, %s2495_s29 }
 0x1eb   :  { %v339_v44 = vpop.permute.xlu0 %338 }
 0x1ec   :  { %v344_v45 = vmul.f32 %v339_v44, %v300_v25 }
 0x1ee   :  { %v2641_v47 = vpack.c.bf16 %v344_v45, %v344_v45 }
 0x1f0   :  { %v362_v50 = vunpack.c.l.b16 %v2641_v47 }
 0x1f3   :  { %v341_v46 = vpop.permute.xlu1 %340 }
 0x1f4   :  { %v345_v48 = vmul.f32 %v341_v46, %v301_v30 }
 0x1f6   :  { %v2643_v49 = vpack.c.bf16 %v345_v48, %v345_v48 }
 0x1f8   :  { %v363_v51 = vunpack.c.l.b16 %v2643_v49 }
 0x1fa   :  { %v364_v52 = vpack.c.b16 %v363_v51, %v362_v50 }
 0x1fc   :  { %365 = vrot.lane.b32.xlu2 %v364_v52, %s2499_s27 }
 0x256   :  { %v366_v53 = vpop.permute.xlu2 %365 }
 0x257   :  { %2018 = vmatmul.msk.bf16.vlgmr.msra.gmra.mxu2 %vm166_vm0, %v366_v53 }
 0x258   :  { %712 = vmatpush.bf16.msra.mxu2 %v2588_v1 }
 0x25c   :  { %713 = vmatpush.bf16.msra.mxu2 %v2593_v3 }
 0x2da   :  { %v379_v56 = vpop.f32.mrf.mxu2 }
 0x2db   :  { %v384_v57 = vadd.f32 %v379_v56, %v206_v55 }
 0x2dd   :  { %2184 = vtanh.f32 %v384_v57  ;;  %v386_v0 = vmul.f32 0.5, %v384_v57 }
 0x2e2   :  { %v381_v60 = vpop.f32.mrf.mxu2 }
 0x2e3   :  { %v2185_v61 = vpop.eup %2184  ;;  %v385_v62 = vadd.f32 %v381_v60, %v208_v59 }
 0x2e4   :  { %400 = vrot.lane.b32.xlu0 %v2185_v61, %s2495_s29 }
 0x2e5   :  { %2186 = vtanh.f32 %v385_v62  ;;  %v387_v2 = vmul.f32 0.5, %v385_v62 }
 0x2e6   :  { %2188 = vtanh.f32 %v386_v0 }
 0x2e7   :  { %2190 = vtanh.f32 %v387_v2 }
 0x2eb   :  { %v2187_v63 = vpop.eup %2186 }
 0x2ec   :  { %402 = vrot.lane.b32.xlu1 %v2187_v63, %s2495_s29  ;;  %v2189_v4 = vpop.eup %2188 }
 0x2ed   :  { %v390_v5 = vmul.f32 0.5, %v2189_v4  ;;  %v2191_v7 = vpop.eup %2190  ;;  %v2142_v4 = vld [vmem:[%s3416_s0 + $0x18] sm:$0xff] }
 0x2ee   :  { %v391_v11 = vmul.f32 0.5, %v2191_v7  ;;  %2004 = vmatmul.msk.bf16.gmra.mxu0 %vm166_vm0, %v2142_v4 }
 0x2ef   :  { %v392_v6 = vadd.f32 0.5, %v390_v5 }
 0x2f0   :  { %v393_v12 = vadd.f32 0.5, %v391_v11 }
 0x2f1   :  { %v396_v15 = vmul.f32 %v392_v6, %v332_v36 }
 0x2f2   :  { %v397_v19 = vmul.f32 %v393_v12, %v333_v41 }
 0x356   :  { %v401_v8 = vpop.permute.xlu0 %400 }
 0x357   :  { %v406_v9 = vmul.f32 %v401_v8, %v392_v6 }
 0x359   :  { %410 = vrot.lane.b32.xlu2 %v406_v9, %s2499_s27 }
 0x35e   :  { %v403_v13 = vpop.permute.xlu1 %402 }
 0x35f   :  { %v407_v14 = vmul.f32 %v403_v13, %v393_v12 }
 0x361   :  { %412 = vrot.lane.b32.xlu0 %v407_v14, %s2499_s27 }
 0x3b3   :  { %v411_v16 = vpop.permute.xlu2 %410 }
 0x3b4   :  { %v416_v17 = vadd.f32 %v411_v16, %v396_v15  ;;  %v215_v16 = vpop.f32.mrf.mxu0 }
 0x3b6   :  { %2192 = vtanh.f32 %v416_v17 }
 0x3bc   :  { %v2193_v18 = vpop.eup %2192 }
 0x3bd   :  { %422 = vrot.lane.b32.xlu1 %v2193_v18, %s2495_s29 }
 0x3d3   :  { %v413_v20 = vpop.permute.xlu0 %412 }
 0x3d4   :  { %v417_v21 = vadd.f32 %v413_v20, %v397_v19  ;;  %v217_v20 = vpop.f32.mrf.mxu0 }
 0x3d6   :  { %2194 = vtanh.f32 %v417_v21 }
 0x3dc   :  { %v2195_v22 = vpop.eup %2194 }
 0x3dd   :  { %424 = vrot.lane.b32.xlu2 %v2195_v22, %s2495_s29 }
 0x42f   :  { %v423_v24 = vpop.permute.xlu1 %422 }
 0x430   :  { %v428_v25 = vmul.f32 %v423_v24, %v392_v6 }
 0x432   :  { %v2663_v27 = vpack.c.bf16 %v428_v25, %v428_v25 }
 0x434   :  { %v446_v30 = vunpack.c.l.b16 %v2663_v27 }
 0x437   :  { %v425_v26 = vpop.permute.xlu2 %424 }
 0x438   :  { %v429_v28 = vmul.f32 %v425_v26, %v393_v12 }
 0x43a   :  { %v2665_v29 = vpack.c.bf16 %v429_v28, %v429_v28 }
 0x43c   :  { %v447_v31 = vunpack.c.l.b16 %v2665_v29 }
 0x43e   :  { %v448_v32 = vpack.c.b16 %v447_v31, %v446_v30 }
 0x440   :  { %449 = vrot.lane.b32.xlu0 %v448_v32, %s2499_s27 }
 0x4b2   :  { %v450_v33 = vpop.permute.xlu0 %449 }
 0x4b3   :  { %2021 = vmatmul.msk.bf16.vlgmr.msrb.gmra.mxu1 %vm166_vm0, %v450_v33 }
 0x4b4   :  { %796 = vmatpush.bf16.msrb.mxu1 %v2588_v1 }
 0x4b8   :  { %797 = vmatpush.bf16.msrb.mxu1 %v2593_v3 }
 0x530   :  { %v463_v36 = vpop.f32.mrf.mxu1 }
 0x531   :  { %v468_v37 = vadd.f32 %v463_v36, %v211_v35 }
 0x533   :  { %2196 = vtanh.f32 %v468_v37  ;;  %v470_v48 = vmul.f32 0.5, %v468_v37 }
 0x538   :  { %v465_v40 = vpop.f32.mrf.mxu1 }
 0x539   :  { %v2197_v41 = vpop.eup %2196  ;;  %v469_v42 = vadd.f32 %v465_v40, %v213_v39 }
 0x53a   :  { %484 = vrot.lane.b32.xlu1 %v2197_v41, %s2495_s29 }
 0x53b   :  { %2198 = vtanh.f32 %v469_v42  ;;  %v471_v44 = vmul.f32 0.5, %v469_v42 }
 0x53d   :  { %2200 = vtanh.f32 %v471_v44 }
 0x53e   :  { %2202 = vtanh.f32 %v470_v48 }
 0x541   :  { %v2199_v43 = vpop.eup %2198 }
 0x542   :  { %486 = vrot.lane.b32.xlu2 %v2199_v43, %s2495_s29 }
 0x543   :  { %v2201_v45 = vpop.eup %2200 }
 0x544   :  { %v475_v46 = vmul.f32 0.5, %v2201_v45  ;;  %v2203_v53 = vpop.eup %2202 }
 0x545   :  { %v474_v54 = vmul.f32 0.5, %v2203_v53 }
 0x546   :  { %v477_v50 = vadd.f32 0.5, %v475_v46 }
 0x547   :  { %v476_v55 = vadd.f32 0.5, %v474_v54 }
 0x548   :  { %v481_v58 = vmul.f32 %v477_v50, %v417_v21  ;;  %v218_v21 = vadd.f32 %v2627_v10, %v217_v20 }
 0x549   :  { %v480_v62 = vmul.f32 %v476_v55, %v416_v17  ;;  %v216_v17 = vadd.f32 %v2627_v10, %v215_v16 }
 0x59c   :  { %v487_v51 = vpop.permute.xlu2 %486 }
 0x59d   :  { %v491_v52 = vmul.f32 %v487_v51, %v477_v50 }
 0x59f   :  { %496 = vrot.lane.b32.xlu1 %v491_v52, %s2499_s27 }
 0x5ac   :  { %v485_v56 = vpop.permute.xlu1 %484 }
 0x5ad   :  { %v490_v57 = vmul.f32 %v485_v56, %v476_v55 }
 0x5af   :  { %494 = vrot.lane.b32.xlu0 %v490_v57, %s2499_s27 }
 0x611   :  { %v497_v59 = vpop.permute.xlu1 %496 }
 0x612   :  { %v501_v60 = vadd.f32 %v497_v59, %v481_v58 }
 0x614   :  { %2204 = vtanh.f32 %v501_v60 }
 0x61a   :  { %v2205_v61 = vpop.eup %2204 }
 0x61b   :  { %508 = vrot.lane.b32.xlu0 %v2205_v61, %s2495_s29 }
 0x621   :  { %v495_v63 = vpop.permute.xlu0 %494 }
 0x622   :  { %v500_v0 = vadd.f32 %v495_v63, %v480_v62 }
 0x624   :  { %2206 = vtanh.f32 %v500_v0 }
 0x62a   :  { %v2207_v2 = vpop.eup %2206 }
 0x62b   :  { %506 = vrot.lane.b32.xlu2 %v2207_v2, %s2495_s29 }
 0x685   :  { %v507_v5 = vpop.permute.xlu2 %506 }
 0x686   :  { %v512_v6 = vmul.f32 %v507_v5, %v476_v55 }
 0x688   :  { %v2685_v8 = vpack.c.bf16 %v512_v6, %v512_v6 }
 0x68a   :  { %v530_v12 = vunpack.c.l.b16 %v2685_v8 }
 0x68d   :  { %v509_v7 = vpop.permute.xlu0 %508 }
 0x68e   :  { %v513_v9 = vmul.f32 %v509_v7, %v477_v50  ;;  %v2143_v50 = vld [vmem:[%s3416_s0 + $0x20] sm:$0xff] }
 0x68f   :  { %2005 = vmatmul.msk.bf16.gmra.mxu0 %vm166_vm0, %v2143_v50 }
 0x690   :  { %v2687_v11 = vpack.c.bf16 %v513_v9, %v513_v9 }
 0x692   :  { %v531_v13 = vunpack.c.l.b16 %v2687_v11 }
 0x694   :  { %v532_v14 = vpack.c.b16 %v531_v13, %v530_v12 }
 0x696   :  { %533 = vrot.lane.b32.xlu1 %v532_v14, %s2499_s27 }
 0x708   :  { %v534_v15 = vpop.permute.xlu1 %533 }
 0x709   :  { %2024 = vmatmul.msk.bf16.vlgmr.msra.gmra.mxu1 %vm166_vm0, %v534_v15 }
 0x70c   :  { %v220_v61 = vpop.f32.mrf.mxu0 }
 0x70d   :  { %v221_v62 = vadd.f32 %v2627_v10, %v220_v61 }
 0x714   :  { %v222_v2 = vpop.f32.mrf.mxu0 }
 0x715   :  { %v223_v4 = vadd.f32 %v2627_v10, %v222_v2 }
 0x786   :  { %v547_v18 = vpop.f32.mrf.mxu1 }
 0x787   :  { %v552_v19 = vadd.f32 %v547_v18, %v216_v17 }
 0x789   :  { %2208 = vtanh.f32 %v552_v19  ;;  %v554_v26 = vmul.f32 0.5, %v552_v19 }
 0x78e   :  { %v549_v22 = vpop.f32.mrf.mxu1 }
 0x78f   :  { %v2209_v23 = vpop.eup %2208  ;;  %v553_v24 = vadd.f32 %v549_v22, %v218_v21 }
 0x790   :  { %568 = vrot.lane.b32.xlu2 %v2209_v23, %s2495_s29 }
 0x791   :  { %2210 = vtanh.f32 %v553_v24  ;;  %v555_v34 = vmul.f32 0.5, %v553_v24 }
 0x792   :  { %2212 = vtanh.f32 %v554_v26 }
 0x793   :  { %2214 = vtanh.f32 %v555_v34 }
 0x797   :  { %v2211_v25 = vpop.eup %2210 }
 0x798   :  { %570 = vrot.lane.b32.xlu0 %v2211_v25, %s2495_s29  ;;  %v2213_v28 = vpop.eup %2212 }
 0x799   :  { %v558_v30 = vmul.f32 0.5, %v2213_v28  ;;  %v2215_v35 = vpop.eup %2214 }
 0x79a   :  { %v559_v36 = vmul.f32 0.5, %v2215_v35 }
 0x79b   :  { %v560_v31 = vadd.f32 0.5, %v558_v30 }
 0x79c   :  { %v561_v37 = vadd.f32 0.5, %v559_v36 }
 0x79d   :  { %v564_v40 = vmul.f32 %v560_v31, %v500_v0 }
 0x79e   :  { %v565_v43 = vmul.f32 %v561_v37, %v501_v60 }
 0x7ea   :  { %v569_v32 = vpop.permute.xlu2 %568 }
 0x7eb   :  { %v574_v33 = vmul.f32 %v569_v32, %v560_v31  ;;  %v2144_v32 = vld [vmem:[%s3416_s0 + $0x28] sm:$0xff] }
 0x7ec   :  { %2006 = vmatmul.msk.bf16.gmra.mxu0 %vm166_vm0, %v2144_v32  ;;  %v2783_v32 = vld [vmem:[#allocation8] sm:$0xff] }
 0x7ed   :  { %578 = vrot.lane.b32.xlu1 %v574_v33, %s2499_s27 }
 0x80a   :  { %v571_v38 = vpop.permute.xlu0 %570 }
 0x80b   :  { %v575_v39 = vmul.f32 %v571_v38, %v561_v37 }
 0x80d   :  { %580 = vrot.lane.b32.xlu2 %v575_v39, %s2499_s27 }
 0x85f   :  { %v579_v41 = vpop.permute.xlu1 %578 }
 0x860   :  { %v584_v42 = vadd.f32 %v579_v41, %v564_v40 }
 0x862   :  { %2216 = vtanh.f32 %v584_v42 }
 0x867   :  { %v581_v44 = vpop.permute.xlu2 %580 }
 0x868   :  { %v2217_v45 = vpop.eup %2216  ;;  %v585_v46 = vadd.f32 %v581_v44, %v565_v43 }
 0x869   :  { %590 = vrot.lane.b32.xlu0 %v2217_v45, %s2495_s29  ;;  %v225_v43 = vpop.f32.mrf.mxu0 }
 0x86a   :  { %2218 = vtanh.f32 %v585_v46  ;;  %v226_v44 = vadd.f32 %v2627_v10, %v225_v43 }
 0x870   :  { %v2219_v48 = vpop.eup %2218 }
 0x871   :  { %592 = vrot.lane.b32.xlu1 %v2219_v48, %s2495_s29  ;;  %v227_v48 = vpop.f32.mrf.mxu0 }
 0x872   :  { %v228_v50 = vadd.f32 %v2627_v10, %v227_v48 }
 0x8db   :  { %v591_v51 = vpop.permute.xlu0 %590 }
 0x8dc   :  { %v596_v52 = vmul.f32 %v591_v51, %v560_v31 }
 0x8de   :  { %v2705_v54 = vpack.c.bf16 %v596_v52, %v596_v52 }
 0x8e0   :  { %v614_v57 = vunpack.c.l.b16 %v2705_v54 }
 0x8e3   :  { %v593_v53 = vpop.permute.xlu1 %592 }
 0x8e4   :  { %v597_v55 = vmul.f32 %v593_v53, %v561_v37 }
 0x8e6   :  { %v2707_v56 = vpack.c.bf16 %v597_v55, %v597_v55 }
 0x8e8   :  { %v615_v58 = vunpack.c.l.b16 %v2707_v56 }
 0x8ea   :  { %v616_v59 = vpack.c.b16 %v615_v58, %v614_v57 }
 0x8ec   :  { %617 = vrot.lane.b32.xlu2 %v616_v59, %s2499_s27 }
 0x946   :  { %v618_v60 = vpop.permute.xlu2 %617 }
 0x947   :  { %2027 = vmatmul.msk.bf16.vlgmr.msrb.gmra.mxu2 %vm166_vm0, %v618_v60 }
 0x948   :  { %880 = vmatpush.bf16.msrb.mxu2 %v2588_v1 }
 0x94c   :  { %881 = vmatpush.bf16.msrb.mxu2 %v2593_v3 }
 0x9ca   :  { %v631_v63 = vpop.f32.mrf.mxu2 }
 0x9cb   :  { %v636_v0 = vadd.f32 %v631_v63, %v221_v62 }
 0x9cd   :  { %2220 = vtanh.f32 %v636_v0  ;;  %v638_v1 = vmul.f32 0.5, %v636_v0 }
 0x9d2   :  { %v633_v5 = vpop.f32.mrf.mxu2 }
 0x9d3   :  { %v2221_v6 = vpop.eup %2220  ;;  %v637_v7 = vadd.f32 %v633_v5, %v223_v4 }
 0x9d4   :  { %652 = vrot.lane.b32.xlu0 %v2221_v6, %s2495_s29 }
 0x9d5   :  { %2222 = vtanh.f32 %v637_v7  ;;  %v639_v3 = vmul.f32 0.5, %v637_v7 }
 0x9d6   :  { %2224 = vtanh.f32 %v638_v1 }
 0x9d7   :  { %2226 = vtanh.f32 %v639_v3 }
 0x9db   :  { %v2223_v9 = vpop.eup %2222 }
 0x9dc   :  { %654 = vrot.lane.b32.xlu1 %v2223_v9, %s2495_s29  ;;  %v2225_v12 = vpop.eup %2224 }
 0x9dd   :  { %v642_v13 = vmul.f32 0.5, %v2225_v12  ;;  %v2227_v15 = vpop.eup %2226 }
 0x9de   :  { %v643_v18 = vmul.f32 0.5, %v2227_v15 }
 0x9df   :  { %v644_v14 = vadd.f32 0.5, %v642_v13 }
 0x9e0   :  { %v645_v19 = vadd.f32 0.5, %v643_v18  ;;  %v2145_v18 = vld [vmem:[%s3416_s0 + $0x30] sm:$0xff] }
 0x9e1   :  { %v648_v22 = vmul.f32 %v644_v14, %v584_v42  ;;  %2007 = vmatmul.msk.bf16.gmra.mxu0 %vm166_vm0, %v2145_v18 }
 0x9e2   :  { %v649_v26 = vmul.f32 %v645_v19, %v585_v46 }
 0xa46   :  { %v653_v16 = vpop.permute.xlu0 %652 }
 0xa47   :  { %v658_v17 = vmul.f32 %v653_v16, %v644_v14  ;;  %v2148_v16 = vld [vmem:[#allocation6 + $0x8] sm:$0xff] }
 0xa48   :  { %1077 = vmatpush.bf16.msra.mxu3 %v2148_v16 }
 0xa49   :  { %662 = vrot.lane.b32.xlu2 %v658_v17, %s2499_s27  ;;  %v2147_v17 = vld [vmem:[#allocation6] sm:$0xff] }
 0xa4c   :  { %1078 = vmatpush.bf16.msra.mxu3 %v2147_v17 }
 0xa4e   :  { %v655_v20 = vpop.permute.xlu1 %654 }
 0xa4f   :  { %v659_v21 = vmul.f32 %v655_v20, %v645_v19 }
 0xa51   :  { %664 = vrot.lane.b32.xlu0 %v659_v21, %s2499_s27 }
 0xaa3   :  { %v663_v23 = vpop.permute.xlu2 %662 }
 0xaa4   :  { %v2721_v24 = vadd.f32 %v663_v23, %v648_v22 }
 0xaa6   :  { %2228 = vtanh.f32 %v2721_v24 }
 0xaac   :  { %v2229_v25 = vpop.eup %2228 }
 0xaad   :  { %674 = vrot.lane.b32.xlu1 %v2229_v25, %s2495_s29 }
 0xac3   :  { %v665_v28 = vpop.permute.xlu0 %664 }
 0xac4   :  { %v669_v30 = vadd.f32 %v665_v28, %v649_v26 }
 0xac6   :  { %2230 = vtanh.f32 %v669_v30 }
 0xacc   :  { %v2231_v31 = vpop.eup %2230 }
 0xacd   :  { %676 = vrot.lane.b32.xlu2 %v2231_v31, %s2495_s29  ;;  %v2780_v31 = vld [vmem:[#allocation8 + $0x8] sm:$0xff] }
 0xace   :  { %1166 = vmatpush.bf16.msra.mxu1 %v2780_v31 }
 0xad2   :  { %1167 = vmatpush.bf16.msra.mxu1 %v2783_v32 }
 0xb1f   :  { %v675_v33 = vpop.permute.xlu1 %674 }
 0xb20   :  { %v680_v34 = vmul.f32 %v675_v33, %v644_v14 }
 0xb22   :  { %v2730_v36 = vpack.c.bf16 %v680_v34, %v680_v34  ;;  %v2087_v34 = vld [vmem:[%s3417_s1 + $0x10] sm:$0xff] }
 0xb24   :  { %v698_v39 = vunpack.c.l.b16 %v2730_v36 }
 0xb27   :  { %v677_v35 = vpop.permute.xlu2 %676 }
 0xb28   :  { %v681_v37 = vmul.f32 %v677_v35, %v645_v19  ;;  %v2088_v35 = vld [vmem:[%s3417_s1 + $0x18] sm:$0xff]  ;;  %s1936_s1 = sshll.u32 %s2501_s6, 4  ;;  %s1937_s1 = int_to_ptr.vmem [resolvable:$true] %s1936_s1 }
 0xb2a   :  { %v2732_v38 = vpack.c.bf16 %v681_v37, %v681_v37  ;;  %v1144_v37 = vpack.c.bf16 %v2088_v35, %v2087_v34 }
 0xb2c   :  { %v699_v40 = vunpack.c.l.b16 %v2732_v38 }
 0xb2e   :  { %v700_v41 = vpack.c.b16 %v699_v40, %v698_v39  ;;  %v230_v39 = vpop.f32.mrf.mxu0 }
 0xb2f   :  { %v231_v40 = vadd.f32 %v2627_v10, %v230_v39 }
 0xb30   :  { %701 = vrot.lane.b32.xlu0 %v700_v41, %s2499_s27 }
 0xb36   :  { %v232_v43 = vpop.f32.mrf.mxu0 }
 0xba2   :  { %v702_v42 = vpop.permute.xlu0 %701 }
 0xba3   :  { %2030 = vmatmul.msk.bf16.vlgmr.msra.gmra.mxu2 %vm166_vm0, %v702_v42 }
 0xba4   :  { %1266 = vmatpush.bf16.msra.mxu2 %v2780_v31 }
 0xba8   :  { %1267 = vmatpush.bf16.msra.mxu2 %v2783_v32 }
 0xc26   :  { %v715_v45 = vpop.f32.mrf.mxu2 }
 0xc27   :  { %v720_v46 = vadd.f32 %v715_v45, %v226_v44  ;;  %v233_v44 = vadd.f32 %v2627_v10, %v232_v43 }
 0xc29   :  { %2232 = vtanh.f32 %v720_v46  ;;  %v722_v60 = vmul.f32 0.5, %v720_v46 }
 0xc2e   :  { %v717_v51 = vpop.f32.mrf.mxu2 }
 0xc2f   :  { %v2233_v52 = vpop.eup %2232  ;;  %v721_v53 = vadd.f32 %v717_v51, %v228_v50  ;;  %v2806_v51 = vld [vmem:[%s3424_s8] ss:$0 sm:$0xff] }
 0xc30   :  { %736 = vrot.lane.b32.xlu1 %v2233_v52, %s2495_s29 }
 0xc31   :  { %2234 = vtanh.f32 %v721_v53  ;;  %v723_v57 = vmul.f32 0.5, %v721_v53 }
 0xc33   :  { %2236 = vtanh.f32 %v723_v57 }
 0xc34   :  { %2238 = vtanh.f32 %v722_v60 }
 0xc37   :  { %v2235_v55 = vpop.eup %2234 }
 0xc38   :  { %738 = vrot.lane.b32.xlu2 %v2235_v55, %s2495_s29 }
 0xc39   :  { %v2237_v58 = vpop.eup %2236 }
 0xc3a   :  { %v727_v59 = vmul.f32 0.5, %v2237_v58  ;;  %v2239_v0 = vpop.eup %2238 }
 0xc3b   :  { %v726_v2 = vmul.f32 0.5, %v2239_v0 }
 0xc3c   :  { %v729_v61 = vadd.f32 0.5, %v727_v59 }
 0xc3d   :  { %v728_v4 = vadd.f32 0.5, %v726_v2 }
 0xc3e   :  { %v733_v7 = vmul.f32 %v729_v61, %v669_v30 }
 0xc92   :  { %v739_v62 = vpop.permute.xlu2 %738 }
 0xc93   :  { %v743_v63 = vmul.f32 %v739_v62, %v729_v61 }
 0xc95   :  { %748 = vrot.lane.b32.xlu1 %v743_v63, %s2499_s27  ;;  %v2089_v63 = vld [vmem:[%s3418_s2 + $0x10] sm:$0xff] }
 0xc9d   :  { %350 = vrot.lane.b32.xlu1 %v2641_v47, %s2499_s27  ;;  %v732_v47 = vmul.f32 %v728_v4, %v2721_v24 }
 0xca2   :  { %v737_v5 = vpop.permute.xlu1 %736 }
 0xca3   :  { %v742_v6 = vmul.f32 %v737_v5, %v728_v4 }
 0xca5   :  { %746 = vrot.lane.b32.xlu0 %v742_v6, %s2499_s27 }
 0xd07   :  { %v749_v9 = vpop.permute.xlu1 %748 }
 0xd08   :  { %v2746_v1 = vadd.f32 %v749_v9, %v733_v7 }
 0xd0a   :  { %2240 = vtanh.f32 %v2746_v1 }
 0xd0f   :  { %v351_v3 = vpop.permute.xlu1 %350 }
 0xd10   :  { %v2241_v12 = vpop.eup %2240  ;;  %357 = vst.msk [vmem:[%s3426_s10] sm:$0xf] %vm356_vm1, %v351_v3 }
 0xd11   :  { %760 = vrot.lane.b32.xlu0 %v2241_v12, %s2495_s29 }
 0xd17   :  { %v747_v13 = vpop.permute.xlu0 %746 }
 0xd18   :  { %v2755_v14 = vadd.f32 %v747_v13, %v732_v47 }
 0xd1a   :  { %2242 = vtanh.f32 %v2755_v14 }
 0xd20   :  { %v2243_v15 = vpop.eup %2242 }
 0xd21   :  { %758 = vrot.lane.b32.xlu2 %v2243_v15, %s2495_s29 }
 0xd29   :  { %352 = vrot.lane.b32.xlu2 %v2643_v49, %s2499_s27 }
 0xd7b   :  { %v759_v19 = vpop.permute.xlu2 %758 }
 0xd7c   :  { %v764_v20 = vmul.f32 %v759_v19, %v728_v4  ;;  %v2090_v19 = vld [vmem:[%s3418_s2 + $0x18] sm:$0xff]  ;;  %s2502_s2 = smov 128  }
 0xd7e   :  { %v2765_v23 = vpack.c.bf16 %v764_v20, %v764_v20 }
 0xd80   :  { %v782_v25 = vunpack.c.l.b16 %v2765_v23 }
 0xd83   :  { %v353_v21 = vpop.permute.xlu2 %352  ;;  %v761_v22 = vpop.permute.xlu0 %760 }
 0xd84   :  { %358 = vst.msk [vmem:[%s3426_s10 + $0x4] sm:$0xf] %vm356_vm1, %v353_v21  ;;  %v765_v49 = vmul.f32 %v761_v22, %v729_v61 }
 0xd86   :  { %v2771_v24 = vpack.c.bf16 %v765_v49, %v765_v49 }
 0xd88   :  { %v783_v26 = vunpack.c.l.b16 %v2771_v24 }
 0xd8a   :  { %v784_v28 = vpack.c.b16 %v783_v26, %v782_v25 }
 0xd8b   :  { %v2151_v30 = vld [vmem:[%s3426_s10] sm:$0xff] }
 0xd8c   :  { %785 = vrot.lane.b32.xlu0 %v784_v28, %s2499_s27  ;;  %2079 = vmatmul.msk.bf16.vlgmr.msra.gmra.mxu3 %vm166_vm0, %v2151_v30 }
 0xdfe   :  { %v786_v33 = vpop.permute.xlu0 %785 }
 0xdff   :  { %2033 = vmatmul.msk.bf16.vlgmr.msrb.gmra.mxu1 %vm166_vm0, %v786_v33 }
 0xe00   :  { %1359 = vmatpush.bf16.msrb.mxu1 %v2780_v31 }
 0xe04   :  { %1360 = vmatpush.bf16.msrb.mxu1 %v2783_v32 }
 0xe0f   :  { %2099 = vmatmul.msk.bf16.vlgmr.msra.gmra.mxu1 %vm166_vm0, %v1144_v37  ;;  %v1080_v50 = vpop.f32.mrf.mxu3 }
 0xe10   :  { %1545 = vmatpush.bf16.msra.mxu1 %v2780_v31  ;;  %v1081_v52 = vadd.f32 %v2806_v51, %v1080_v50 }
 0xe14   :  { %1546 = vmatpush.bf16.msra.mxu1 %v2783_v32 }
 0xe17   :  { %v1082_v10 = vpop.f32.mrf.mxu3 }
 0xe18   :  { %v1083_v58 = vadd.f32 %v2806_v51, %v1082_v10 }
 0xe7c   :  { %v799_v41 = vpop.f32.mrf.mxu1 }
 0xe7d   :  { %v804_v42 = vadd.f32 %v799_v41, %v231_v40 }
 0xe7f   :  { %2244 = vtanh.f32 %v804_v42  ;;  %v806_v5 = vmul.f32 0.5, %v804_v42 }
 0xe84   :  { %v801_v45 = vpop.f32.mrf.mxu1 }
 0xe85   :  { %v2245_v46 = vpop.eup %2244  ;;  %v805_v48 = vadd.f32 %v801_v45, %v233_v44 }
 0xe86   :  { %820 = vrot.lane.b32.xlu1 %v2245_v46, %s2495_s29 }
 0xe87   :  { %2246 = vtanh.f32 %v805_v48  ;;  %v807_v0 = vmul.f32 0.5, %v805_v48 }
 0xe8c   :  { %v1169_v53 = vpop.f32.mrf.mxu1 }
 0xe8d   :  { %v2247_v55 = vpop.eup %2246  ;;  %v1174_v57 = vadd.f32 %v1169_v53, %v1081_v52 }
 0xe8e   :  { %822 = vrot.lane.b32.xlu2 %v2247_v55, %s2495_s29 }
 0xe8f   :  { %2248 = vtanh.f32 %v1174_v57  ;;  %v1176_v47 = vmul.f32 0.5, %v1174_v57 }
 0xe94   :  { %v1171_v59 = vpop.f32.mrf.mxu1 }
 0xe95   :  { %v2249_v60 = vpop.eup %2248  ;;  %v1175_v61 = vadd.f32 %v1171_v59, %v1083_v58 }
 0xe96   :  { %1198 = vrot.lane.b32.xlu0 %v2249_v60, %s2495_s29 }
 0xe97   :  { %2250 = vtanh.f32 %v1175_v61  ;;  %v1177_v17 = vmul.f32 0.5, %v1175_v61 }
 0xe98   :  { %2252 = vtanh.f32 %v807_v0 }
 0xe99   :  { %2254 = vtanh.f32 %v806_v5 }
 0xe9a   :  { %2256 = vtanh.f32 %v1176_v47 }
 0xe9b   :  { %2258 = vtanh.f32 %v1177_v17 }
 0xe9d   :  { %v2251_v62 = vpop.eup %2250 }
 0xe9e   :  { %1200 = vrot.lane.b32.xlu1 %v2251_v62, %s2495_s29  ;;  %v2253_v2 = vpop.eup %2252 }
 0xe9f   :  { %v811_v4 = vmul.f32 0.5, %v2253_v2  ;;  %v2255_v3 = vpop.eup %2254 }
 0xea0   :  { %v810_v12 = vmul.f32 0.5, %v2255_v3  ;;  %v2257_v18 = vpop.eup %2256 }
 0xea1   :  { %v813_v6 = vadd.f32 0.5, %v811_v4  ;;  %v1180_v20 = vmul.f32 0.5, %v2257_v18  ;;  %v2259_v22 = vpop.eup %2258 }
 0xea2   :  { %v812_v13 = vadd.f32 0.5, %v810_v12  ;;  %v1181_v26 = vmul.f32 0.5, %v2259_v22 }
 0xea3   :  { %v1182_v21 = vadd.f32 0.5, %v1180_v20  ;;  %v817_v39 = vmul.f32 %v813_v6, %v2746_v1 }
 0xea4   :  { %v1183_v28 = vadd.f32 0.5, %v1181_v26  ;;  %v816_v34 = vmul.f32 %v812_v13, %v2755_v14 }
 0xea6   :  { %1188 = vrot.lane.b32.xlu1 %v2089_v63, %s2499_s27 }
 0xee8   :  { %v823_v7 = vpop.permute.xlu2 %822 }
 0xee9   :  { %v827_v9 = vmul.f32 %v823_v7, %v813_v6 }
 0xeeb   :  { %832 = vrot.lane.b32.xlu0 %v827_v9, %s2499_s27 }
 0xef8   :  { %v821_v15 = vpop.permute.xlu1 %820 }
 0xef9   :  { %v826_v16 = vmul.f32 %v821_v15, %v812_v13  ;;  %v2146_v15 = vld [vmem:[%s3416_s0 + $0x38] sm:$0xff] }
 0xefa   :  { %2008 = vmatmul.msk.bf16.gmra.mxu0 %vm166_vm0, %v2146_v15 }
 0xefb   :  { %830 = vrot.lane.b32.xlu2 %v826_v16, %s2499_s27 }
 0xf03   :  { %1190 = vrot.lane.b32.xlu2 %v2090_v19, %s2499_s27 }
 0xf08   :  { %v1199_v49 = vpop.permute.xlu0 %1198 }
 0xf09   :  { %v1204_v25 = vmul.f32 %v1199_v49, %v1182_v21 }
 0xf0b   :  { %1208 = vrot.lane.b32.xlu0 %v1204_v25, %s2499_s27 }
 0xf10   :  { %v1201_v30 = vpop.permute.xlu1 %1200 }
 0xf11   :  { %v1205_v33 = vmul.f32 %v1201_v30, %v1183_v28 }
 0xf13   :  { %1210 = vrot.lane.b32.xlu1 %v1205_v33, %s2499_s27 }
 0xf18   :  { %v1189_v44 = vpop.permute.xlu1 %1188 }
 0xf19   :  { %v1194_v14 = vmul.f32 %v1189_v44, %v1182_v21 }
 0xf55   :  { %v831_v35 = vpop.permute.xlu2 %830 }
 0xf56   :  { %v2826_v37 = vadd.f32 %v831_v35, %v816_v34 }
 0xf58   :  { %2260 = vtanh.f32 %v2826_v37 }
 0xf5d   :  { %v833_v40 = vpop.permute.xlu0 %832  ;;  %v1191_v48 = vpop.permute.xlu2 %1190 }
 0xf5e   :  { %v2261_v41 = vpop.eup %2260  ;;  %v2830_v42 = vadd.f32 %v833_v40, %v817_v39  ;;  %v1195_v1 = vmul.f32 %v1191_v48, %v1183_v28 }
 0xf5f   :  { %842 = vrot.lane.b32.xlu2 %v2261_v41, %s2495_s29 }
 0xf60   :  { %2262 = vtanh.f32 %v2830_v42 }
 0xf66   :  { %v2263_v43 = vpop.eup %2262 }
 0xf67   :  { %844 = vrot.lane.b32.xlu0 %v2263_v43, %s2495_s29 }
 0xf7d   :  { %v1209_v45 = vpop.permute.xlu0 %1208 }
 0xf7e   :  { %v2835_v46 = vadd.f32 %v1209_v45, %v1194_v14 }
 0xf80   :  { %2264 = vtanh.f32 %v2835_v46 }
 0xf85   :  { %v1211_v50 = vpop.permute.xlu1 %1210 }
 0xf86   :  { %v2265_v52 = vpop.eup %2264  ;;  %v2838_v53 = vadd.f32 %v1211_v50, %v1195_v1 }
 0xf87   :  { %1220 = vrot.lane.b32.xlu1 %v2265_v52, %s2495_s29 }
 0xf88   :  { %2266 = vtanh.f32 %v2838_v53 }
 0xf8e   :  { %v2267_v55 = vpop.eup %2266 }
 0xf8f   :  { %1222 = vrot.lane.b32.xlu2 %v2267_v55, %s2495_s29  ;;  %434 = vrot.lane.b32.xlu1 %v2663_v27, %s2499_s27 }
 0xf97   :  { %436 = vrot.lane.b32.xlu2 %v2665_v29, %s2499_s27 }
 0xfb9   :  { %v843_v57 = vpop.permute.xlu2 %842 }
 0xfba   :  { %v848_v10 = vmul.f32 %v843_v57, %v812_v13 }
 0xfbc   :  { %v2847_v59 = vpack.c.bf16 %v848_v10, %v848_v10 }
 0xfbe   :  { %v866_v62 = vunpack.c.l.b16 %v2847_v59 }
 0xfd9   :  { %v845_v58 = vpop.permute.xlu0 %844 }
 0xfda   :  { %v849_v60 = vmul.f32 %v845_v58, %v813_v6 }
 0xfdc   :  { %v2849_v61 = vpack.c.bf16 %v849_v60, %v849_v60 }
 0xfde   :  { %v867_v63 = vunpack.c.l.b16 %v2849_v61 }
 0xfe0   :  { %v868_v0 = vpack.c.b16 %v867_v63, %v866_v62 }
 0xfe2   :  { %869 = vrot.lane.b32.xlu0 %v868_v0, %s2499_s27 }
 0xfe9   :  { %v1223_v2 = vpop.permute.xlu2 %1222 }
 0xfea   :  { %v2858_v29 = vmul.f32 %v1223_v2, %v1183_v28 }
 0xfec   :  { %v2862_v5 = vpack.c.bf16 %v2858_v29, %v2858_v29 }
 0xfee   :  { %v1253_v9 = vunpack.c.l.b16 %v2862_v5 }
 0xff1   :  { %v437_v27 = vpop.permute.xlu2 %436 }
 0xff2   :  { %2020 = vst.msk [vmem:[%s3426_s10 + $0xc] sm:$0xf] %vm356_vm1, %v437_v27 }
 0xff9   :  { %v1221_v4 = vpop.permute.xlu1 %1220 }
 0xffa   :  { %v2864_v6 = vmul.f32 %v1221_v4, %v1182_v21 }
 0xffc   :  { %v2868_v7 = vpack.c.bf16 %v2864_v6, %v2864_v6 }
 0xffe   :  { %v1252_v3 = vunpack.c.l.b16 %v2868_v7 }
0x1000   :  { %v1254_v12 = vpack.c.b16 %v1253_v9, %v1252_v3 }
0x1001   :  { %v435_v47 = vpop.permute.xlu1 %434 }
0x1002   :  { %2019 = vst.msk [vmem:[%s3426_s10 + $0x8] sm:$0xf] %vm356_vm1, %v435_v47  ;;  %1255 = vrot.lane.b32.xlu0 %v1254_v12, %s2499_s27 }
0x1009   :  { %v2152_v13 = vld [vmem:[%s3426_s10 + $0x8] sm:$0xff] }
0x100a   :  { %2080 = vmatmul.msk.bf16.gmra.mxu3 %vm166_vm0, %v2152_v13 }
0x1054   :  { %v870_v16 = vpop.permute.xlu0 %869 }
0x1055   :  { %2036 = vmatmul.msk.bf16.vlgmr.msrb.gmra.mxu2 %vm166_vm0, %v870_v16 }
0x1056   :  { %1452 = vmatpush.bf16.msrb.mxu2 %v2780_v31 }
0x105a   :  { %1453 = vmatpush.bf16.msrb.mxu2 %v2783_v32 }
0x1074   :  { %v1256_v17 = vpop.permute.xlu0 %1255 }
0x1075   :  { %2100 = vmatmul.msk.bf16.vlgmr.msra.gmra.mxu2 %vm166_vm0, %v1256_v17 }
0x1076   :  { %1638 = vmatpush.bf16.msra.mxu2 %v2780_v31 }
0x107a   :  { %1639 = vmatpush.bf16.msra.mxu2 %v2783_v32 }
0x108d   :  { %v1085_v20 = vpop.f32.mrf.mxu3 }
0x108e   :  { %v1086_v21 = vadd.f32 %v2806_v51, %v1085_v20 }
0x1095   :  { %v1087_v25 = vpop.f32.mrf.mxu3 }
0x1096   :  { %v1088_v26 = vadd.f32 %v2806_v51, %v1087_v25 }
0x10d8   :  { %v2891_v18 = vpop.f32.mrf.mxu2 }
0x10e0   :  { %v2893_v19 = vpop.f32.mrf.mxu2 }
0x10f8   :  { %v1269_v22 = vpop.f32.mrf.mxu2 }
0x10f9   :  { %v1274_v49 = vadd.f32 %v1269_v22, %v1086_v21 }
0x10fb   :  { %2268 = vtanh.f32 %v1274_v49  ;;  %v1276_v41 = vmul.f32 0.5, %v1274_v49 }
0x1100   :  { %v1271_v28 = vpop.f32.mrf.mxu2 }
0x1101   :  { %v2269_v30 = vpop.eup %2268  ;;  %v1275_v33 = vadd.f32 %v1271_v28, %v1088_v26 }
0x1102   :  { %1290 = vrot.lane.b32.xlu1 %v2269_v30, %s2495_s29 }
0x1103   :  { %2270 = vtanh.f32 %v1275_v33  ;;  %v1277_v35 = vmul.f32 0.5, %v1275_v33 }
0x1105   :  { %2272 = vtanh.f32 %v1277_v35 }
0x1106   :  { %2274 = vtanh.f32 %v1276_v41 }
0x1109   :  { %v2271_v34 = vpop.eup %2270 }
0x110a   :  { %1292 = vrot.lane.b32.xlu2 %v2271_v34, %s2495_s29 }
0x110b   :  { %v2273_v39 = vpop.eup %2272 }
0x110c   :  { %v1281_v40 = vmul.f32 0.5, %v2273_v39  ;;  %v2275_v45 = vpop.eup %2274 }
0x110d   :  { %v1280_v48 = vmul.f32 0.5, %v2275_v45 }
0x110e   :  { %v1283_v43 = vadd.f32 0.5, %v1281_v40 }
0x110f   :  { %v1282_v1 = vadd.f32 0.5, %v1280_v48 }
0x1110   :  { %v1287_v55 = vmul.f32 %v1283_v43, %v2838_v53 }
0x1164   :  { %v1293_v44 = vpop.permute.xlu2 %1292 }
0x1165   :  { %v1297_v14 = vmul.f32 %v1293_v44, %v1283_v43 }
0x1167   :  { %1302 = vrot.lane.b32.xlu1 %v1297_v14, %s2499_s27 }
0x116f   :  { %518 = vrot.lane.b32.xlu1 %v2685_v8, %s2499_s27  ;;  %v1286_v8 = vmul.f32 %v1282_v1, %v2835_v46 }
0x1174   :  { %v1291_v50 = vpop.permute.xlu1 %1290 }
0x1175   :  { %v1296_v52 = vmul.f32 %v1291_v50, %v1282_v1 }
0x1177   :  { %1300 = vrot.lane.b32.xlu0 %v1296_v52, %s2499_s27 }
0x11d9   :  { %v1303_v57 = vpop.permute.xlu1 %1302 }
0x11da   :  { %v1307_v10 = vadd.f32 %v1303_v57, %v1287_v55 }
0x11dc   :  { %2276 = vtanh.f32 %v1307_v10 }
0x11e1   :  { %v519_v58 = vpop.permute.xlu1 %518 }
0x11e2   :  { %v2277_v60 = vpop.eup %2276  ;;  %2022 = vst.msk [vmem:[%s3426_s10 + $0x10] sm:$0xf] %vm356_vm1, %v519_v58 }
0x11e3   :  { %1314 = vrot.lane.b32.xlu0 %v2277_v60, %s2495_s29 }
0x11e9   :  { %v1301_v62 = vpop.permute.xlu0 %1300 }
0x11ea   :  { %v1306_v63 = vadd.f32 %v1301_v62, %v1286_v8 }
0x11ec   :  { %2278 = vtanh.f32 %v1306_v63 }
0x11f2   :  { %v2279_v0 = vpop.eup %2278 }
0x11f3   :  { %1312 = vrot.lane.b32.xlu2 %v2279_v0, %s2495_s29 }
0x11fb   :  { %520 = vrot.lane.b32.xlu2 %v2687_v11, %s2499_s27 }
0x124d   :  { %v1313_v53 = vpop.permute.xlu2 %1312 }
0x124e   :  { %v2913_v2 = vmul.f32 %v1313_v53, %v1282_v1 }
0x1250   :  { %v2917_v9 = vpack.c.bf16 %v2913_v2, %v2913_v2 }
0x1252   :  { %v1345_v11 = vunpack.c.l.b16 %v2917_v9 }
0x1255   :  { %v521_v27 = vpop.permute.xlu2 %520  ;;  %v1315_v4 = vpop.permute.xlu0 %1314 }
0x1256   :  { %2023 = vst.msk [vmem:[%s3426_s10 + $0x14] sm:$0xf] %vm356_vm1, %v521_v27  ;;  %v2923_v46 = vmul.f32 %v1315_v4, %v1283_v43 }
0x1258   :  { %v2927_v3 = vpack.c.bf16 %v2923_v46, %v2923_v46 }
0x125a   :  { %v1346_v12 = vunpack.c.l.b16 %v2927_v3 }
0x125c   :  { %v1347_v47 = vpack.c.b16 %v1346_v12, %v1345_v11 }
0x125d   :  { %v2153_v13 = vld [vmem:[%s3426_s10 + $0x10] sm:$0xff] }
0x125e   :  { %1348 = vrot.lane.b32.xlu0 %v1347_v47, %s2499_s27  ;;  %2081 = vmatmul.msk.bf16.gmra.mxu3 %vm166_vm0, %v2153_v13 }
0x12d0   :  { %v1349_v15 = vpop.permute.xlu0 %1348 }
0x12d1   :  { %2105 = vmatmul.msk.bf16.vlgmr.msrb.gmra.mxu1 %vm166_vm0, %v1349_v15 }
0x12d2   :  { %1731 = vmatpush.bf16.msrb.mxu1 %v2780_v31 }
0x12d6   :  { %1732 = vmatpush.bf16.msrb.mxu1 %v2783_v32 }
0x12e1   :  { %v1090_v16 = vpop.f32.mrf.mxu3 }
0x12e2   :  { %v1091_v17 = vadd.f32 %v2806_v51, %v1090_v16 }
0x12e9   :  { %v1092_v22 = vpop.f32.mrf.mxu3 }
0x12ea   :  { %v1093_v49 = vadd.f32 %v2806_v51, %v1092_v22 }
0x134e   :  { %v1362_v20 = vpop.f32.mrf.mxu1 }
0x134f   :  { %v1367_v21 = vadd.f32 %v1362_v20, %v1091_v17 }
0x1351   :  { %2280 = vtanh.f32 %v1367_v21  ;;  %v1369_v39 = vmul.f32 0.5, %v1367_v21 }
0x1356   :  { %v1364_v25 = vpop.f32.mrf.mxu1 }
0x1357   :  { %v2281_v26 = vpop.eup %2280  ;;  %v1368_v28 = vadd.f32 %v1364_v25, %v1093_v49 }
0x1358   :  { %1383 = vrot.lane.b32.xlu1 %v2281_v26, %s2495_s29 }
0x1359   :  { %2282 = vtanh.f32 %v1368_v28  ;;  %v1370_v33 = vmul.f32 0.5, %v1368_v28 }
0x135b   :  { %2284 = vtanh.f32 %v1370_v33 }
0x135c   :  { %2286 = vtanh.f32 %v1369_v39 }
0x135f   :  { %v2283_v30 = vpop.eup %2282 }
0x1360   :  { %1385 = vrot.lane.b32.xlu2 %v2283_v30, %s2495_s29 }
0x1361   :  { %v2285_v34 = vpop.eup %2284 }
0x1362   :  { %v1374_v35 = vmul.f32 0.5, %v2285_v34  ;;  %v2287_v44 = vpop.eup %2286 }
0x1363   :  { %v1373_v14 = vmul.f32 0.5, %v2287_v44 }
0x1364   :  { %v1376_v40 = vadd.f32 0.5, %v1374_v35 }
0x1365   :  { %v1375_v45 = vadd.f32 0.5, %v1373_v14 }
0x1366   :  { %v1380_v50 = vmul.f32 %v1376_v40, %v1307_v10 }
0x1367   :  { %v1379_v60 = vmul.f32 %v1375_v45, %v1306_v63 }
0x13ba   :  { %v1386_v41 = vpop.permute.xlu2 %1385 }
0x13bb   :  { %v1390_v43 = vmul.f32 %v1386_v41, %v1376_v40 }
0x13bd   :  { %1395 = vrot.lane.b32.xlu1 %v1390_v43, %s2499_s27 }
0x13c5   :  { %602 = vrot.lane.b32.xlu1 %v2705_v54, %s2499_s27 }
0x13ca   :  { %v1384_v48 = vpop.permute.xlu1 %1383 }
0x13cb   :  { %v1389_v1 = vmul.f32 %v1384_v48, %v1375_v45 }
0x13cd   :  { %1393 = vrot.lane.b32.xlu0 %v1389_v1, %s2499_s27 }
0x142f   :  { %v1396_v52 = vpop.permute.xlu1 %1395 }
0x1430   :  { %v1400_v55 = vadd.f32 %v1396_v52, %v1380_v50 }
0x1432   :  { %2288 = vtanh.f32 %v1400_v55 }
0x1437   :  { %v603_v57 = vpop.permute.xlu1 %602 }
0x1438   :  { %v2289_v58 = vpop.eup %2288  ;;  %2025 = vst.msk [vmem:[%s3426_s10 + $0x18] sm:$0xf] %vm356_vm1, %v603_v57 }
0x1439   :  { %1407 = vrot.lane.b32.xlu0 %v2289_v58, %s2495_s29 }
0x143f   :  { %v1394_v54 = vpop.permute.xlu0 %1393 }
0x1440   :  { %v1399_v8 = vadd.f32 %v1394_v54, %v1379_v60 }
0x1442   :  { %2290 = vtanh.f32 %v1399_v8 }
0x1448   :  { %v2291_v62 = vpop.eup %2290 }
0x1449   :  { %1405 = vrot.lane.b32.xlu2 %v2291_v62, %s2495_s29 }
0x1451   :  { %604 = vrot.lane.b32.xlu2 %v2707_v56, %s2499_s27 }
0x14a3   :  { %v1406_v10 = vpop.permute.xlu2 %1405 }
0x14a4   :  { %v2955_v0 = vmul.f32 %v1406_v10, %v1375_v45 }
0x14a6   :  { %v2959_v4 = vpack.c.bf16 %v2955_v0, %v2955_v0 }
0x14a8   :  { %v1438_v56 = vunpack.c.l.b16 %v2959_v4 }
0x14ab   :  { %v605_v53 = vpop.permute.xlu2 %604  ;;  %v1408_v27 = vpop.permute.xlu0 %1407 }
0x14ac   :  { %2026 = vst.msk [vmem:[%s3426_s10 + $0x1c] sm:$0xf] %vm356_vm1, %v605_v53  ;;  %v2965_v63 = vmul.f32 %v1408_v27, %v1376_v40 }
0x14ae   :  { %v2969_v11 = vpack.c.bf16 %v2965_v63, %v2965_v63 }
0x14b0   :  { %v1439_v12 = vunpack.c.l.b16 %v2969_v11 }
0x14b2   :  { %v1440_v47 = vpack.c.b16 %v1439_v12, %v1438_v56 }
0x14b3   :  { %v2154_v13 = vld [vmem:[%s3426_s10 + $0x18] sm:$0xff] }
0x14b4   :  { %1441 = vrot.lane.b32.xlu0 %v1440_v47, %s2499_s27  ;;  %2082 = vmatmul.msk.bf16.gmra.mxu3 %vm166_vm0, %v2154_v13 }
0x1526   :  { %v1442_v15 = vpop.permute.xlu0 %1441 }
0x1527   :  { %2110 = vmatmul.msk.bf16.vlgmr.msrb.gmra.mxu2 %vm166_vm0, %v1442_v15 }
0x1528   :  { %1824 = vmatpush.bf16.msrb.mxu2 %v2780_v31 }
0x152c   :  { %1825 = vmatpush.bf16.msrb.mxu2 %v2783_v32 }
0x1537   :  { %v1095_v16 = vpop.f32.mrf.mxu3 }
0x1538   :  { %v1096_v17 = vadd.f32 %v2806_v51, %v1095_v16 }
0x153f   :  { %v1097_v22 = vpop.f32.mrf.mxu3 }
0x1540   :  { %v1098_v49 = vadd.f32 %v2806_v51, %v1097_v22 }
0x15aa   :  { %v1455_v20 = vpop.f32.mrf.mxu2 }
0x15ab   :  { %v1460_v21 = vadd.f32 %v1455_v20, %v1096_v17 }
0x15ad   :  { %2292 = vtanh.f32 %v1460_v21  ;;  %v1462_v34 = vmul.f32 0.5, %v1460_v21 }
0x15b2   :  { %v1457_v25 = vpop.f32.mrf.mxu2 }
0x15b3   :  { %v2293_v26 = vpop.eup %2292  ;;  %v1461_v28 = vadd.f32 %v1457_v25, %v1098_v49 }
0x15b4   :  { %1476 = vrot.lane.b32.xlu1 %v2293_v26, %s2495_s29 }
0x15b5   :  { %2294 = vtanh.f32 %v1461_v28  ;;  %v1463_v31 = vmul.f32 0.5, %v1461_v28 }
0x15b7   :  { %2296 = vtanh.f32 %v1463_v31 }
0x15b8   :  { %2298 = vtanh.f32 %v1462_v34 }
0x15bb   :  { %v2295_v30 = vpop.eup %2294 }
0x15bc   :  { %1478 = vrot.lane.b32.xlu2 %v2295_v30, %s2495_s29 }
0x15bd   :  { %v2297_v32 = vpop.eup %2296 }
0x15be   :  { %v1467_v33 = vmul.f32 0.5, %v2297_v32  ;;  %v2299_v41 = vpop.eup %2298 }
0x15bf   :  { %v1466_v43 = vmul.f32 0.5, %v2299_v41 }
0x15c0   :  { %v1469_v35 = vadd.f32 0.5, %v1467_v33 }
0x15c1   :  { %v1468_v44 = vadd.f32 0.5, %v1466_v43 }
0x15c2   :  { %v1473_v48 = vmul.f32 %v1469_v35, %v1400_v55 }
0x15c3   :  { %v1472_v58 = vmul.f32 %v1468_v44, %v1399_v8 }
0x1616   :  { %v1479_v39 = vpop.permute.xlu2 %1478 }
0x1617   :  { %v1483_v40 = vmul.f32 %v1479_v39, %v1469_v35 }
0x1619   :  { %1488 = vrot.lane.b32.xlu1 %v1483_v40, %s2499_s27 }
0x1621   :  { %686 = vrot.lane.b32.xlu1 %v2730_v36, %s2499_s27 }
0x1626   :  { %v1477_v14 = vpop.permute.xlu1 %1476 }
0x1627   :  { %v1482_v45 = vmul.f32 %v1477_v14, %v1468_v44 }
0x1629   :  { %1486 = vrot.lane.b32.xlu0 %v1482_v45, %s2499_s27 }
0x168b   :  { %v1489_v1 = vpop.permute.xlu1 %1488 }
0x168c   :  { %v1493_v50 = vadd.f32 %v1489_v1, %v1473_v48 }
0x168e   :  { %2300 = vtanh.f32 %v1493_v50 }
0x1693   :  { %v687_v52 = vpop.permute.xlu1 %686 }
0x1694   :  { %v2301_v57 = vpop.eup %2300  ;;  %2028 = vst.msk [vmem:[%s3426_s10 + $0x20] sm:$0xf] %vm356_vm1, %v687_v52 }
0x1695   :  { %1500 = vrot.lane.b32.xlu0 %v2301_v57, %s2495_s29 }
0x169b   :  { %v1487_v36 = vpop.permute.xlu0 %1486 }
0x169c   :  { %v1492_v60 = vadd.f32 %v1487_v36, %v1472_v58 }
0x169e   :  { %2302 = vtanh.f32 %v1492_v60 }
0x16a4   :  { %v2303_v54 = vpop.eup %2302 }
0x16a5   :  { %1498 = vrot.lane.b32.xlu2 %v2303_v54, %s2495_s29 }
0x16ad   :  { %688 = vrot.lane.b32.xlu2 %v2732_v38, %s2499_s27 }
0x16ff   :  { %v1499_v55 = vpop.permute.xlu2 %1498 }
0x1700   :  { %v2997_v62 = vmul.f32 %v1499_v55, %v1468_v44 }
0x1702   :  { %v3001_v27 = vpack.c.bf16 %v2997_v62, %v2997_v62 }
0x1704   :  { %v1531_v38 = vunpack.c.l.b16 %v3001_v27 }
0x1707   :  { %v689_v10 = vpop.permute.xlu2 %688  ;;  %v1501_v53 = vpop.permute.xlu0 %1500 }
0x1708   :  { %2029 = vst.msk [vmem:[%s3426_s10 + $0x24] sm:$0xf] %vm356_vm1, %v689_v10  ;;  %v3007_v8 = vmul.f32 %v1501_v53, %v1469_v35 }
0x170a   :  { %v3011_v56 = vpack.c.bf16 %v3007_v8, %v3007_v8 }
0x170c   :  { %v1532_v12 = vunpack.c.l.b16 %v3011_v56 }
0x170e   :  { %v1533_v47 = vpack.c.b16 %v1532_v12, %v1531_v38 }
0x170f   :  { %v2155_v13 = vld [vmem:[%s3426_s10 + $0x20] sm:$0xff] }
0x1710   :  { %1534 = vrot.lane.b32.xlu0 %v1533_v47, %s2499_s27  ;;  %2083 = vmatmul.msk.bf16.gmra.mxu3 %vm166_vm0, %v2155_v13 }
0x1782   :  { %v1535_v15 = vpop.permute.xlu0 %1534 }
0x1783   :  { %2115 = vmatmul.msk.bf16.vlgmr.msra.gmra.mxu1 %vm166_vm0, %v1535_v15 }
0x1793   :  { %v1100_v16 = vpop.f32.mrf.mxu3 }
0x1794   :  { %v1101_v17 = vadd.f32 %v2806_v51, %v1100_v16 }
0x179b   :  { %v1102_v22 = vpop.f32.mrf.mxu3 }
0x179c   :  { %v1103_v49 = vadd.f32 %v2806_v51, %v1102_v22 }
0x1800   :  { %v1548_v20 = vpop.f32.mrf.mxu1 }
0x1801   :  { %v1553_v21 = vadd.f32 %v1548_v20, %v1101_v17 }
0x1803   :  { %2304 = vtanh.f32 %v1553_v21  ;;  %v1555_v34 = vmul.f32 0.5, %v1553_v21 }
0x1808   :  { %v1550_v25 = vpop.f32.mrf.mxu1 }
0x1809   :  { %v2305_v26 = vpop.eup %2304  ;;  %v1554_v28 = vadd.f32 %v1550_v25, %v1103_v49 }
0x180a   :  { %1569 = vrot.lane.b32.xlu1 %v2305_v26, %s2495_s29 }
0x180b   :  { %2306 = vtanh.f32 %v1554_v28  ;;  %v1556_v31 = vmul.f32 0.5, %v1554_v28 }
0x180d   :  { %2308 = vtanh.f32 %v1556_v31 }
0x180e   :  { %2310 = vtanh.f32 %v1555_v34 }
0x1811   :  { %v2307_v30 = vpop.eup %2306 }
0x1812   :  { %1571 = vrot.lane.b32.xlu2 %v2307_v30, %s2495_s29 }
0x1813   :  { %v2309_v32 = vpop.eup %2308 }
0x1814   :  { %v1560_v33 = vmul.f32 0.5, %v2309_v32  ;;  %v2311_v41 = vpop.eup %2310 }
0x1815   :  { %v1559_v43 = vmul.f32 0.5, %v2311_v41 }
0x1816   :  { %v1562_v35 = vadd.f32 0.5, %v1560_v33 }
0x1817   :  { %v1561_v44 = vadd.f32 0.5, %v1559_v43  ;;  %v235_v43 = vpop.f32.mrf.mxu0 }
0x1818   :  { %v1566_v48 = vmul.f32 %v1562_v35, %v1493_v50 }
0x186c   :  { %v1572_v39 = vpop.permute.xlu2 %1571 }
0x186d   :  { %v1576_v40 = vmul.f32 %v1572_v39, %v1562_v35 }
0x186f   :  { %1581 = vrot.lane.b32.xlu1 %v1576_v40, %s2499_s27 }
0x1877   :  { %770 = vrot.lane.b32.xlu1 %v2765_v23, %s2499_s27  ;;  %v1565_v23 = vmul.f32 %v1561_v44, %v1492_v60 }
0x187c   :  { %v1570_v14 = vpop.permute.xlu1 %1569 }
0x187d   :  { %v1575_v45 = vmul.f32 %v1570_v14, %v1561_v44  ;;  %v2364_v14 = vld [vmem:[%s3421_s5] ss:$0 sm:$0xff]  ;;  %s1923_s5 = sshll.u32 %s2504_s28, 4  ;;  %s1924_s5 = int_to_ptr.vmem [resolvable:$true] %s1923_s5 }
0x187f   :  { %1579 = vrot.lane.b32.xlu0 %v1575_v45, %s2499_s27  ;;  %v236_v45 = vadd.f32 %v2364_v14, %v235_v43 }
0x18e1   :  { %v1582_v1 = vpop.permute.xlu1 %1581 }
0x18e2   :  { %v3029_v52 = vadd.f32 %v1582_v1, %v1566_v48  ;;  %v888_v1 = vadd.f32 %v2891_v18, %v236_v45 }
0x18e4   :  { %2312 = vtanh.f32 %v3029_v52 }
0x18e9   :  { %v771_v57 = vpop.permute.xlu1 %770 }
0x18ea   :  { %v2313_v58 = vpop.eup %2312  ;;  %2031 = vst.msk [vmem:[%s3426_s10 + $0x28] sm:$0xf] %vm356_vm1, %v771_v57 }
0x18eb   :  { %1593 = vrot.lane.b32.xlu0 %v2313_v58, %s2495_s29 }
0x18f1   :  { %v1580_v36 = vpop.permute.xlu0 %1579 }
0x18f2   :  { %v3037_v54 = vadd.f32 %v1580_v36, %v1565_v23 }
0x18f4   :  { %2314 = vtanh.f32 %v3037_v54 }
0x18fa   :  { %v2315_v50 = vpop.eup %2314 }
0x18fb   :  { %1591 = vrot.lane.b32.xlu2 %v2315_v50, %s2495_s29 }
0x1903   :  { %772 = vrot.lane.b32.xlu2 %v2771_v24, %s2499_s27 }
0x1955   :  { %v1592_v55 = vpop.permute.xlu2 %1591 }
0x1956   :  { %v3043_v10 = vmul.f32 %v1592_v55, %v1561_v44 }
0x1958   :  { %v3047_v12 = vpack.c.bf16 %v3043_v10, %v3043_v10 }
0x195a   :  { %v1624_v24 = vunpack.c.l.b16 %v3047_v12 }
0x195d   :  { %v773_v53 = vpop.permute.xlu2 %772  ;;  %v1594_v38 = vpop.permute.xlu0 %1593 }
0x195e   :  { %2032 = vst.msk [vmem:[%s3426_s10 + $0x2c] sm:$0xf] %vm356_vm1, %v773_v53  ;;  %v3053_v60 = vmul.f32 %v1594_v38, %v1562_v35 }
0x1960   :  { %v3057_v47 = vpack.c.bf16 %v3053_v60, %v3053_v60 }
0x1962   :  { %v1625_v13 = vunpack.c.l.b16 %v3057_v47 }
0x1964   :  { %v1626_v15 = vpack.c.b16 %v1625_v13, %v1624_v24 }
0x1965   :  { %v2156_v16 = vld [vmem:[%s3426_s10 + $0x28] sm:$0xff] }
0x1966   :  { %1627 = vrot.lane.b32.xlu0 %v1626_v15, %s2499_s27  ;;  %2084 = vmatmul.msk.bf16.gmra.mxu3 %vm166_vm0, %v2156_v16 }
0x19d8   :  { %v1628_v17 = vpop.permute.xlu0 %1627 }
0x19d9   :  { %2120 = vmatmul.msk.bf16.vlgmr.msra.gmra.mxu2 %vm166_vm0, %v1628_v17 }
0x19e9   :  { %v1105_v20 = vpop.f32.mrf.mxu3 }
0x19ea   :  { %v1106_v21 = vadd.f32 %v2806_v51, %v1105_v20  ;;  %v890_v20 = vmul.f32 0.5, %v888_v1 }
0x19f1   :  { %v1107_v25 = vpop.f32.mrf.mxu3 }
0x19f2   :  { %v1108_v26 = vadd.f32 %v2806_v51, %v1107_v25 }
0x1a5c   :  { %v1641_v22 = vpop.f32.mrf.mxu2 }
0x1a5d   :  { %v1646_v49 = vadd.f32 %v1641_v22, %v1106_v21 }
0x1a5f   :  { %2316 = vtanh.f32 %v1646_v49  ;;  %v1648_v39 = vmul.f32 0.5, %v1646_v49 }
0x1a64   :  { %v1643_v28 = vpop.f32.mrf.mxu2 }
0x1a65   :  { %v2317_v30 = vpop.eup %2316  ;;  %v1647_v31 = vadd.f32 %v1643_v28, %v1108_v26 }
0x1a66   :  { %1662 = vrot.lane.b32.xlu1 %v2317_v30, %s2495_s29 }
0x1a67   :  { %2318 = vtanh.f32 %v1647_v31  ;;  %v1649_v33 = vmul.f32 0.5, %v1647_v31 }
0x1a69   :  { %2320 = vtanh.f32 %v1649_v33 }
0x1a6a   :  { %2322 = vtanh.f32 %v1648_v39 }
0x1a6b   :  { %2324 = vtanh.f32 %v888_v1 }
0x1a6d   :  { %v2319_v32 = vpop.eup %2318 }
0x1a6e   :  { %1664 = vrot.lane.b32.xlu2 %v2319_v32, %s2495_s29 }
0x1a6f   :  { %v2321_v34 = vpop.eup %2320 }
0x1a70   :  { %v1653_v35 = vmul.f32 0.5, %v2321_v34  ;;  %v2323_v48 = vpop.eup %2322 }
0x1a71   :  { %v1652_v57 = vmul.f32 0.5, %v2323_v48  ;;  %v2325_v50 = vpop.eup %2324 }
0x1a72   :  { %v1655_v40 = vadd.f32 0.5, %v1653_v35 }
0x1a73   :  { %v1654_v58 = vadd.f32 0.5, %v1652_v57 }
0x1a74   :  { %v1659_v55 = vmul.f32 %v1655_v40, %v3029_v52  ;;  %v237_v52 = vpop.f32.mrf.mxu0 }
0x1a75   :  { %v238_v17 = vadd.f32 %v2364_v14, %v237_v52 }
0x1a77   :  { %v889_v21 = vadd.f32 %v2893_v19, %v238_v17 }
0x1a79   :  { %v891_v14 = vmul.f32 0.5, %v889_v21 }
0x1ac8   :  { %v1665_v41 = vpop.permute.xlu2 %1664 }
0x1ac9   :  { %v1669_v44 = vmul.f32 %v1665_v41, %v1655_v40 }
0x1acb   :  { %1674 = vrot.lane.b32.xlu1 %v1669_v44, %s2499_s27 }
0x1ad3   :  { %854 = vrot.lane.b32.xlu1 %v2847_v59, %s2499_s27  ;;  %v1658_v59 = vmul.f32 %v1654_v58, %v3037_v54 }
0x1ad8   :  { %v1663_v23 = vpop.permute.xlu1 %1662 }
0x1ad9   :  { %v1668_v36 = vmul.f32 %v1663_v23, %v1654_v58 }
0x1adb   :  { %1672 = vrot.lane.b32.xlu0 %v1668_v36, %s2499_s27  ;;  %904 = vrot.lane.b32.xlu1 %v2325_v50, %s2495_s29 }
0x1b3d   :  { %v1675_v53 = vpop.permute.xlu1 %1674 }
0x1b3e   :  { %v3081_v38 = vadd.f32 %v1675_v53, %v1659_v55 }
0x1b40   :  { %2326 = vtanh.f32 %v3081_v38 }
0x1b45   :  { %v855_v18 = vpop.permute.xlu1 %854 }
0x1b46   :  { %v2327_v24 = vpop.eup %2326  ;;  %2034 = vst.msk [vmem:[%s3426_s10 + $0x30] sm:$0xf] %vm356_vm1, %v855_v18 }
0x1b47   :  { %1686 = vrot.lane.b32.xlu0 %v2327_v24, %s2495_s29 }
0x1b4d   :  { %v1673_v13 = vpop.permute.xlu0 %1672  ;;  %v905_v25 = vpop.permute.xlu1 %904 }
0x1b4e   :  { %v3090_v15 = vadd.f32 %v1673_v13, %v1658_v59 }
0x1b50   :  { %2328 = vtanh.f32 %v3090_v15 }
0x1b51   :  { %2330 = vtanh.f32 %v890_v20 }
0x1b52   :  { %2332 = vtanh.f32 %v889_v21 }
0x1b53   :  { %2334 = vtanh.f32 %v891_v14 }
0x1b56   :  { %v2329_v16 = vpop.eup %2328 }
0x1b57   :  { %1684 = vrot.lane.b32.xlu2 %v2329_v16, %s2495_s29  ;;  %v2331_v22 = vpop.eup %2330 }
0x1b58   :  { %v2333_v54 = vpop.eup %2332  ;;  %v894_v49 = vmul.f32 0.5, %v2331_v22 }
0x1b59   :  { %v2335_v23 = vpop.eup %2334 }
0x1b5a   :  { %v3098_v26 = vadd.f32 0.5, %v894_v49  ;;  %v895_v18 = vmul.f32 0.5, %v2335_v23 }
0x1b5c   :  { %v910_v28 = vmul.f32 %v905_v25, %v3098_v26  ;;  %v900_v59 = vmul.f32 %v3098_v26, %v2826_v37  ;;  %v897_v13 = vadd.f32 0.5, %v895_v18 }
0x1b5f   :  { %856 = vrot.lane.b32.xlu2 %v2849_v61, %s2499_s27 }
0x1b67   :  { %906 = vrot.lane.b32.xlu2 %v2333_v54, %s2495_s29 }
0x1b6f   :  { %914 = vrot.lane.b32.xlu2 %v910_v28, %s2499_s27 }
0x1bb1   :  { %v1685_v30 = vpop.permute.xlu2 %1684 }
0x1bb2   :  { %v3102_v31 = vmul.f32 %v1685_v30, %v1654_v58 }
0x1bb4   :  { %v3106_v61 = vpack.c.bf16 %v3102_v31, %v3102_v31 }
0x1bb6   :  { %v1717_v35 = vunpack.c.l.b16 %v3106_v61 }
0x1bb9   :  { %v857_v19 = vpop.permute.xlu2 %856  ;;  %v1687_v32 = vpop.permute.xlu0 %1686 }
0x1bba   :  { %2035 = vst.msk [vmem:[%s3426_s10 + $0x34] sm:$0xf] %vm356_vm1, %v857_v19  ;;  %v3112_v33 = vmul.f32 %v1687_v32, %v1655_v40  ;;  %v901_v19 = vmul.f32 %v897_v13, %v2830_v42 }
0x1bbc   :  { %v3116_v34 = vpack.c.bf16 %v3112_v33, %v3112_v33 }
0x1bbe   :  { %v1718_v39 = vunpack.c.l.b16 %v3116_v34 }
0x1bc0   :  { %v1719_v41 = vpack.c.b16 %v1718_v39, %v1717_v35 }
0x1bc1   :  { %v2157_v43 = vld [vmem:[%s3426_s10 + $0x30] sm:$0xff]  ;;  %v907_v57 = vpop.permute.xlu2 %906 }
0x1bc2   :  { %1720 = vrot.lane.b32.xlu0 %v1719_v41, %s2499_s27  ;;  %2085 = vmatmul.msk.bf16.gmra.mxu3 %vm166_vm0, %v2157_v43  ;;  %v911_v16 = vmul.f32 %v907_v57, %v897_v13 }
0x1bc9   :  { %v915_v24 = vpop.permute.xlu2 %914 }
0x1bca   :  { %v3131_v52 = vadd.f32 %v915_v24, %v900_v59 }
0x1c34   :  { %v1721_v44 = vpop.permute.xlu0 %1720 }
0x1c35   :  { %2125 = vmatmul.msk.bf16.vlgmr.msrb.gmra.mxu1 %vm166_vm0, %v1721_v44 }
0x1c45   :  { %v1110_v40 = vpop.f32.mrf.mxu3 }
0x1c46   :  { %v1111_v45 = vadd.f32 %v2806_v51, %v1110_v40 }
0x1c4d   :  { %v1112_v58 = vpop.f32.mrf.mxu3 }
0x1c4e   :  { %v1113_v36 = vadd.f32 %v2806_v51, %v1112_v58 }
0x1cb2   :  { %v1734_v48 = vpop.f32.mrf.mxu1 }
0x1cb3   :  { %v1739_v1 = vadd.f32 %v1734_v48, %v1111_v45 }
0x1cb5   :  { %2336 = vtanh.f32 %v1739_v1  ;;  %v1741_v20 = vmul.f32 0.5, %v1739_v1 }
0x1cba   :  { %v1736_v50 = vpop.f32.mrf.mxu1 }
0x1cbb   :  { %v2337_v55 = vpop.eup %2336  ;;  %v1740_v53 = vadd.f32 %v1736_v50, %v1113_v36 }
0x1cbc   :  { %1755 = vrot.lane.b32.xlu0 %v2337_v55, %s2495_s29 }
0x1cbd   :  { %2338 = vtanh.f32 %v1740_v53  ;;  %v1742_v21 = vmul.f32 0.5, %v1740_v53 }
0x1cbe   :  { %2340 = vtanh.f32 %v3131_v52 }
0x1cbf   :  { %2342 = vtanh.f32 %v1741_v20 }
0x1cc0   :  { %2344 = vtanh.f32 %v1742_v21 }
0x1cc3   :  { %v2339_v17 = vpop.eup %2338 }
0x1cc4   :  { %916 = vrot.lane.b32.xlu0 %v911_v16, %s2499_s27  ;;  %1757 = vrot.lane.b32.xlu1 %v2339_v17, %s2495_s29  ;;  %v2341_v51 = vpop.eup %2340 }
0x1cc5   :  { %v2343_v22 = vpop.eup %2342 }
0x1cc6   :  { %v1745_v37 = vmul.f32 0.5, %v2343_v22  ;;  %v2345_v49 = vpop.eup %2344 }
0x1cc7   :  { %v1746_v30 = vmul.f32 0.5, %v2345_v49 }
0x1cc8   :  { %v1747_v54 = vadd.f32 0.5, %v1745_v37 }
0x1cc9   :  { %v1748_v32 = vadd.f32 0.5, %v1746_v30 }
0x1cca   :  { %v1751_v58 = vmul.f32 %v1747_v54, %v3090_v15 }
0x1ccb   :  { %v1752_v42 = vmul.f32 %v1748_v32, %v3081_v38 }
0x1ccc   :  { %926 = vrot.lane.b32.xlu0 %v2341_v51, %s2495_s29 }
0x1d2e   :  { %v1756_v25 = vpop.permute.xlu0 %1755 }
0x1d2f   :  { %v1761_v28 = vmul.f32 %v1756_v25, %v1747_v54  ;;  %v2365_v25 = vld [vmem:[%s3424_s8] ss:$0 sm:$0xff]  ;;  %s2503_s8 = smov 8  }
0x1d31   :  { %1765 = vrot.lane.b32.xlu1 %v1761_v28, %s2499_s27 }
0x1d36   :  { %v917_v35 = vpop.permute.xlu0 %916  ;;  %v1758_v39 = vpop.permute.xlu1 %1757 }
0x1d37   :  { %v3139_v41 = vadd.f32 %v917_v35, %v901_v19  ;;  %v1762_v43 = vmul.f32 %v1758_v39, %v1748_v32 }
0x1d39   :  { %2346 = vtanh.f32 %v3139_v41  ;;  %1767 = vrot.lane.b32.xlu2 %v1762_v43, %s2499_s27 }
0x1d3e   :  { %v927_v40 = vpop.permute.xlu0 %926 }
0x1d3f   :  { %v2347_v44 = vpop.eup %2346  ;;  %v932_v14 = vmul.f32 %v927_v40, %v3098_v26 }
0x1d40   :  { %928 = vrot.lane.b32.xlu1 %v2347_v44, %s2495_s29 }
0x1d41   :  { %v934_v45 = vpack.c.bf16 %v932_v14, %v932_v14 }
0x1d48   :  { %938 = vrot.lane.b32.xlu1 %v934_v45, %s2499_s27 }
0x1d93   :  { %v1768_v48 = vpop.permute.xlu2 %1767 }
0x1d94   :  { %v3147_v1 = vadd.f32 %v1768_v48, %v1752_v42 }
0x1d96   :  { %2348 = vtanh.f32 %v3147_v1 }
0x1d9c   :  { %v2349_v57 = vpop.eup %2348 }
0x1d9d   :  { %1779 = vrot.lane.b32.xlu0 %v2349_v57, %s2495_s29 }
0x1da3   :  { %v1766_v23 = vpop.permute.xlu1 %1765 }
0x1da4   :  { %v3152_v36 = vadd.f32 %v1766_v23, %v1751_v58 }
0x1da6   :  { %2350 = vtanh.f32 %v3152_v36 }
0x1dac   :  { %v2351_v26 = vpop.eup %2350 }
0x1dad   :  { %1777 = vrot.lane.b32.xlu2 %v2351_v26, %s2495_s29 }
0x1db2   :  { %v929_v50 = vpop.permute.xlu1 %928 }
0x1db3   :  { %v933_v38 = vmul.f32 %v929_v50, %v897_v13 }
0x1db5   :  { %v935_v55 = vpack.c.bf16 %v933_v38, %v933_v38 }
0x1db7   :  { %940 = vrot.lane.b32.xlu2 %v935_v55, %s2499_s27 }
0x1dba   :  { %v939_v53 = vpop.permute.xlu1 %938 }
0x1dbb   :  { %2037 = vst.msk [vmem:[%s3426_s10 + $0x38] sm:$0xf] %vm356_vm1, %v939_v53 }
0x1e07   :  { %v1778_v15 = vpop.permute.xlu2 %1777 }
0x1e08   :  { %v3161_v18 = vmul.f32 %v1778_v15, %v1747_v54 }
0x1e0a   :  { %v3165_v59 = vpack.c.bf16 %v3161_v18, %v3161_v18 }
0x1e0c   :  { %v1810_v51 = vunpack.c.l.b16 %v3165_v59 }
0x1e0f   :  { %v1780_v24 = vpop.permute.xlu0 %1779 }
0x1e10   :  { %v3167_v16 = vmul.f32 %v1780_v24, %v1748_v32 }
0x1e11   :  { %v941_v13 = vpop.permute.xlu2 %940 }
0x1e12   :  { %v3171_v17 = vpack.c.bf16 %v3167_v16, %v3167_v16  ;;  %2038 = vst.msk [vmem:[%s3426_s10 + $0x3c] sm:$0xf] %vm356_vm1, %v941_v13 }
0x1e14   :  { %v1811_v20 = vunpack.c.l.b16 %v3171_v17 }
0x1e16   :  { %v1812_v21 = vpack.c.b16 %v1811_v20, %v1810_v51 }
0x1e18   :  { %1813 = vrot.lane.b32.xlu0 %v1812_v21, %s2499_s27 }
0x1e19   :  { %v2158_v22 = vld [vmem:[%s3426_s10 + $0x38] sm:$0xff] }
0x1e1a   :  { %2086 = vmatmul.msk.bf16.gmra.mxu3 %vm166_vm0, %v2158_v22 }
0x1e20   :  { %951 = vrot.lane.b32.xlu0 %v933_v38, %s2499_s27 }
0x1e8a   :  { %v1814_v37 = vpop.permute.xlu0 %1813 }
0x1e8b   :  { %2130 = vmatmul.msk.bf16.vlgmr.msrb.gmra.mxu2 %vm166_vm0, %v1814_v37 }
0x1e92   :  { %v952_v54 = vpop.permute.xlu0 %951 }
0x1e93   :  { %956 = vst.msk [vmem:[#allocation9 + $0x8] sm:$0xff] %vm166_vm0, %v952_v54 }
0x1e9d   :  { %v1115_v49 = vpop.f32.mrf.mxu3 }
0x1e9e   :  { %v1116_v28 = vadd.f32 %v2365_v25, %v1115_v49 }
0x1ea5   :  { %v1117_v32 = vpop.f32.mrf.mxu3 }
0x1ea6   :  { %v1118_v35 = vadd.f32 %v2365_v25, %v1117_v32 }
0x1f0e   :  { %v1827_v30 = vpop.f32.mrf.mxu2 }
0x1f0f   :  { %v1832_v19 = vadd.f32 %v1827_v30, %v1116_v28 }
0x1f11   :  { %2352 = vtanh.f32 %v1832_v19 }
0x1f16   :  { %v1829_v39 = vpop.f32.mrf.mxu2 }
0x1f17   :  { %v2353_v43 = vpop.eup %2352  ;;  %v1833_v44 = vadd.f32 %v1829_v39, %v1118_v35 }
0x1f18   :  { %1848 = vrot.lane.b32.xlu1 %v2353_v43, %s2495_s29 }
0x1f19   :  { %2354 = vtanh.f32 %v1833_v44 }
0x1f1f   :  { %v2355_v40 = vpop.eup %2354 }
0x1f20   :  { %959 = vrot.lane.b32.xlu1 %v3131_v52, %s2500_s20  ;;  %1850 = vrot.lane.b32.xlu2 %v2355_v40, %s2495_s29  ;;  %v1835_v52 = vmul.f32 0.5, %v1833_v44 }
0x1f22   :  { %2356 = vtanh.f32 %v1835_v52 }
0x1f28   :  { %949 = vrot.lane.b32.xlu2 %v932_v14, %s2499_s27 }
0x1f30   :  { %961 = vrot.lane.b32.xlu2 %v3139_v41, %s2500_s20 }
0x1f38   :  { %1242 = vrot.lane.b32.xlu2 %v2864_v6, %s2499_s27  ;;  %v2357_v6 = vpop.eup %2356 }
0x1f39   :  { %v1839_v41 = vmul.f32 0.5, %v2357_v6 }
0x1f3b   :  { %v3211_v14 = vadd.f32 0.5, %v1839_v41 }
0x1f40   :  { %1326 = vrot.lane.b32.xlu2 %v2927_v3, %s2499_s27  ;;  %v1834_v3 = vmul.f32 0.5, %v1832_v19 }
0x1f42   :  { %2358 = vtanh.f32 %v1834_v3 }
0x1f48   :  { %1417 = vrot.lane.b32.xlu2 %v2959_v4, %s2499_s27 }
0x1f50   :  { %1419 = vrot.lane.b32.xlu2 %v2969_v11, %s2499_s27  ;;  %v2359_v11 = vpop.eup %2358 }
0x1f58   :  { %1510 = vrot.lane.b32.xlu2 %v3001_v27, %s2499_s27 }
0x1f60   :  { %1522 = vrot.lane.b32.xlu2 %v3007_v8, %s2499_s27  ;;  %v1838_v8 = vmul.f32 0.5, %v2359_v11 }
0x1f68   :  { %1613 = vrot.lane.b32.xlu2 %v3043_v10, %s2499_s27  ;;  %v3218_v10 = vadd.f32 0.5, %v1838_v8 }
0x1f7a   :  { %v1851_v4 = vpop.permute.xlu2 %1850 }
0x1f7b   :  { %v1855_v45 = vmul.f32 %v1851_v4, %v3211_v14 }
0x1f7d   :  { %1860 = vrot.lane.b32.xlu1 %v1855_v45, %s2499_s27 }
0x1f82   :  { %v950_v27 = vpop.permute.xlu2 %949 }
0x1f83   :  { %955 = vst.msk [vmem:[#allocation9] sm:$0xff] %vm166_vm0, %v950_v27 }
0x1f85   :  { %1234 = vrot.lane.b32.xlu1 %v2862_v5, %s2499_s27 }
0x1f8a   :  { %v1849_v42 = vpop.permute.xlu1 %1848  ;;  %v962_v48 = vpop.permute.xlu2 %961 }
0x1f8b   :  { %v1854_v57 = vmul.f32 %v1849_v42, %v3218_v10  ;;  %966 = vst.msk [vmem:[#allocation10 + $0x8] sm:$0xff] %vm166_vm0, %v962_v48 }
0x1f8d   :  { %1858 = vrot.lane.b32.xlu0 %v1854_v57, %s2499_s27  ;;  %1324 = vrot.lane.b32.xlu1 %v2917_v9, %s2499_s27 }
0x1f92   :  { %v960_v58 = vpop.permute.xlu1 %959  ;;  %v1243_v23 = vpop.permute.xlu2 %1242 }
0x1f93   :  { %965 = vst.msk [vmem:[#allocation10] sm:$0xff] %vm166_vm0, %v960_v58 }
0x1f94   :  { %1248 = vst.msk [vmem:[%s3425_s9] sm:$0xff] %vm166_vm0, %v1243_v23 }
0x1f95   :  { %1232 = vrot.lane.b32.xlu0 %v2868_v7, %s2499_s27  ;;  %1336 = vrot.lane.b32.xlu1 %v2923_v46, %s2499_s27 }
0x1f9a   :  { %v1327_v5 = vpop.permute.xlu2 %1326 }
0x1f9b   :  { %2102 = vst.msk [vmem:[%s3426_s10 + $0xc] sm:$0xf] %vm356_vm1, %v1327_v5 }
0x1f9d   :  { %1244 = vrot.lane.b32.xlu0 %v2858_v29, %s2499_s27  ;;  %1429 = vrot.lane.b32.xlu1 %v2965_v63, %s2499_s27 }
0x1fa2   :  { %v1418_v9 = vpop.permute.xlu2 %1417 }
0x1fa3   :  { %2106 = vst.msk [vmem:[%s3426_s10 + $0x10] sm:$0xf] %vm356_vm1, %v1418_v9 }
0x1fa5   :  { %1334 = vrot.lane.b32.xlu0 %v2913_v2, %s2499_s27  ;;  %1520 = vrot.lane.b32.xlu1 %v2997_v62, %s2499_s27 }
0x1faa   :  { %v1420_v7 = vpop.permute.xlu2 %1419 }
0x1fab   :  { %2107 = vst.msk [vmem:[%s3426_s10 + $0x14] sm:$0xf] %vm356_vm1, %v1420_v7 }
0x1fad   :  { %1427 = vrot.lane.b32.xlu0 %v2955_v0, %s2499_s27  ;;  %v1845_v0 = vmul.f32 %v3211_v14, %v3147_v1  ;;  %v1844_v1 = vmul.f32 %v3218_v10, %v3152_v36 }
0x1fb2   :  { %v1511_v29 = vpop.permute.xlu2 %1510 }
0x1fb3   :  { %2111 = vst.msk [vmem:[%s3426_s10 + $0x18] sm:$0xf] %vm356_vm1, %v1511_v29 }
0x1fb5   :  { %1512 = vrot.lane.b32.xlu0 %v3011_v56, %s2499_s27 }
0x1fba   :  { %v1523_v2 = vpop.permute.xlu2 %1522 }
0x1fbb   :  { %2114 = vst.msk [vmem:[%s3425_s9 + $0x38] sm:$0xff] %vm166_vm0, %v1523_v2 }
0x1fc2   :  { %v1614_v46 = vpop.permute.xlu2 %1613 }
0x1fc3   :  { %2118 = vst.msk [vmem:[%s3425_s9 + $0x40] sm:$0xff] %vm166_vm0, %v1614_v46 }
0x1fef   :  { %v1861_v63 = vpop.permute.xlu1 %1860 }
0x1ff0   :  { %v1865_v62 = vadd.f32 %v1861_v63, %v1845_v0 }
0x1ff2   :  { %2360 = vtanh.f32 %v1865_v62  ;;  %1908 = vrot.lane.b32.xlu2 %v1865_v62, %s2500_s20 }
0x1ff7   :  { %v1235_v56 = vpop.permute.xlu1 %1234 }
0x1ff8   :  { %v2361_v26 = vpop.eup %2360  ;;  %1239 = vst.msk [vmem:[%s3426_s10 + $0x4] sm:$0xf] %vm356_vm1, %v1235_v56 }
0x1ff9   :  { %1872 = vrot.lane.b32.xlu1 %v2361_v26, %s2495_s29 }
0x1ffa   :  { %1708 = vrot.lane.b32.xlu2 %v3112_v33, %s2499_s27 }
0x1fff   :  { %v1325_v50 = vpop.permute.xlu1 %1324  ;;  %v1859_v38 = vpop.permute.xlu0 %1858 }
0x2000   :  { %2101 = vst.msk [vmem:[%s3426_s10 + $0x8] sm:$0xf] %vm356_vm1, %v1325_v50  ;;  %v1864_v55 = vadd.f32 %v1859_v38, %v1844_v1 }
0x2001   :  { %1605 = vrot.lane.b32.xlu1 %v3057_v47, %s2499_s27 }
0x2002   :  { %2362 = vtanh.f32 %v1864_v55  ;;  %1799 = vrot.lane.b32.xlu2 %v3161_v18, %s2499_s27 }
0x2007   :  { %v1337_v53 = vpop.permute.xlu1 %1336  ;;  %v1233_v33 = vpop.permute.xlu0 %1232 }
0x2008   :  { %v2363_v15 = vpop.eup %2362  ;;  %2104 = vst.msk [vmem:[%s3425_s9 + $0x18] sm:$0xff] %vm166_vm0, %v1337_v53 }
0x2009   :  { %1238 = vst.msk [vmem:[%s3426_s10] sm:$0xf] %vm356_vm1, %v1233_v33  ;;  %1696 = vrot.lane.b32.xlu1 %v3106_v61, %s2499_s27  ;;  %1870 = vrot.lane.b32.xlu0 %v2363_v15, %s2495_s29 }
0x200f   :  { %v1430_v47 = vpop.permute.xlu1 %1429  ;;  %v1245_v36 = vpop.permute.xlu0 %1244 }
0x2010   :  { %2109 = vst.msk [vmem:[%s3425_s9 + $0x28] sm:$0xff] %vm166_vm0, %v1430_v47 }
0x2011   :  { %1249 = vst.msk [vmem:[%s3425_s9 + $0x8] sm:$0xff] %vm166_vm0, %v1245_v36  ;;  %1906 = vrot.lane.b32.xlu1 %v1864_v55, %s2500_s20  ;;  %1603 = vrot.lane.b32.xlu0 %v3047_v12, %s2499_s27 }
0x2017   :  { %v1521_v61 = vpop.permute.xlu1 %1520  ;;  %v1335_v18 = vpop.permute.xlu0 %1334 }
0x2018   :  { %2113 = vst.msk [vmem:[%s3425_s9 + $0x30] sm:$0xff] %vm166_vm0, %v1521_v61 }
0x2019   :  { %2103 = vst.msk [vmem:[%s3425_s9 + $0x10] sm:$0xff] %vm166_vm0, %v1335_v18  ;;  %1706 = vrot.lane.b32.xlu1 %v3102_v31, %s2499_s27  ;;  %1615 = vrot.lane.b32.xlu0 %v3053_v60, %s2499_s27 }
0x201f   :  { %v1428_v24 = vpop.permute.xlu0 %1427 }
0x2020   :  { %2108 = vst.msk [vmem:[%s3425_s9 + $0x20] sm:$0xff] %vm166_vm0, %v1428_v24 }
0x2021   :  { %1791 = vrot.lane.b32.xlu1 %v3171_v17, %s2499_s27  ;;  %1698 = vrot.lane.b32.xlu0 %v3116_v34, %s2499_s27 }
0x2027   :  { %v1513_v12 = vpop.permute.xlu0 %1512 }
0x2028   :  { %2112 = vst.msk [vmem:[%s3426_s10 + $0x1c] sm:$0xf] %vm356_vm1, %v1513_v12 }
0x2029   :  { %1789 = vrot.lane.b32.xlu0 %v3165_v59, %s2499_s27 }
0x204c   :  { %v1909_v60 = vpop.permute.xlu2 %1908 }
0x204d   :  { %1914 = vst.msk [vmem:[#allocation10 + $0x18] sm:$0xff] %vm166_vm0, %v1909_v60 }
0x2054   :  { %v1709_v31 = vpop.permute.xlu2 %1708 }
0x2055   :  { %2124 = vst.msk [vmem:[%s3425_s9 + $0x58] sm:$0xff] %vm166_vm0, %v1709_v31 }
0x205c   :  { %v1800_v13 = vpop.permute.xlu2 %1799 }
0x205d   :  { %2128 = vst.msk [vmem:[%s3425_s9 + $0x60] sm:$0xff] %vm166_vm0, %v1800_v13 }
0x206b   :  { %v1873_v34 = vpop.permute.xlu1 %1872 }
0x206c   :  { %v1877_v17 = vmul.f32 %v1873_v34, %v3211_v14 }
0x206e   :  { %1894 = vrot.lane.b32.xlu0 %v1877_v17, %s2499_s27  ;;  %v1879_v54 = vpack.c.bf16 %v1877_v17, %v1877_v17 }
0x2073   :  { %v1606_v59 = vpop.permute.xlu1 %1605 }
0x2074   :  { %2117 = vst.msk [vmem:[%s3426_s10 + $0x24] sm:$0xf] %vm356_vm1, %v1606_v59 }
0x2076   :  { %1801 = vrot.lane.b32.xlu0 %v3167_v16, %s2499_s27 }
0x207b   :  { %v1697_v51 = vpop.permute.xlu1 %1696  ;;  %v1871_v20 = vpop.permute.xlu0 %1870 }
0x207c   :  { %2121 = vst.msk [vmem:[%s3426_s10 + $0x28] sm:$0xf] %vm356_vm1, %v1697_v51  ;;  %v1876_v21 = vmul.f32 %v1871_v20, %v3218_v10 }
0x207e   :  { %v1878_v22 = vpack.c.bf16 %v1876_v21, %v1876_v21  ;;  %1892 = vrot.lane.b32.xlu2 %v1876_v21, %s2499_s27 }
0x2080   :  { %1882 = vrot.lane.b32.xlu1 %v1878_v22, %s2499_s27 }
0x2083   :  { %v1907_v16 = vpop.permute.xlu1 %1906  ;;  %v1604_v37 = vpop.permute.xlu0 %1603 }
0x2084   :  { %1913 = vst.msk [vmem:[#allocation10 + $0x10] sm:$0xff] %vm166_vm0, %v1907_v16 }
0x2085   :  { %2116 = vst.msk [vmem:[%s3426_s10 + $0x20] sm:$0xf] %vm356_vm1, %v1604_v37 }
0x2086   :  { %1884 = vrot.lane.b32.xlu2 %v1879_v54, %s2499_s27 }
0x2087   :  { %1944 = dma.vmem_to_hbm [thread:$0]  %s1937_s1, 512, %s1939_s4, [#allocation11], %s2502_s2, %s2502_s2, %s2503_s8  }
0x208b   :  { %v1707_v49 = vpop.permute.xlu1 %1706  ;;  %v1616_v25 = vpop.permute.xlu0 %1615 }
0x208c   :  { %2123 = vst.msk [vmem:[%s3425_s9 + $0x50] sm:$0xff] %vm166_vm0, %v1707_v49 }
0x208d   :  { %2119 = vst.msk [vmem:[%s3425_s9 + $0x48] sm:$0xff] %vm166_vm0, %v1616_v25 }
0x2093   :  { %v1792_v28 = vpop.permute.xlu1 %1791  ;;  %v1699_v30 = vpop.permute.xlu0 %1698 }
0x2094   :  { %2127 = vst.msk [vmem:[%s3426_s10 + $0x34] sm:$0xf] %vm356_vm1, %v1792_v28 }
0x2095   :  { %2122 = vst.msk [vmem:[%s3426_s10 + $0x2c] sm:$0xf] %vm356_vm1, %v1699_v30 }
0x209b   :  { %v1790_v19 = vpop.permute.xlu0 %1789 }
0x209c   :  { %2126 = vst.msk [vmem:[%s3426_s10 + $0x30] sm:$0xf] %vm356_vm1, %v1790_v19 }
0x20d8   :  { %v1893_v32 = vpop.permute.xlu2 %1892 }
0x20d9   :  { %2133 = vst.msk [vmem:[%s3425_s9 + $0x70] sm:$0xff] %vm166_vm0, %v1893_v32 }
0x20da   :  { %1902 = vst.msk [vmem:[#allocation9 + $0x10] sm:$0xff] %vm166_vm0, %v1893_v32 }
0x20e0   :  { %v1885_v35 = vpop.permute.xlu2 %1884  ;;  %v1895_v39 = vpop.permute.xlu0 %1894 }
0x20e1   :  { %2132 = vst.msk [vmem:[%s3426_s10 + $0x3c] sm:$0xf] %vm356_vm1, %v1885_v35 }
0x20e2   :  { %2134 = vst.msk [vmem:[%s3425_s9 + $0x78] sm:$0xff] %vm166_vm0, %v1895_v39 }
0x20e3   :  { %1903 = vst.msk [vmem:[#allocation9 + $0x18] sm:$0xff] %vm166_vm0, %v1895_v39 }
0x20e4   :  { %1931 = dma.vmem_to_hbm [thread:$0]  %s1924_s5, 512, %s1926_s14, [#allocation5], %s2502_s2, %s2502_s2, %s2503_s8  }
0x20e8   :  { %v1802_v43 = vpop.permute.xlu0 %1801 }
0x20e9   :  { %2129 = vst.msk [vmem:[%s3425_s9 + $0x68] sm:$0xff] %vm166_vm0, %v1802_v43 }
0x20f2   :  { %v1883_v44 = vpop.permute.xlu1 %1882 }
0x20f3   :  { %2131 = vst.msk [vmem:[%s3426_s10 + $0x38] sm:$0xf] %vm356_vm1, %v1883_v44 }
0x20f4   :  { %2490 = dma.done.wait [#allocation5], 512  }
0x20f5   :  { %2491 = vsyncadd [#allocation5], 4294966784 }
0x20f6   :  { %2492 = dma.done.wait [#allocation11], 512  }
0x20f7   :  { %2493 = vsyncadd [#allocation11], 4294966784 }
0x20f8   :  { %1957 = vsyncpa [#allocation4], 1 }
0x20f9   :  { %1958 = vsyncpa [#allocation7], 1 }
0x20fa   :  { %1959 = vsyncpa [#allocation5], 1 }
0x20fb   :  { %1960 = vsyncpa [#allocation11], 1 }

</bundles_post_ra>
